<compile_context>
chip_gen: v7x
topology: tpu7x:2x2x1
jax: 0.10.0
libtpu: 0.0.40
codegen_flags: <defaults>
</compile_context>

<pallas_src>
import functools
import math

import jax
import jax.numpy as jnp
from jax.experimental import pallas as pl
from jax.experimental.pallas import tpu as pltpu

BN_EPS = 1e-3
_SMALL_ROWS = 64                 # layers with <= this many rows run as plain jnp
_VMEM_LIMIT = 32 * 1024 * 1024   # explicit scoped-VMEM bound (safe on all gens)

try:
    _DEVICE_KIND = jax.devices()[0].device_kind.lower()
except Exception:                # pragma: no cover
    _DEVICE_KIND = ""
_TN_PREF = 128 if "v5" in _DEVICE_KIND else 256   # v5: 128-wide MXU, 1 vst slot
_TK_PREF = 512
_TM_PREF = 256


# --------------------------------------------------------------------------
# Tile selection helpers
# --------------------------------------------------------------------------
def _pick_tile(dim, pref, align):
    """Largest tile <= pref that is a multiple of `align` and divides `dim`,
    falling back to the full dim (legal: block dim == full array dim)."""
    if dim <= pref:
        return dim
    t = (pref // align) * align
    while t >= align:
        if dim % t == 0:
            return t
        t -= align
    return dim


def _pick_row_tile(rows, pref=_TM_PREF):
    """Row tile that yields >=2 row blocks when possible (feeds both v7x TCs)."""
    if rows >= 16:
        pref = min(pref, max(8, ((rows // 2) // 8) * 8))
    return _pick_tile(rows, pref, 8)


def _cpad(c):
    """Lane-dense channel width: pad sub-128 channel counts up to 128."""
    return 128 if c < 128 else c


# --------------------------------------------------------------------------
# Pallas kernels
# --------------------------------------------------------------------------
def _mm_kernel(act, has_res, has_gate, *refs):
    """Tiled matmul + folded BN + activation (+ fused SE gate / residual) with
    an f32 VMEM accumulator; K is the last ("arbitrary") grid axis.
    Operands/outputs are bf16, all epilogue math is f32."""
    a_ref, b_ref, s_ref, c_ref, *rest = refs
    idx = 0
    g_ref = None
    r_ref = None
    if has_gate:
        g_ref = rest[idx]
        idx += 1
    if has_res:
        r_ref = rest[idx]
        idx += 1
    o_ref = rest[idx]
    acc_ref = rest[idx + 1]

    k = pl.program_id(2)

    @pl.when(k == 0)
    def _():
        acc_ref[...] = jnp.zeros_like(acc_ref)

    a = a_ref[...]
    if has_gate:
        # SE channel gate rides the otherwise-idle VPU slots under the MXU.
        a = (a.astype(jnp.float32) * g_ref[0]).astype(jnp.bfloat16)
    acc_ref[...] += jnp.dot(a, b_ref[...], preferred_element_type=jnp.float32)

    @pl.when(k == pl.num_programs(2) - 1)
    def _():
        y = acc_ref[...] * s_ref[...] + c_ref[...]
        if act == "silu":
            y = y * jax.nn.sigmoid(y)
        if has_res:
            y = y + r_ref[...].astype(jnp.float32)
        o_ref[...] = y.astype(o_ref.dtype)


@functools.lru_cache(maxsize=None)
def _mm_bn_act(P, K, C, tm, tk, tn, act, has_res, has_gate, bpi):
    grid = (P // tm, C // tn, K // tk)
    in_specs = [
        pl.BlockSpec((tm, tk), lambda i, j, k: (i, k)),
        pl.BlockSpec((tk, tn), lambda i, j, k: (k, j)),
        pl.BlockSpec((1, tn), lambda i, j, k: (0, j)),
        pl.BlockSpec((1, tn), lambda i, j, k: (0, j)),
    ]
    if has_gate:
        # gate is (N, 1, K); row-block i lies inside image i // bpi.
        in_specs.append(pl.BlockSpec((1, 1, tk), lambda i, j, k: (i // bpi, 0, k)))
    if has_res:
        in_specs.append(pl.BlockSpec((tm, tn), lambda i, j, k: (i, j)))
    return pl.pallas_call(
        functools.partial(_mm_kernel, act, has_res, has_gate),
        out_shape=jax.ShapeDtypeStruct((P, C), jnp.bfloat16),
        grid=grid,
        in_specs=in_specs,
        out_specs=pl.BlockSpec((tm, tn), lambda i, j, k: (i, j)),
        scratch_shapes=[pltpu.VMEM((tm, tn), jnp.float32)],
        compiler_params=pltpu.CompilerParams(
            dimension_semantics=("parallel", "parallel", "arbitrary"),
            vmem_limit_bytes=_VMEM_LIMIT),
    )


def _dw_kernel(T, p_ref, w_ref, s_ref, c_ref, o_ref):
    """Depthwise conv (pre-gathered bf16 taps) + folded BN + SiLU on a
    (rows, channels) tile.  p_ref: (T, tm, tc) bf16; w_ref: (T, 1, tc) f32."""
    acc = p_ref[0].astype(jnp.float32) * w_ref[0]
    for t in range(1, T):
        acc = acc + p_ref[t].astype(jnp.float32) * w_ref[t]
    y = acc * s_ref[...] + c_ref[...]
    y = y * jax.nn.sigmoid(y)
    o_ref[...] = y.astype(o_ref.dtype)


@functools.lru_cache(maxsize=None)
def _dw_bn_silu(T, P, C, tm, tc):
    return pl.pallas_call(
        functools.partial(_dw_kernel, T),
        out_shape=jax.ShapeDtypeStruct((P, C), jnp.bfloat16),
        grid=(P // tm, C // tc),
        in_specs=[pl.BlockSpec((T, tm, tc), lambda i, j: (0, i, j)),
                  pl.BlockSpec((T, 1, tc), lambda i, j: (0, 0, j)),
                  pl.BlockSpec((1, tc), lambda i, j: (0, j)),
                  pl.BlockSpec((1, tc), lambda i, j: (0, j))],
        out_specs=pl.BlockSpec((tm, tc), lambda i, j: (i, j)),
        compiler_params=pltpu.CompilerParams(
            dimension_semantics=("parallel", "parallel"),
            vmem_limit_bytes=_VMEM_LIMIT),
    )


# --------------------------------------------------------------------------
# Glue (im2col, layer wrappers) — plain JAX under the single outer jit
# --------------------------------------------------------------------------
def _shifted_windows(x, k, stride):
    """x: (N,H,W,C) bf16 -> list of k*k shifted strided views, PyTorch padding."""
    N, H, W, C = x.shape
    pad = (k - 1) // 2
    xp = jnp.pad(x, ((0, 0), (pad, pad), (pad, pad), (0, 0)))
    Ho = (H + 2 * pad - k) // stride + 1
    Wo = (W + 2 * pad - k) // stride + 1
    cols = [xp[:, dy:dy + (Ho - 1) * stride + 1:stride,
                  dx:dx + (Wo - 1) * stride + 1:stride, :]
            for dy in range(k) for dx in range(k)]
    return cols, Ho, Wo


def conv_bn_act(x, w, scale, bias, *, kernel, stride, act, residual=None, gate=None):
    """Conv2d(bias=False) + folded BN + activation (+ fused SE gate / residual).
    x/residual bf16; weights bf16; scale/bias/gate f32; returns bf16."""
    N, H, W, Cin = x.shape
    Cout = w.shape[-1]
    if kernel == 1:
        Ho, Wo = H, W
        a4 = x
    else:
        cols, Ho, Wo = _shifted_windows(x, kernel, stride)
        a4 = jnp.concatenate(cols, axis=-1)          # bf16 patches (N,Ho,Wo,kk*Cin)
    P = N * Ho * Wo
    K = a4.shape[-1]
    a = a4.reshape(P, K)
    res2 = residual.reshape(P, Cout) if residual is not None else None

    # Tiny-row layers: MXU nearly empty + per-step overhead dominates -> jnp.
    if P <= _SMALL_ROWS:
        af = a.astype(jnp.float32)
        if gate is not None:
            af = af * jnp.repeat(gate, Ho * Wo, axis=0)
        y = jnp.dot(af.astype(jnp.bfloat16), w, preferred_element_type=jnp.float32)
        y = y * scale + bias
        if act == "silu":
            y = y * jax.nn.sigmoid(y)
        if res2 is not None:
            y = y + res2.astype(jnp.float32)
        return y.astype(jnp.bfloat16).reshape(N, Ho, Wo, Cout)

    # Safety valve: keep the K tile bounded (no oversized full-dim fallback).
    if K > _TK_PREF and K % 128 != 0:
        Kp = ((K + 127) // 128) * 128
        a = jnp.pad(a, ((0, 0), (0, Kp - K)))
        w = jnp.pad(w, ((0, Kp - K), (0, 0)))
        if gate is not None:
            gate = jnp.pad(gate, ((0, 0), (0, Kp - K)))
        K = Kp

    has_gate = gate is not None
    if has_gate and (Ho * Wo) % 8 != 0:
        # gate fusion needs row tiles that stay within one image; fall back.
        a = (a.astype(jnp.float32) *
             jnp.repeat(gate, Ho * Wo, axis=0)).astype(jnp.bfloat16)
        has_gate = False

    if has_gate:
        tm = _pick_row_tile(Ho * Wo)
        bpi = (Ho * Wo) // tm
    else:
        tm = _pick_row_tile(P)
        bpi = 1
    tk = _pick_tile(K, _TK_PREF, 128)
    tn = _pick_tile(Cout, _TN_PREF, 128)

    args = [a, w, scale.reshape(1, Cout), bias.reshape(1, Cout)]
    if has_gate:
        args.append(gate.reshape(N, 1, K))
    if res2 is not None:
        args.append(res2)
    fn = _mm_bn_act(P, K, Cout, tm, tk, tn, act, res2 is not None, has_gate, bpi)
    return fn(*args).reshape(N, Ho, Wo, Cout)


def depthwise_bn_silu(x, w, scale, bias, *, kernel, stride):
    N, H, W, C = x.shape
    cols, Ho, Wo = _shifted_windows(x, kernel, stride)
    T = kernel * kernel
    P = N * Ho * Wo
    taps = jnp.stack(cols, axis=0).reshape(T, P, C)            # bf16
    if P <= _SMALL_ROWS:
        y = (taps.astype(jnp.float32) * w.reshape(T, 1, C)).sum(axis=0)
        y = y * scale + bias
        y = y * jax.nn.sigmoid(y)
        return y.astype(jnp.bfloat16).reshape(N, Ho, Wo, C)
    # TODO(synk): tap stacking still materializes (T,P,C) in HBM for large P.
    tm = _pick_row_tile(P, pref=64)
    tc = _pick_tile(C, 256, 128)
    y = _dw_bn_silu(T, P, C, tm, tc)(
        taps, w.reshape(T, 1, C), scale.reshape(1, C), bias.reshape(1, C))
    return y.reshape(N, Ho, Wo, C)


def se_gate(x, w1, b1, w2, b2):
    """torchvision SqueezeExcitation squeeze path -> per-(image, channel) gate.
    N=2 rows, so this is plain jnp under the outer jit; the gate itself is
    applied inside the project matmul (Pallas) or fused by XLA (jnp path)."""
    s = jnp.mean(x.astype(jnp.float32), axis=(1, 2))            # (N, C)
    h = jax.nn.silu(s @ w1 + b1)
    return jax.nn.sigmoid(h @ w2 + b2)                          # (N, C) f32


# --------------------------------------------------------------------------
# Parameter construction (deterministic, synthetic; zero-padded for lane density)
# --------------------------------------------------------------------------
class ParamGen:
    def __init__(self, key):
        self.key = key

    def _next(self):
        self.key, sub = jax.random.split(self.key)
        return sub

    def conv(self, k, cin, cout, cin_pad=None, cout_pad=None):
        cin_pad = cin if cin_pad is None else cin_pad
        cout_pad = cout if cout_pad is None else cout_pad
        fan_in = k * k * cin
        w = jax.random.normal(self._next(), (k, k, cin, cout), jnp.float32)
        w = w * math.sqrt(2.0 / fan_in)
        if cin_pad != cin or cout_pad != cout:
            w = jnp.pad(w, ((0, 0), (0, 0), (0, cin_pad - cin), (0, cout_pad - cout)))
        return w.reshape(k * k * cin_pad, cout_pad).astype(jnp.bfloat16)

    def dwconv(self, k, c, c_pad=None):
        c_pad = c if c_pad is None else c_pad
        w = jax.random.normal(self._next(), (k, k, c), jnp.float32)
        w = w * math.sqrt(2.0 / (k * k))
        if c_pad != c:
            w = jnp.pad(w, ((0, 0), (0, 0), (0, c_pad - c)))
        return w.reshape(k * k, c_pad)

    @staticmethod
    def bn(c, c_pad=None):
        c_pad = c if c_pad is None else c_pad
        gamma = jnp.ones((c,), jnp.float32)
        beta = jnp.zeros((c,), jnp.float32)
        mean = jnp.zeros((c,), jnp.float32)
        var = jnp.ones((c,), jnp.float32)
        scale = gamma / jnp.sqrt(var + BN_EPS)
        bias = beta - mean * scale
        if c_pad != c:
            scale = jnp.concatenate([scale, jnp.ones((c_pad - c,), jnp.float32)])
            bias = jnp.concatenate([bias, jnp.zeros((c_pad - c,), jnp.float32)])
        return scale, bias

    def fc(self, cin, cout, cin_pad=None, cout_pad=None):
        cin_pad = cin if cin_pad is None else cin_pad
        cout_pad = cout if cout_pad is None else cout_pad
        w = jax.random.normal(self._next(), (cin, cout), jnp.float32)
        w = w * math.sqrt(1.0 / cin)
        if cin_pad != cin or cout_pad != cout:
            w = jnp.pad(w, ((0, cin_pad - cin), (0, cout_pad - cout)))
        return w, jnp.zeros((cout_pad,), jnp.float32)


# (kind, expand_ratio, kernel, stride, in_ch, out_ch, num_layers) — EfficientNetV2-S
STAGES = [
    ("fused", 1, 3, 1, 24, 24, 2),
    ("fused", 4, 3, 2, 24, 48, 4),
    ("fused", 4, 3, 2, 48, 64, 4),
    ("mb",    4, 3, 2, 64, 128, 6),
    ("mb",    6, 3, 1, 128, 160, 9),
    ("mb",    6, 3, 2, 160, 256, 15),
]
HEAD_CH = 1280


def build_params(key):
    """Returns (static block config list, array-only param pytree)."""
    g = ParamGen(key)
    s, b = g.bn(24, _cpad(24))
    stem = {"w": g.conv(3, 3, 24, 3, _cpad(24)), "scale": s, "bias": b}
    cur_real, cur_pad = 24, _cpad(24)

    cfg_blocks, prm_blocks = [], []
    for kind, expand, k, stride, cin_stage, cout_stage, n_layers in STAGES:
        for layer in range(n_layers):
            cin_r = cin_stage if layer == 0 else cout_stage
            st = stride if layer == 0 else 1
            cin_p = cur_pad
            cexp_r = cin_r * expand
            cexp_p = _cpad(cexp_r)
            cout_r = cout_stage
            cout_p = _cpad(cout_r)
            cfg = {"type": kind, "k": k, "stride": st,
                   "res": (st == 1 and cin_r == cout_r),
                   "expand": cexp_r != cin_r}
            prm = {}
            if kind == "fused":
                if cexp_r != cin_r:
                    s1, b1 = g.bn(cexp_r, cexp_p)
                    s2, b2 = g.bn(cout_r, cout_p)
                    prm["expand"] = (g.conv(k, cin_r, cexp_r, cin_p, cexp_p), s1, b1)
                    prm["project"] = (g.conv(1, cexp_r, cout_r, cexp_p, cout_p), s2, b2)
                else:
                    s1, b1 = g.bn(cout_r, cout_p)
                    prm["single"] = (g.conv(k, cin_r, cout_r, cin_p, cout_p), s1, b1)
            else:  # MBConv
                csq = max(1, cin_r // 4)
                s1, b1 = g.bn(cexp_r, cexp_p)
                s2, b2 = g.bn(cexp_r, cexp_p)
                s3, b3 = g.bn(cout_r, cout_p)
                prm["expand"] = (g.conv(1, cin_r, cexp_r, cin_p, cexp_p), s1, b1)
                prm["dw"] = (g.dwconv(k, cexp_r, cexp_p), s2, b2)
                w1, bb1 = g.fc(cexp_r, csq, cexp_p, csq)
                w2, bb2 = g.fc(csq, cexp_r, csq, cexp_p)
                prm["se"] = (w1, bb1, w2, bb2)
                prm["project"] = (g.conv(1, cexp_r, cout_r, cexp_p, cout_p), s3, b3)
            cfg_blocks.append(cfg)
            prm_blocks.append(prm)
            cur_real, cur_pad = cout_r, cout_p

    s, b = g.bn(HEAD_CH)
    head = {"w": g.conv(1, 256, HEAD_CH, cur_pad, HEAD_CH), "scale": s, "bias": b}
    params = {"stem": stem, "blocks": prm_blocks, "head": head}
    return cfg_blocks, params


# --------------------------------------------------------------------------
# Forward pass
# --------------------------------------------------------------------------
def forward_block(cfg, prm, x):
    res = x if cfg["res"] else None
    if cfg["type"] == "fused":
        if cfg["expand"]:
            x = conv_bn_act(x, *prm["expand"], kernel=cfg["k"],
                            stride=cfg["stride"], act="silu")
            x = conv_bn_act(x, *prm["project"], kernel=1, stride=1,
                            act="none", residual=res)
        else:
            x = conv_bn_act(x, *prm["single"], kernel=cfg["k"],
                            stride=cfg["stride"], act="silu", residual=res)
    else:  # MBConv
        x = conv_bn_act(x, *prm["expand"], kernel=1, stride=1, act="silu")
        x = depthwise_bn_silu(x, *prm["dw"], kernel=cfg["k"],
                              stride=cfg["stride"])
        g = se_gate(x, *prm["se"])
        x = conv_bn_act(x, *prm["project"], kernel=1, stride=1,
                        act="none", residual=res, gate=g)
    return x


def efficientnet_encoder_forward(cfg_blocks, params, x_nchw):
    """Matches EfficientNetEncoder.forward: features -> avgpool(1,1) -> flatten."""
    x = jnp.transpose(x_nchw, (0, 2, 3, 1)).astype(jnp.bfloat16)  # NCHW -> NHWC
    p = params["stem"]
    x = conv_bn_act(x, p["w"], p["scale"], p["bias"], kernel=3, stride=2,
                    act="silu")
    for cfg, prm in zip(cfg_blocks, params["blocks"]):
        x = forward_block(cfg, prm, x)
    p = params["head"]
    x = conv_bn_act(x, p["w"], p["scale"], p["bias"], kernel=1, stride=1,
                    act="silu")
    # AdaptiveAvgPool2d((1,1)) + Flatten: only N output rows -> plain jnp.
    return jnp.mean(x.astype(jnp.float32), axis=(1, 2))


# --------------------------------------------------------------------------
if __name__ == "__main__":
    key = jax.random.PRNGKey(0)
    pkey, xkey = jax.random.split(key)
    cfg_blocks, params = build_params(pkey)

    # Small image batch (NCHW, like the PyTorch module); 32x32 so the 5
    # stride-2 stages reduce the spatial dims to 1x1 before the head.
    x = jax.random.normal(xkey, (2, 3, 32, 32), jnp.float32)

    forward = jax.jit(functools.partial(efficientnet_encoder_forward, cfg_blocks))
    out = jax.block_until_ready(forward(params, x))

    assert out.shape == (2, 1280), out.shape
    assert out.dtype == jnp.float32
    assert bool(jnp.all(jnp.isfinite(out)))
    print("KERNEL_OK")
</pallas_src>

<mosaic_0001>
module attributes {stable_mosaic.version = 11 : i64} {
  func.func @_mm_kernel(%arg0: i32, %arg1: i32, %arg2: i32, %arg3: memref<256x27xbf16, #tpu.memory_space<vmem>>, %arg4: memref<27x128xbf16, #tpu.memory_space<vmem>>, %arg5: memref<1x128xf32, #tpu.memory_space<vmem>>, %arg6: memref<1x128xf32, #tpu.memory_space<vmem>>, %arg7: memref<256x128xbf16, #tpu.memory_space<vmem>>, %arg8: memref<256x128xf32, #tpu.memory_space<vmem>>) attributes {dimension_semantics = [#tpu.dimension_semantics<parallel>, #tpu.dimension_semantics<parallel>, #tpu.dimension_semantics<arbitrary>], iteration_bounds = array<i64: 2, 1, 1>, scalar_prefetch = 0 : i64, scratch_operands = 1 : i64, tpu.core_type = #tpu.core_type<tc>, window_params = [{transform_indices = @transform_0, window_bounds = array<i64: 256, 27>}, {transform_indices = @transform_1, window_bounds = array<i64: 27, 128>}, {transform_indices = @transform_2, window_bounds = array<i64: 1, 128>}, {transform_indices = @transform_3, window_bounds = array<i64: 1, 128>}, {transform_indices = @transform_4, window_bounds = array<i64: 256, 128>}]} {
    %c0_i32 = arith.constant 0 : i32
    %0 = arith.cmpi eq, %arg2, %c0_i32 : i32
    %1 = arith.extui %0 : i1 to i32
    %c0_i32_0 = arith.constant 0 : i32
    %2 = arith.cmpi ne, %1, %c0_i32_0 : i32
    scf.if %2 {
      %cst_10 = arith.constant 0.000000e+00 : f32
      %12 = vector.broadcast %cst_10 : f32 to vector<256x128xf32>
      %c0_11 = arith.constant 0 : index
      %c0_12 = arith.constant 0 : index
      %13 = vector.load %arg8[%c0_11, %c0_12] : memref<256x128xf32, #tpu.memory_space<vmem>>, vector<256x128xf32>
      tpu.vector_store %arg8[%c0_11, %c0_12], %12 {strides = array<i32>} : memref<256x128xf32, #tpu.memory_space<vmem>>, vector<256x128xf32>,
    } else {
    }
    %c0 = arith.constant 0 : index
    %c0_1 = arith.constant 0 : index
    %3 = vector.load %arg3[%c0, %c0_1] : memref<256x27xbf16, #tpu.memory_space<vmem>>, vector<256x27xbf16>
    %c0_2 = arith.constant 0 : index
    %c0_3 = arith.constant 0 : index
    %4 = vector.load %arg8[%c0_2, %c0_3] : memref<256x128xf32, #tpu.memory_space<vmem>>, vector<256x128xf32>
    %c0_4 = arith.constant 0 : index
    %c0_5 = arith.constant 0 : index
    %5 = vector.load %arg4[%c0_4, %c0_5] : memref<27x128xbf16, #tpu.memory_space<vmem>>, vector<27x128xbf16>
    %cst = arith.constant dense<0.000000e+00> : vector<256x128xf32>
    %6 = tpu.matmul %3, %5, %cst {dimension_numbers = #tpu.dot_dimension_numbers<[1], [0], [0], [1], [0, 0, 1, 1], [], []>} : vector<256x27xbf16>, vector<27x128xbf16>, vector<256x128xf32> -> vector<256x128xf32>
    %7 = arith.addf %4, %6 : vector<256x128xf32>
    %c0_6 = arith.constant 0 : index
    %c0_7 = arith.constant 0 : index
    %8 = vector.load %arg8[%c0_6, %c0_7] : memref<256x128xf32, #tpu.memory_space<vmem>>, vector<256x128xf32>
    tpu.vector_store %arg8[%c0_6, %c0_7], %7 {strides = array<i32>} : memref<256x128xf32, #tpu.memory_space<vmem>>, vector<256x128xf32>,
    %c0_i32_8 = arith.constant 0 : i32
    %9 = arith.cmpi eq, %arg2, %c0_i32_8 : i32
    %10 = arith.extui %9 : i1 to i32
    %c0_i32_9 = arith.constant 0 : i32
    %11 = arith.cmpi ne, %10, %c0_i32_9 : i32
    scf.if %11 {
      %c0_10 = arith.constant 0 : index
      %c0_11 = arith.constant 0 : index
      %12 = vector.load %arg8[%c0_10, %c0_11] : memref<256x128xf32, #tpu.memory_space<vmem>>, vector<256x128xf32>
      %c0_12 = arith.constant 0 : index
      %c0_13 = arith.constant 0 : index
      %13 = vector.load %arg5[%c0_12, %c0_13] : memref<1x128xf32, #tpu.memory_space<vmem>>, vector<1x128xf32>
      %14 = vector.broadcast %13 : vector<1x128xf32> to vector<256x128xf32>
      %15 = arith.mulf %12, %14 : vector<256x128xf32>
      %c0_14 = arith.constant 0 : index
      %c0_15 = arith.constant 0 : index
      %16 = vector.load %arg6[%c0_14, %c0_15] : memref<1x128xf32, #tpu.memory_space<vmem>>, vector<1x128xf32>
      %17 = vector.broadcast %16 : vector<1x128xf32> to vector<256x128xf32>
      %18 = arith.addf %15, %17 : vector<256x128xf32>
      %19 = arith.negf %18 : vector<256x128xf32>
      %20 = math.exp %19 : vector<256x128xf32>
      %cst_16 = arith.constant 1.000000e+00 : f32
      %21 = vector.broadcast %cst_16 : f32 to vector<256x128xf32>
      %22 = arith.addf %21, %20 : vector<256x128xf32>
      %23 = arith.divf %21, %22 : vector<256x128xf32>
      %24 = arith.mulf %18, %23 : vector<256x128xf32>
      %25 = arith.truncf %24 : vector<256x128xf32> to vector<256x128xbf16>
      %c0_17 = arith.constant 0 : index
      %c0_18 = arith.constant 0 : index
      %26 = vector.load %arg7[%c0_17, %c0_18] : memref<256x128xbf16, #tpu.memory_space<vmem>>, vector<256x128xbf16>
      tpu.vector_store %arg7[%c0_17, %c0_18], %25 {strides = array<i32>} : memref<256x128xbf16, #tpu.memory_space<vmem>>, vector<256x128xbf16>,
    } else {
    }
    return
  }
  func.func @transform_0(%arg0: i32, %arg1: i32, %arg2: i32) -> (i32, i32) {
    %c0_i32 = arith.constant 0 : i32
    return %arg0, %arg2 : i32, i32
  }
  func.func @transform_1(%arg0: i32, %arg1: i32, %arg2: i32) -> (i32, i32) {
    %c0_i32 = arith.constant 0 : i32
    return %arg2, %arg1 : i32, i32
  }
  func.func @transform_2(%arg0: i32, %arg1: i32, %arg2: i32) -> (i32, i32) {
    %c0_i32 = arith.constant 0 : i32
    %c0_i32_0 = arith.constant 0 : i32
    return %c0_i32, %arg1 : i32, i32
  }
  func.func @transform_3(%arg0: i32, %arg1: i32, %arg2: i32) -> (i32, i32) {
    %c0_i32 = arith.constant 0 : i32
    %c0_i32_0 = arith.constant 0 : i32
    return %c0_i32, %arg1 : i32, i32
  }
  func.func @transform_4(%arg0: i32, %arg1: i32, %arg2: i32) -> (i32, i32) {
    %c0_i32 = arith.constant 0 : i32
    return %arg0, %arg1 : i32, i32
  }
}

module attributes {stable_mosaic.version = 11 : i64} {
  func.func @_mm_kernel(%arg0: i32, %arg1: i32, %arg2: i32, %arg3: memref<256x384xbf16, #tpu.memory_space<vmem>>, %arg4: memref<384x128xbf16, #tpu.memory_space<vmem>>, %arg5: memref<1x128xf32, #tpu.memory_space<vmem>>, %arg6: memref<1x128xf32, #tpu.memory_space<vmem>>, %arg7: memref<256x128xbf16, #tpu.memory_space<vmem>>, %arg8: memref<256x128xbf16, #tpu.memory_space<vmem>>, %arg9: memref<256x128xf32, #tpu.memory_space<vmem>>) attributes {dimension_semantics = [#tpu.dimension_semantics<parallel>, #tpu.dimension_semantics<parallel>, #tpu.dimension_semantics<arbitrary>], iteration_bounds = array<i64: 2, 1, 3>, scalar_prefetch = 0 : i64, scratch_operands = 1 : i64, tpu.core_type = #tpu.core_type<tc>, window_params = [{transform_indices = @transform_0, window_bounds = array<i64: 256, 384>}, {transform_indices = @transform_1, window_bounds = array<i64: 384, 128>}, {transform_indices = @transform_2, window_bounds = array<i64: 1, 128>}, {transform_indices = @transform_3, window_bounds = array<i64: 1, 128>}, {transform_indices = @transform_4, window_bounds = array<i64: 256, 128>}, {transform_indices = @transform_5, window_bounds = array<i64: 256, 128>}]} {
    %c0_i32 = arith.constant 0 : i32
    %0 = arith.cmpi eq, %arg2, %c0_i32 : i32
    %1 = arith.extui %0 : i1 to i32
    %c0_i32_0 = arith.constant 0 : i32
    %2 = arith.cmpi ne, %1, %c0_i32_0 : i32
    scf.if %2 {
      %cst_9 = arith.constant 0.000000e+00 : f32
      %12 = vector.broadcast %cst_9 : f32 to vector<256x128xf32>
      %c0_10 = arith.constant 0 : index
      %c0_11 = arith.constant 0 : index
      %13 = vector.load %arg9[%c0_10, %c0_11] : memref<256x128xf32, #tpu.memory_space<vmem>>, vector<256x128xf32>
      tpu.vector_store %arg9[%c0_10, %c0_11], %12 {strides = array<i32>} : memref<256x128xf32, #tpu.memory_space<vmem>>, vector<256x128xf32>,
    } else {
    }
    %c0 = arith.constant 0 : index
    %c0_1 = arith.constant 0 : index
    %3 = vector.load %arg3[%c0, %c0_1] : memref<256x384xbf16, #tpu.memory_space<vmem>>, vector<256x384xbf16>
    %c0_2 = arith.constant 0 : index
    %c0_3 = arith.constant 0 : index
    %4 = vector.load %arg9[%c0_2, %c0_3] : memref<256x128xf32, #tpu.memory_space<vmem>>, vector<256x128xf32>
    %c0_4 = arith.constant 0 : index
    %c0_5 = arith.constant 0 : index
    %5 = vector.load %arg4[%c0_4, %c0_5] : memref<384x128xbf16, #tpu.memory_space<vmem>>, vector<384x128xbf16>
    %cst = arith.constant dense<0.000000e+00> : vector<256x128xf32>
    %6 = tpu.matmul %3, %5, %cst {dimension_numbers = #tpu.dot_dimension_numbers<[1], [0], [0], [1], [0, 0, 1, 1], [], []>} : vector<256x384xbf16>, vector<384x128xbf16>, vector<256x128xf32> -> vector<256x128xf32>
    %7 = arith.addf %4, %6 : vector<256x128xf32>
    %c0_6 = arith.constant 0 : index
    %c0_7 = arith.constant 0 : index
    %8 = vector.load %arg9[%c0_6, %c0_7] : memref<256x128xf32, #tpu.memory_space<vmem>>, vector<256x128xf32>
    tpu.vector_store %arg9[%c0_6, %c0_7], %7 {strides = array<i32>} : memref<256x128xf32, #tpu.memory_space<vmem>>, vector<256x128xf32>,
    %c2_i32 = arith.constant 2 : i32
    %9 = arith.cmpi eq, %arg2, %c2_i32 : i32
    %10 = arith.extui %9 : i1 to i32
    %c0_i32_8 = arith.constant 0 : i32
    %11 = arith.cmpi ne, %10, %c0_i32_8 : i32
    scf.if %11 {
      %c0_9 = arith.constant 0 : index
      %c0_10 = arith.constant 0 : index
      %12 = vector.load %arg9[%c0_9, %c0_10] : memref<256x128xf32, #tpu.memory_space<vmem>>, vector<256x128xf32>
      %c0_11 = arith.constant 0 : index
      %c0_12 = arith.constant 0 : index
      %13 = vector.load %arg5[%c0_11, %c0_12] : memref<1x128xf32, #tpu.memory_space<vmem>>, vector<1x128xf32>
      %14 = vector.broadcast %13 : vector<1x128xf32> to vector<256x128xf32>
      %15 = arith.mulf %12, %14 : vector<256x128xf32>
      %c0_13 = arith.constant 0 : index
      %c0_14 = arith.constant 0 : index
      %16 = vector.load %arg6[%c0_13, %c0_14] : memref<1x128xf32, #tpu.memory_space<vmem>>, vector<1x128xf32>
      %17 = vector.broadcast %16 : vector<1x128xf32> to vector<256x128xf32>
      %18 = arith.addf %15, %17 : vector<256x128xf32>
      %19 = arith.negf %18 : vector<256x128xf32>
      %20 = math.exp %19 : vector<256x128xf32>
      %cst_15 = arith.constant 1.000000e+00 : f32
      %21 = vector.broadcast %cst_15 : f32 to vector<256x128xf32>
      %22 = arith.addf %21, %20 : vector<256x128xf32>
      %23 = arith.divf %21, %22 : vector<256x128xf32>
      %24 = arith.mulf %18, %23 : vector<256x128xf32>
      %c0_16 = arith.constant 0 : index
      %c0_17 = arith.constant 0 : index
      %25 = vector.load %arg7[%c0_16, %c0_17] : memref<256x128xbf16, #tpu.memory_space<vmem>>, vector<256x128xbf16>
      %26 = arith.extf %25 : vector<256x128xbf16> to vector<256x128xf32>
      %27 = arith.addf %24, %26 : vector<256x128xf32>
      %28 = arith.truncf %27 : vector<256x128xf32> to vector<256x128xbf16>
      %c0_18 = arith.constant 0 : index
      %c0_19 = arith.constant 0 : index
      %29 = vector.load %arg8[%c0_18, %c0_19] : memref<256x128xbf16, #tpu.memory_space<vmem>>, vector<256x128xbf16>
      tpu.vector_store %arg8[%c0_18, %c0_19], %28 {strides = array<i32>} : memref<256x128xbf16, #tpu.memory_space<vmem>>, vector<256x128xbf16>,
    } else {
    }
    return
  }
  func.func @transform_0(%arg0: i32, %arg1: i32, %arg2: i32) -> (i32, i32) {
    %c0_i32 = arith.constant 0 : i32
    return %arg0, %arg2 : i32, i32
  }
  func.func @transform_1(%arg0: i32, %arg1: i32, %arg2: i32) -> (i32, i32) {
    %c0_i32 = arith.constant 0 : i32
    return %arg2, %arg1 : i32, i32
  }
  func.func @transform_2(%arg0: i32, %arg1: i32, %arg2: i32) -> (i32, i32) {
    %c0_i32 = arith.constant 0 : i32
    %c0_i32_0 = arith.constant 0 : i32
    return %c0_i32, %arg1 : i32, i32
  }
  func.func @transform_3(%arg0: i32, %arg1: i32, %arg2: i32) -> (i32, i32) {
    %c0_i32 = arith.constant 0 : i32
    %c0_i32_0 = arith.constant 0 : i32
    return %c0_i32, %arg1 : i32, i32
  }
  func.func @transform_4(%arg0: i32, %arg1: i32, %arg2: i32) -> (i32, i32) {
    %c0_i32 = arith.constant 0 : i32
    return %arg0, %arg1 : i32, i32
  }
  func.func @transform_5(%arg0: i32, %arg1: i32, %arg2: i32) -> (i32, i32) {
    %c0_i32 = arith.constant 0 : i32
    return %arg0, %arg1 : i32, i32
  }
}

module attributes {stable_mosaic.version = 11 : i64} {
  func.func @_mm_kernel(%arg0: i32, %arg1: i32, %arg2: i32, %arg3: memref<64x384xbf16, #tpu.memory_space<vmem>>, %arg4: memref<384x128xbf16, #tpu.memory_space<vmem>>, %arg5: memref<1x128xf32, #tpu.memory_space<vmem>>, %arg6: memref<1x128xf32, #tpu.memory_space<vmem>>, %arg7: memref<64x128xbf16, #tpu.memory_space<vmem>>, %arg8: memref<64x128xf32, #tpu.memory_space<vmem>>) attributes {dimension_semantics = [#tpu.dimension_semantics<parallel>, #tpu.dimension_semantics<parallel>, #tpu.dimension_semantics<arbitrary>], iteration_bounds = array<i64: 2, 1, 3>, scalar_prefetch = 0 : i64, scratch_operands = 1 : i64, tpu.core_type = #tpu.core_type<tc>, window_params = [{transform_indices = @transform_0, window_bounds = array<i64: 64, 384>}, {transform_indices = @transform_1, window_bounds = array<i64: 384, 128>}, {transform_indices = @transform_2, window_bounds = array<i64: 1, 128>}, {transform_indices = @transform_3, window_bounds = array<i64: 1, 128>}, {transform_indices = @transform_4, window_bounds = array<i64: 64, 128>}]} {
    %c0_i32 = arith.constant 0 : i32
    %0 = arith.cmpi eq, %arg2, %c0_i32 : i32
    %1 = arith.extui %0 : i1 to i32
    %c0_i32_0 = arith.constant 0 : i32
    %2 = arith.cmpi ne, %1, %c0_i32_0 : i32
    scf.if %2 {
      %cst_9 = arith.constant 0.000000e+00 : f32
      %12 = vector.broadcast %cst_9 : f32 to vector<64x128xf32>
      %c0_10 = arith.constant 0 : index
      %c0_11 = arith.constant 0 : index
      %13 = vector.load %arg8[%c0_10, %c0_11] : memref<64x128xf32, #tpu.memory_space<vmem>>, vector<64x128xf32>
      tpu.vector_store %arg8[%c0_10, %c0_11], %12 {strides = array<i32>} : memref<64x128xf32, #tpu.memory_space<vmem>>, vector<64x128xf32>,
    } else {
    }
    %c0 = arith.constant 0 : index
    %c0_1 = arith.constant 0 : index
    %3 = vector.load %arg3[%c0, %c0_1] : memref<64x384xbf16, #tpu.memory_space<vmem>>, vector<64x384xbf16>
    %c0_2 = arith.constant 0 : index
    %c0_3 = arith.constant 0 : index
    %4 = vector.load %arg8[%c0_2, %c0_3] : memref<64x128xf32, #tpu.memory_space<vmem>>, vector<64x128xf32>
    %c0_4 = arith.constant 0 : index
    %c0_5 = arith.constant 0 : index
    %5 = vector.load %arg4[%c0_4, %c0_5] : memref<384x128xbf16, #tpu.memory_space<vmem>>, vector<384x128xbf16>
    %cst = arith.constant dense<0.000000e+00> : vector<64x128xf32>
    %6 = tpu.matmul %3, %5, %cst {dimension_numbers = #tpu.dot_dimension_numbers<[1], [0], [0], [1], [0, 0, 1, 1], [], []>} : vector<64x384xbf16>, vector<384x128xbf16>, vector<64x128xf32> -> vector<64x128xf32>
    %7 = arith.addf %4, %6 : vector<64x128xf32>
    %c0_6 = arith.constant 0 : index
    %c0_7 = arith.constant 0 : index
    %8 = vector.load %arg8[%c0_6, %c0_7] : memref<64x128xf32, #tpu.memory_space<vmem>>, vector<64x128xf32>
    tpu.vector_store %arg8[%c0_6, %c0_7], %7 {strides = array<i32>} : memref<64x128xf32, #tpu.memory_space<vmem>>, vector<64x128xf32>,
    %c2_i32 = arith.constant 2 : i32
    %9 = arith.cmpi eq, %arg2, %c2_i32 : i32
    %10 = arith.extui %9 : i1 to i32
    %c0_i32_8 = arith.constant 0 : i32
    %11 = arith.cmpi ne, %10, %c0_i32_8 : i32
    scf.if %11 {
      %c0_9 = arith.constant 0 : index
      %c0_10 = arith.constant 0 : index
      %12 = vector.load %arg8[%c0_9, %c0_10] : memref<64x128xf32, #tpu.memory_space<vmem>>, vector<64x128xf32>
      %c0_11 = arith.constant 0 : index
      %c0_12 = arith.constant 0 : index
      %13 = vector.load %arg5[%c0_11, %c0_12] : memref<1x128xf32, #tpu.memory_space<vmem>>, vector<1x128xf32>
      %14 = vector.broadcast %13 : vector<1x128xf32> to vector<64x128xf32>
      %15 = arith.mulf %12, %14 : vector<64x128xf32>
      %c0_13 = arith.constant 0 : index
      %c0_14 = arith.constant 0 : index
      %16 = vector.load %arg6[%c0_13, %c0_14] : memref<1x128xf32, #tpu.memory_space<vmem>>, vector<1x128xf32>
      %17 = vector.broadcast %16 : vector<1x128xf32> to vector<64x128xf32>
      %18 = arith.addf %15, %17 : vector<64x128xf32>
      %19 = arith.negf %18 : vector<64x128xf32>
      %20 = math.exp %19 : vector<64x128xf32>
      %cst_15 = arith.constant 1.000000e+00 : f32
      %21 = vector.broadcast %cst_15 : f32 to vector<64x128xf32>
      %22 = arith.addf %21, %20 : vector<64x128xf32>
      %23 = arith.divf %21, %22 : vector<64x128xf32>
      %24 = arith.mulf %18, %23 : vector<64x128xf32>
      %25 = arith.truncf %24 : vector<64x128xf32> to vector<64x128xbf16>
      %c0_16 = arith.constant 0 : index
      %c0_17 = arith.constant 0 : index
      %26 = vector.load %arg7[%c0_16, %c0_17] : memref<64x128xbf16, #tpu.memory_space<vmem>>, vector<64x128xbf16>
      tpu.vector_store %arg7[%c0_16, %c0_17], %25 {strides = array<i32>} : memref<64x128xbf16, #tpu.memory_space<vmem>>, vector<64x128xbf16>,
    } else {
    }
    return
  }
  func.func @transform_0(%arg0: i32, %arg1: i32, %arg2: i32) -> (i32, i32) {
    %c0_i32 = arith.constant 0 : i32
    return %arg0, %arg2 : i32, i32
  }
  func.func @transform_1(%arg0: i32, %arg1: i32, %arg2: i32) -> (i32, i32) {
    %c0_i32 = arith.constant 0 : i32
    return %arg2, %arg1 : i32, i32
  }
  func.func @transform_2(%arg0: i32, %arg1: i32, %arg2: i32) -> (i32, i32) {
    %c0_i32 = arith.constant 0 : i32
    %c0_i32_0 = arith.constant 0 : i32
    return %c0_i32, %arg1 : i32, i32
  }
  func.func @transform_3(%arg0: i32, %arg1: i32, %arg2: i32) -> (i32, i32) {
    %c0_i32 = arith.constant 0 : i32
    %c0_i32_0 = arith.constant 0 : i32
    return %c0_i32, %arg1 : i32, i32
  }
  func.func @transform_4(%arg0: i32, %arg1: i32, %arg2: i32) -> (i32, i32) {
    %c0_i32 = arith.constant 0 : i32
    return %arg0, %arg1 : i32, i32
  }
}

module attributes {stable_mosaic.version = 11 : i64} {
  func.func @_mm_kernel(%arg0: i32, %arg1: i32, %arg2: i32, %arg3: memref<64x128xbf16, #tpu.memory_space<vmem>>, %arg4: memref<128x128xbf16, #tpu.memory_space<vmem>>, %arg5: memref<1x128xf32, #tpu.memory_space<vmem>>, %arg6: memref<1x128xf32, #tpu.memory_space<vmem>>, %arg7: memref<64x128xbf16, #tpu.memory_space<vmem>>, %arg8: memref<64x128xf32, #tpu.memory_space<vmem>>) attributes {dimension_semantics = [#tpu.dimension_semantics<parallel>, #tpu.dimension_semantics<parallel>, #tpu.dimension_semantics<arbitrary>], iteration_bounds = array<i64: 2, 1, 1>, scalar_prefetch = 0 : i64, scratch_operands = 1 : i64, tpu.core_type = #tpu.core_type<tc>, window_params = [{transform_indices = @transform_0, window_bounds = array<i64: 64, 128>}, {transform_indices = @transform_1, window_bounds = array<i64: 128, 128>}, {transform_indices = @transform_2, window_bounds = array<i64: 1, 128>}, {transform_indices = @transform_3, window_bounds = array<i64: 1, 128>}, {transform_indices = @transform_4, window_bounds = array<i64: 64, 128>}]} {
    %c0_i32 = arith.constant 0 : i32
    %0 = arith.cmpi eq, %arg2, %c0_i32 : i32
    %1 = arith.extui %0 : i1 to i32
    %c0_i32_0 = arith.constant 0 : i32
    %2 = arith.cmpi ne, %1, %c0_i32_0 : i32
    scf.if %2 {
      %cst_10 = arith.constant 0.000000e+00 : f32
      %12 = vector.broadcast %cst_10 : f32 to vector<64x128xf32>
      %c0_11 = arith.constant 0 : index
      %c0_12 = arith.constant 0 : index
      %13 = vector.load %arg8[%c0_11, %c0_12] : memref<64x128xf32, #tpu.memory_space<vmem>>, vector<64x128xf32>
      tpu.vector_store %arg8[%c0_11, %c0_12], %12 {strides = array<i32>} : memref<64x128xf32, #tpu.memory_space<vmem>>, vector<64x128xf32>,
    } else {
    }
    %c0 = arith.constant 0 : index
    %c0_1 = arith.constant 0 : index
    %3 = vector.load %arg3[%c0, %c0_1] : memref<64x128xbf16, #tpu.memory_space<vmem>>, vector<64x128xbf16>
    %c0_2 = arith.constant 0 : index
    %c0_3 = arith.constant 0 : index
    %4 = vector.load %arg8[%c0_2, %c0_3] : memref<64x128xf32, #tpu.memory_space<vmem>>, vector<64x128xf32>
    %c0_4 = arith.constant 0 : index
    %c0_5 = arith.constant 0 : index
    %5 = vector.load %arg4[%c0_4, %c0_5] : memref<128x128xbf16, #tpu.memory_space<vmem>>, vector<128x128xbf16>
    %cst = arith.constant dense<0.000000e+00> : vector<64x128xf32>
    %6 = tpu.matmul %3, %5, %cst {dimension_numbers = #tpu.dot_dimension_numbers<[1], [0], [0], [1], [0, 0, 1, 1], [], []>} : vector<64x128xbf16>, vector<128x128xbf16>, vector<64x128xf32> -> vector<64x128xf32>
    %7 = arith.addf %4, %6 : vector<64x128xf32>
    %c0_6 = arith.constant 0 : index
    %c0_7 = arith.constant 0 : index
    %8 = vector.load %arg8[%c0_6, %c0_7] : memref<64x128xf32, #tpu.memory_space<vmem>>, vector<64x128xf32>
    tpu.vector_store %arg8[%c0_6, %c0_7], %7 {strides = array<i32>} : memref<64x128xf32, #tpu.memory_space<vmem>>, vector<64x128xf32>,
    %c0_i32_8 = arith.constant 0 : i32
    %9 = arith.cmpi eq, %arg2, %c0_i32_8 : i32
    %10 = arith.extui %9 : i1 to i32
    %c0_i32_9 = arith.constant 0 : i32
    %11 = arith.cmpi ne, %10, %c0_i32_9 : i32
    scf.if %11 {
      %c0_10 = arith.constant 0 : index
      %c0_11 = arith.constant 0 : index
      %12 = vector.load %arg8[%c0_10, %c0_11] : memref<64x128xf32, #tpu.memory_space<vmem>>, vector<64x128xf32>
      %c0_12 = arith.constant 0 : index
      %c0_13 = arith.constant 0 : index
      %13 = vector.load %arg5[%c0_12, %c0_13] : memref<1x128xf32, #tpu.memory_space<vmem>>, vector<1x128xf32>
      %14 = vector.broadcast %13 : vector<1x128xf32> to vector<64x128xf32>
      %15 = arith.mulf %12, %14 : vector<64x128xf32>
      %c0_14 = arith.constant 0 : index
      %c0_15 = arith.constant 0 : index
      %16 = vector.load %arg6[%c0_14, %c0_15] : memref<1x128xf32, #tpu.memory_space<vmem>>, vector<1x128xf32>
      %17 = vector.broadcast %16 : vector<1x128xf32> to vector<64x128xf32>
      %18 = arith.addf %15, %17 : vector<64x128xf32>
      %19 = arith.truncf %18 : vector<64x128xf32> to vector<64x128xbf16>
      %c0_16 = arith.constant 0 : index
      %c0_17 = arith.constant 0 : index
      %20 = vector.load %arg7[%c0_16, %c0_17] : memref<64x128xbf16, #tpu.memory_space<vmem>>, vector<64x128xbf16>
      tpu.vector_store %arg7[%c0_16, %c0_17], %19 {strides = array<i32>} : memref<64x128xbf16, #tpu.memory_space<vmem>>, vector<64x128xbf16>,
    } else {
    }
    return
  }
  func.func @transform_0(%arg0: i32, %arg1: i32, %arg2: i32) -> (i32, i32) {
    %c0_i32 = arith.constant 0 : i32
    return %arg0, %arg2 : i32, i32
  }
  func.func @transform_1(%arg0: i32, %arg1: i32, %arg2: i32) -> (i32, i32) {
    %c0_i32 = arith.constant 0 : i32
    return %arg2, %arg1 : i32, i32
  }
  func.func @transform_2(%arg0: i32, %arg1: i32, %arg2: i32) -> (i32, i32) {
    %c0_i32 = arith.constant 0 : i32
    %c0_i32_0 = arith.constant 0 : i32
    return %c0_i32, %arg1 : i32, i32
  }
  func.func @transform_3(%arg0: i32, %arg1: i32, %arg2: i32) -> (i32, i32) {
    %c0_i32 = arith.constant 0 : i32
    %c0_i32_0 = arith.constant 0 : i32
    return %c0_i32, %arg1 : i32, i32
  }
  func.func @transform_4(%arg0: i32, %arg1: i32, %arg2: i32) -> (i32, i32) {
    %c0_i32 = arith.constant 0 : i32
    return %arg0, %arg1 : i32, i32
  }
}

module attributes {stable_mosaic.version = 11 : i64} {
  func.func @_mm_kernel(%arg0: i32, %arg1: i32, %arg2: i32, %arg3: memref<64x384xbf16, #tpu.memory_space<vmem>>, %arg4: memref<384x192xbf16, #tpu.memory_space<vmem>>, %arg5: memref<1x192xf32, #tpu.memory_space<vmem>>, %arg6: memref<1x192xf32, #tpu.memory_space<vmem>>, %arg7: memref<64x192xbf16, #tpu.memory_space<vmem>>, %arg8: memref<64x192xf32, #tpu.memory_space<vmem>>) attributes {dimension_semantics = [#tpu.dimension_semantics<parallel>, #tpu.dimension_semantics<parallel>, #tpu.dimension_semantics<arbitrary>], iteration_bounds = array<i64: 2, 1, 3>, scalar_prefetch = 0 : i64, scratch_operands = 1 : i64, tpu.core_type = #tpu.core_type<tc>, window_params = [{transform_indices = @transform_0, window_bounds = array<i64: 64, 384>}, {transform_indices = @transform_1, window_bounds = array<i64: 384, 192>}, {transform_indices = @transform_2, window_bounds = array<i64: 1, 192>}, {transform_indices = @transform_3, window_bounds = array<i64: 1, 192>}, {transform_indices = @transform_4, window_bounds = array<i64: 64, 192>}]} {
    %c0_i32 = arith.constant 0 : i32
    %0 = arith.cmpi eq, %arg2, %c0_i32 : i32
    %1 = arith.extui %0 : i1 to i32
    %c0_i32_0 = arith.constant 0 : i32
    %2 = arith.cmpi ne, %1, %c0_i32_0 : i32
    scf.if %2 {
      %cst_9 = arith.constant 0.000000e+00 : f32
      %12 = vector.broadcast %cst_9 : f32 to vector<64x192xf32>
      %c0_10 = arith.constant 0 : index
      %c0_11 = arith.constant 0 : index
      %13 = vector.load %arg8[%c0_10, %c0_11] : memref<64x192xf32, #tpu.memory_space<vmem>>, vector<64x192xf32>
      tpu.vector_store %arg8[%c0_10, %c0_11], %12 {strides = array<i32>} : memref<64x192xf32, #tpu.memory_space<vmem>>, vector<64x192xf32>,
    } else {
    }
    %c0 = arith.constant 0 : index
    %c0_1 = arith.constant 0 : index
    %3 = vector.load %arg3[%c0, %c0_1] : memref<64x384xbf16, #tpu.memory_space<vmem>>, vector<64x384xbf16>
    %c0_2 = arith.constant 0 : index
    %c0_3 = arith.constant 0 : index
    %4 = vector.load %arg8[%c0_2, %c0_3] : memref<64x192xf32, #tpu.memory_space<vmem>>, vector<64x192xf32>
    %c0_4 = arith.constant 0 : index
    %c0_5 = arith.constant 0 : index
    %5 = vector.load %arg4[%c0_4, %c0_5] : memref<384x192xbf16, #tpu.memory_space<vmem>>, vector<384x192xbf16>
    %cst = arith.constant dense<0.000000e+00> : vector<64x192xf32>
    %6 = tpu.matmul %3, %5, %cst {dimension_numbers = #tpu.dot_dimension_numbers<[1], [0], [0], [1], [0, 0, 1, 1], [], []>} : vector<64x384xbf16>, vector<384x192xbf16>, vector<64x192xf32> -> vector<64x192xf32>
    %7 = arith.addf %4, %6 : vector<64x192xf32>
    %c0_6 = arith.constant 0 : index
    %c0_7 = arith.constant 0 : index
    %8 = vector.load %arg8[%c0_6, %c0_7] : memref<64x192xf32, #tpu.memory_space<vmem>>, vector<64x192xf32>
    tpu.vector_store %arg8[%c0_6, %c0_7], %7 {strides = array<i32>} : memref<64x192xf32, #tpu.memory_space<vmem>>, vector<64x192xf32>,
    %c2_i32 = arith.constant 2 : i32
    %9 = arith.cmpi eq, %arg2, %c2_i32 : i32
    %10 = arith.extui %9 : i1 to i32
    %c0_i32_8 = arith.constant 0 : i32
    %11 = arith.cmpi ne, %10, %c0_i32_8 : i32
    scf.if %11 {
      %c0_9 = arith.constant 0 : index
      %c0_10 = arith.constant 0 : index
      %12 = vector.load %arg8[%c0_9, %c0_10] : memref<64x192xf32, #tpu.memory_space<vmem>>, vector<64x192xf32>
      %c0_11 = arith.constant 0 : index
      %c0_12 = arith.constant 0 : index
      %13 = vector.load %arg5[%c0_11, %c0_12] : memref<1x192xf32, #tpu.memory_space<vmem>>, vector<1x192xf32>
      %14 = vector.broadcast %13 : vector<1x192xf32> to vector<64x192xf32>
      %15 = arith.mulf %12, %14 : vector<64x192xf32>
      %c0_13 = arith.constant 0 : index
      %c0_14 = arith.constant 0 : index
      %16 = vector.load %arg6[%c0_13, %c0_14] : memref<1x192xf32, #tpu.memory_space<vmem>>, vector<1x192xf32>
      %17 = vector.broadcast %16 : vector<1x192xf32> to vector<64x192xf32>
      %18 = arith.addf %15, %17 : vector<64x192xf32>
      %19 = arith.negf %18 : vector<64x192xf32>
      %20 = math.exp %19 : vector<64x192xf32>
      %cst_15 = arith.constant 1.000000e+00 : f32
      %21 = vector.broadcast %cst_15 : f32 to vector<64x192xf32>
      %22 = arith.addf %21, %20 : vector<64x192xf32>
      %23 = arith.divf %21, %22 : vector<64x192xf32>
      %24 = arith.mulf %18, %23 : vector<64x192xf32>
      %25 = arith.truncf %24 : vector<64x192xf32> to vector<64x192xbf16>
      %c0_16 = arith.constant 0 : index
      %c0_17 = arith.constant 0 : index
      %26 = vector.load %arg7[%c0_16, %c0_17] : memref<64x192xbf16, #tpu.memory_space<vmem>>, vector<64x192xbf16>
      tpu.vector_store %arg7[%c0_16, %c0_17], %25 {strides = array<i32>} : memref<64x192xbf16, #tpu.memory_space<vmem>>, vector<64x192xbf16>,
    } else {
    }
    return
  }
  func.func @transform_0(%arg0: i32, %arg1: i32, %arg2: i32) -> (i32, i32) {
    %c0_i32 = arith.constant 0 : i32
    return %arg0, %arg2 : i32, i32
  }
  func.func @transform_1(%arg0: i32, %arg1: i32, %arg2: i32) -> (i32, i32) {
    %c0_i32 = arith.constant 0 : i32
    return %arg2, %arg1 : i32, i32
  }
  func.func @transform_2(%arg0: i32, %arg1: i32, %arg2: i32) -> (i32, i32) {
    %c0_i32 = arith.constant 0 : i32
    %c0_i32_0 = arith.constant 0 : i32
    return %c0_i32, %arg1 : i32, i32
  }
  func.func @transform_3(%arg0: i32, %arg1: i32, %arg2: i32) -> (i32, i32) {
    %c0_i32 = arith.constant 0 : i32
    %c0_i32_0 = arith.constant 0 : i32
    return %c0_i32, %arg1 : i32, i32
  }
  func.func @transform_4(%arg0: i32, %arg1: i32, %arg2: i32) -> (i32, i32) {
    %c0_i32 = arith.constant 0 : i32
    return %arg0, %arg1 : i32, i32
  }
}

module attributes {stable_mosaic.version = 11 : i64} {
  func.func @_mm_kernel(%arg0: i32, %arg1: i32, %arg2: i32, %arg3: memref<64x192xbf16, #tpu.memory_space<vmem>>, %arg4: memref<192x128xbf16, #tpu.memory_space<vmem>>, %arg5: memref<1x128xf32, #tpu.memory_space<vmem>>, %arg6: memref<1x128xf32, #tpu.memory_space<vmem>>, %arg7: memref<64x128xbf16, #tpu.memory_space<vmem>>, %arg8: memref<64x128xbf16, #tpu.memory_space<vmem>>, %arg9: memref<64x128xf32, #tpu.memory_space<vmem>>) attributes {dimension_semantics = [#tpu.dimension_semantics<parallel>, #tpu.dimension_semantics<parallel>, #tpu.dimension_semantics<arbitrary>], iteration_bounds = array<i64: 2, 1, 1>, scalar_prefetch = 0 : i64, scratch_operands = 1 : i64, tpu.core_type = #tpu.core_type<tc>, window_params = [{transform_indices = @transform_0, window_bounds = array<i64: 64, 192>}, {transform_indices = @transform_1, window_bounds = array<i64: 192, 128>}, {transform_indices = @transform_2, window_bounds = array<i64: 1, 128>}, {transform_indices = @transform_3, window_bounds = array<i64: 1, 128>}, {transform_indices = @transform_4, window_bounds = array<i64: 64, 128>}, {transform_indices = @transform_5, window_bounds = array<i64: 64, 128>}]} {
    %c0_i32 = arith.constant 0 : i32
    %0 = arith.cmpi eq, %arg2, %c0_i32 : i32
    %1 = arith.extui %0 : i1 to i32
    %c0_i32_0 = arith.constant 0 : i32
    %2 = arith.cmpi ne, %1, %c0_i32_0 : i32
    scf.if %2 {
      %cst_10 = arith.constant 0.000000e+00 : f32
      %12 = vector.broadcast %cst_10 : f32 to vector<64x128xf32>
      %c0_11 = arith.constant 0 : index
      %c0_12 = arith.constant 0 : index
      %13 = vector.load %arg9[%c0_11, %c0_12] : memref<64x128xf32, #tpu.memory_space<vmem>>, vector<64x128xf32>
      tpu.vector_store %arg9[%c0_11, %c0_12], %12 {strides = array<i32>} : memref<64x128xf32, #tpu.memory_space<vmem>>, vector<64x128xf32>,
    } else {
    }
    %c0 = arith.constant 0 : index
    %c0_1 = arith.constant 0 : index
    %3 = vector.load %arg3[%c0, %c0_1] : memref<64x192xbf16, #tpu.memory_space<vmem>>, vector<64x192xbf16>
    %c0_2 = arith.constant 0 : index
    %c0_3 = arith.constant 0 : index
    %4 = vector.load %arg9[%c0_2, %c0_3] : memref<64x128xf32, #tpu.memory_space<vmem>>, vector<64x128xf32>
    %c0_4 = arith.constant 0 : index
    %c0_5 = arith.constant 0 : index
    %5 = vector.load %arg4[%c0_4, %c0_5] : memref<192x128xbf16, #tpu.memory_space<vmem>>, vector<192x128xbf16>
    %cst = arith.constant dense<0.000000e+00> : vector<64x128xf32>
    %6 = tpu.matmul %3, %5, %cst {dimension_numbers = #tpu.dot_dimension_numbers<[1], [0], [0], [1], [0, 0, 1, 1], [], []>} : vector<64x192xbf16>, vector<192x128xbf16>, vector<64x128xf32> -> vector<64x128xf32>
    %7 = arith.addf %4, %6 : vector<64x128xf32>
    %c0_6 = arith.constant 0 : index
    %c0_7 = arith.constant 0 : index
    %8 = vector.load %arg9[%c0_6, %c0_7] : memref<64x128xf32, #tpu.memory_space<vmem>>, vector<64x128xf32>
    tpu.vector_store %arg9[%c0_6, %c0_7], %7 {strides = array<i32>} : memref<64x128xf32, #tpu.memory_space<vmem>>, vector<64x128xf32>,
    %c0_i32_8 = arith.constant 0 : i32
    %9 = arith.cmpi eq, %arg2, %c0_i32_8 : i32
    %10 = arith.extui %9 : i1 to i32
    %c0_i32_9 = arith.constant 0 : i32
    %11 = arith.cmpi ne, %10, %c0_i32_9 : i32
    scf.if %11 {
      %c0_10 = arith.constant 0 : index
      %c0_11 = arith.constant 0 : index
      %12 = vector.load %arg9[%c0_10, %c0_11] : memref<64x128xf32, #tpu.memory_space<vmem>>, vector<64x128xf32>
      %c0_12 = arith.constant 0 : index
      %c0_13 = arith.constant 0 : index
      %13 = vector.load %arg5[%c0_12, %c0_13] : memref<1x128xf32, #tpu.memory_space<vmem>>, vector<1x128xf32>
      %14 = vector.broadcast %13 : vector<1x128xf32> to vector<64x128xf32>
      %15 = arith.mulf %12, %14 : vector<64x128xf32>
      %c0_14 = arith.constant 0 : index
      %c0_15 = arith.constant 0 : index
      %16 = vector.load %arg6[%c0_14, %c0_15] : memref<1x128xf32, #tpu.memory_space<vmem>>, vector<1x128xf32>
      %17 = vector.broadcast %16 : vector<1x128xf32> to vector<64x128xf32>
      %18 = arith.addf %15, %17 : vector<64x128xf32>
      %c0_16 = arith.constant 0 : index
      %c0_17 = arith.constant 0 : index
      %19 = vector.load %arg7[%c0_16, %c0_17] : memref<64x128xbf16, #tpu.memory_space<vmem>>, vector<64x128xbf16>
      %20 = arith.extf %19 : vector<64x128xbf16> to vector<64x128xf32>
      %21 = arith.addf %18, %20 : vector<64x128xf32>
      %22 = arith.truncf %21 : vector<64x128xf32> to vector<64x128xbf16>
      %c0_18 = arith.constant 0 : index
      %c0_19 = arith.constant 0 : index
      %23 = vector.load %arg8[%c0_18, %c0_19] : memref<64x128xbf16, #tpu.memory_space<vmem>>, vector<64x128xbf16>
      tpu.vector_store %arg8[%c0_18, %c0_19], %22 {strides = array<i32>} : memref<64x128xbf16, #tpu.memory_space<vmem>>, vector<64x128xbf16>,
    } else {
    }
    return
  }
  func.func @transform_0(%arg0: i32, %arg1: i32, %arg2: i32) -> (i32, i32) {
    %c0_i32 = arith.constant 0 : i32
    return %arg0, %arg2 : i32, i32
  }
  func.func @transform_1(%arg0: i32, %arg1: i32, %arg2: i32) -> (i32, i32) {
    %c0_i32 = arith.constant 0 : i32
    return %arg2, %arg1 : i32, i32
  }
  func.func @transform_2(%arg0: i32, %arg1: i32, %arg2: i32) -> (i32, i32) {
    %c0_i32 = arith.constant 0 : i32
    %c0_i32_0 = arith.constant 0 : i32
    return %c0_i32, %arg1 : i32, i32
  }
  func.func @transform_3(%arg0: i32, %arg1: i32, %arg2: i32) -> (i32, i32) {
    %c0_i32 = arith.constant 0 : i32
    %c0_i32_0 = arith.constant 0 : i32
    return %c0_i32, %arg1 : i32, i32
  }
  func.func @transform_4(%arg0: i32, %arg1: i32, %arg2: i32) -> (i32, i32) {
    %c0_i32 = arith.constant 0 : i32
    return %arg0, %arg1 : i32, i32
  }
  func.func @transform_5(%arg0: i32, %arg1: i32, %arg2: i32) -> (i32, i32) {
    %c0_i32 = arith.constant 0 : i32
    return %arg0, %arg1 : i32, i32
  }
}

</mosaic_0001>

<bundles_post_ra>
// kernel: efficientnet_encoder_forward.11
= control target key start
LH: loop header
LB: loop body
LE: loop exit
PB: predicated region body
PF: predicated region fallthrough
CT: control target
= control target key end

     0   :  { %s1917_s15 = smov 0   ;;  %s1919_s16 = smov 0   ;;  %s2244_s0 = inlined_call_operand.vmem [shape: bf16[512,27], index: 0, kind: input, shape index: {}]   ;;  %s2245_s1 = inlined_call_operand.vmem [shape: bf16[27,128], index: 1, kind: input, shape index: {}]   ;;  %s2246_s2 = inlined_call_operand.vmem [shape: f32[1,128], index: 2, kind: input, shape index: {}]   ;;  %s2247_s3 = inlined_call_operand.vmem [shape: f32[1,128], index: 3, kind: input, shape index: {}]   ;;  %s2248_s4 = inlined_call_operand.vmem [shape: bf16[512,128], index: 4, kind: output, shape index: {}]  }
   0x1   :  { %s1921_s17 = smov 0  }
   0x2 LB: > { %s33_s18 = sadd.s32 1, %s1885_s16  ;;  %p1404_p0 = scmp.ge.s32.totalorder %s1889_s17, 1  ;;  %s1889_s17 = sphi %s1921_s17, %s14_s17   ;;  %s1885_s16 = sphi %s1919_s16, %s2250_s16   ;;  %s1881_s15 = sphi %s1917_s15, %s2249_s15  }
   0x3   : > { %p35_p1 = scmp.ge.s32.totalorder %s33_s18, 2  ;;  %p221_p2 = scmp.lt.s32.totalorder %s1889_s17, 3 }
   0x5   : > { %s2252_s18 = smov (%p35_p1, %s33_s18), 0  ;;  %p222_p3 = pnand %p1404_p0, %p221_p2 }
   0x6   : > { %v1721_v0 = vld [vmem:[%s2245_s1] sm:$0xff] (!%p222_p3)   ;;  %vm545_vm0 = vcmask (!%p222_p3), 1044480   ;;  %v1722_v1 = vld [vmem:[%s2245_s1 + $0x8] sm:$0x3f] (!%p222_p3)   ;;  %vm546_vm1 = vcmask (!%p222_p3), 1045504   ;;  %s1405_s23 = sshll.u32 (!%p222_p3), %s1881_s15, 5 }
   0x7   : > { %225 = sbr.rel (%p222_p3) target bundleno = 323 (0x143), region = 36  ;;  %1656 = vmatprep.subr.bf16.mxu0 (!%p222_p3), %v1721_v0  ;;  %1692 = vmatprep.subr.bf16.mxu1 (!%p222_p3), %v1721_v0  ;;  %v1891_v2 = vmov (!%p222_p3), 65535   ;;  %p268_p4 = scmp.lt.s32.totalorder (!%p222_p3), %s1405_s23, 63  ;;  %vm496_vm2 = vcmask (!%p222_p3), 220160   ;;  %v1986_v22 = vld [vmem:[%s2246_s2] ss:$0 sm:$0xff] (!%p222_p3) }
   0x8   : > { %1657 = vmatpush3.bf16.msra.mxu0 (!%p222_p3), %v1721_v0  ;;  %1694 = vmatpush3.bf16.msra.mxu1 (!%p222_p3), %v1721_v0  ;;  %v547_v3 = vsel (!%p222_p3), %vm545_vm0, 4294967295, %v1891_v2  ;;  %v1991_v24 = vld [vmem:[%s2247_s3] ss:$0 sm:$0xff] (!%p222_p3) }
   0x9   : > { %v548_v4 = vsel (!%p222_p3), %vm546_vm1, %v547_v3, 0 }
   0xa   : > { %v550_v5 = vand.u32 (!%p222_p3), %v1722_v1, %v548_v4 }
   0xc   : > { %1658 = vmatprep.subr.bf16.mxu0 (!%p222_p3), %v550_v5  ;;  %1693 = vmatprep.subr.bf16.mxu1 (!%p222_p3), %v550_v5 }
   0xd   : > { %1659 = vmatpush3.bf16.msra.mxu0 (!%p222_p3), %v550_v5  ;;  %1695 = vmatpush3.bf16.msra.mxu1 (!%p222_p3), %v550_v5 }
   0xe   : > { %s2254_s23 = smov (!%p268_p4, %s1405_s23), 63 }
   0xf   : > { %s1406_s24 = sshll.u32 %s2254_s23, 2 }
  0x10   : > { %s1949_s27 = scalar_lea.vmem %s2244_s0, %s1406_s24  ;;  %s2137_s8 = scalar_lea.vmem %s2248_s4, %s1406_s24 }
  0x11   : > { %v1723_v6 = vld [vmem:[%s1949_s27] sm:$0xff]   ;;  %v1725_v8 = vld [vmem:[%s1949_s27 + $0x8] sm:$0xff]   ;;  %v1727_v10 = vld [vmem:[%s1949_s27 + $0x10] sm:$0xff]  }
  0x12   : > { %v1724_v7 = vld [vmem:[%s1949_s27 + $0x40] sm:$0xff]   ;;  %1660 = vmatprep.mubr.msk.bf16.mxu0 %vm496_vm2, %v1723_v6  ;;  %v1726_v9 = vld [vmem:[%s1949_s27 + $0x48] sm:$0xff]   ;;  %v1728_v11 = vld [vmem:[%s1949_s27 + $0x50] sm:$0xff]  }
  0x13   : > { %1676 = vmatprep.mubr.msk.bf16.mxu1 %vm496_vm2, %v1724_v7  ;;  %1661 = vmatmul.mubr.msk.bf16.vlgmr.msra.gmra.mrb[0].mxu0 %vm496_vm2, %v1725_v8  ;;  %v1729_v12 = vld [vmem:[%s1949_s27 + $0x18] sm:$0xff]   ;;  %v1731_v14 = vld [vmem:[%s1949_s27 + $0x20] sm:$0xff]   ;;  %v1733_v16 = vld [vmem:[%s1949_s27 + $0x28] sm:$0xff]  }
  0x14   : > { %1677 = vmatmul.mubr.msk.bf16.vlgmr.msra.gmra.mrb[0].mxu1 %vm496_vm2, %v1726_v9  ;;  %1664 = vmatprep.mubr.msk.bf16.mxu0 %vm496_vm2, %v1727_v10  ;;  %v1730_v13 = vld [vmem:[%s1949_s27 + $0x58] sm:$0xff]   ;;  %v1732_v15 = vld [vmem:[%s1949_s27 + $0x60] sm:$0xff]   ;;  %v1734_v17 = vld [vmem:[%s1949_s27 + $0x68] sm:$0xff]  }
  0x15   : > { %1680 = vmatprep.mubr.msk.bf16.mxu1 %vm496_vm2, %v1728_v11  ;;  %v1735_v18 = vld [vmem:[%s1949_s27 + $0x30] sm:$0xff]   ;;  %v1737_v20 = vld [vmem:[%s1949_s27 + $0x38] sm:$0xff]  }
  0x16   : > { %v1736_v19 = vld [vmem:[%s1949_s27 + $0x70] sm:$0xff]   ;;  %v1738_v21 = vld [vmem:[%s1949_s27 + $0x78] sm:$0xff]  }
  0x1b   : > { %1665 = vmatmul.mubr.msk.bf16.gmra.mrb[4].mxu0 %vm496_vm2, %v1729_v12 }
  0x1c   : > { %1681 = vmatmul.mubr.msk.bf16.gmra.mrb[4].mxu1 %vm496_vm2, %v1730_v13  ;;  %1668 = vmatprep.mubr.msk.bf16.mxu0 %vm496_vm2, %v1731_v14 }
  0x1d   : > { %1684 = vmatprep.mubr.msk.bf16.mxu1 %vm496_vm2, %v1732_v15 }
  0x23   : > { %1669 = vmatmul.mubr.msk.bf16.gmra.mrb[8].mxu0 %vm496_vm2, %v1733_v16 }
  0x24   : > { %1685 = vmatmul.mubr.msk.bf16.gmra.mrb[8].mxu1 %vm496_vm2, %v1734_v17  ;;  %1672 = vmatprep.mubr.msk.bf16.mxu0 %vm496_vm2, %v1735_v18 }
  0x25   : > { %1688 = vmatprep.mubr.msk.bf16.mxu1 %vm496_vm2, %v1736_v19 }
  0x2b   : > { %1673 = vmatmul.mubr.msk.bf16.gmra.mrb[12].mxu0 %vm496_vm2, %v1737_v20 }
  0x2c   : > { %1689 = vmatmul.mubr.msk.bf16.gmra.mrb[12].mxu1 %vm496_vm2, %v1738_v21 }
  0xe6   : > { %v1662_v23 = vpop.f32.mrb[0].mxu0 }
  0xe7   : > { %v821_v25 = vmul.f32 %v1662_v23, %v1986_v22  ;;  %v1678_v26 = vpop.f32.mrb[0].mxu1  ;;  %v586_v27 = vpop.f32.mrb[1].mxu0 }
  0xe8   : > { %v837_v28 = vmul.f32 %v1678_v26, %v1986_v22  ;;  %v819_v29 = vmul.f32 %v1986_v22, %v586_v27  ;;  %v650_v30 = vpop.f32.mrb[1].mxu1  ;;  %v1663_v31 = vpop.f32.mrb[2].mxu0 }
  0xe9   : > { %v1997_v32 = vadd.f32 %v1991_v24, %v821_v25  ;;  %v835_v33 = vmul.f32 %v1986_v22, %v650_v30  ;;  %v822_v34 = vmul.f32 %v1663_v31, %v1986_v22  ;;  %v1679_v35 = vpop.f32.mrb[2].mxu1  ;;  %v589_v36 = vpop.f32.mrb[3].mxu0 }
  0xea   : > { %v2002_v37 = vadd.f32 %v1991_v24, %v837_v28  ;;  %v2005_v38 = vadd.f32 %v1991_v24, %v819_v29  ;;  %v838_v39 = vmul.f32 %v1679_v35, %v1986_v22  ;;  %v820_v40 = vmul.f32 %v1986_v22, %v589_v36  ;;  %v653_v41 = vpop.f32.mrb[3].mxu1 }
  0xeb   : > { %v1447_v42 = vmul.f32 -1.442695, %v1997_v32  ;;  %v2011_v43 = vadd.f32 %v1991_v24, %v835_v33  ;;  %v2014_v44 = vadd.f32 %v1991_v24, %v822_v34  ;;  %v836_v45 = vmul.f32 %v1986_v22, %v653_v41 }
  0xec   : > { %v1463_v46 = vmul.f32 -1.442695, %v2002_v37  ;;  %v1445_v47 = vmul.f32 -1.442695, %v2005_v38  ;;  %v2020_v48 = vadd.f32 %v1991_v24, %v838_v39  ;;  %v2023_v49 = vadd.f32 %v1991_v24, %v820_v40 }
  0xed   : > { %1739 = vpow2.f32 %v1447_v42  ;;  %v1461_v50 = vmul.f32 -1.442695, %v2011_v43  ;;  %v1448_v51 = vmul.f32 -1.442695, %v2014_v44  ;;  %v2028_v52 = vadd.f32 %v1991_v24, %v836_v45 }
  0xee   : > { %1741 = vpow2.f32 %v1463_v46  ;;  %v1464_v53 = vmul.f32 -1.442695, %v2020_v48  ;;  %v1666_v54 = vpop.f32.mrb[4].mxu0  ;;  %v1446_v55 = vmul.f32 -1.442695, %v2023_v49 }
  0xef   : > { %1743 = vpow2.f32 %v1445_v47  ;;  %v825_v56 = vmul.f32 %v1666_v54, %v1986_v22  ;;  %v1682_v57 = vpop.f32.mrb[4].mxu1  ;;  %v602_v58 = vpop.f32.mrb[5].mxu0  ;;  %v1462_v59 = vmul.f32 -1.442695, %v2028_v52 }
  0xf0   : > { %1745 = vpow2.f32 %v1461_v50  ;;  %v841_v60 = vmul.f32 %v1682_v57, %v1986_v22  ;;  %v823_v61 = vmul.f32 %v1986_v22, %v602_v58  ;;  %v666_v62 = vpop.f32.mrb[5].mxu1  ;;  %v1667_v63 = vpop.f32.mrb[6].mxu0 }
  0xf1   : > { %1747 = vpow2.f32 %v1448_v51  ;;  %v2037_v0 = vadd.f32 %v1991_v24, %v825_v56  ;;  %v839_v1 = vmul.f32 %v1986_v22, %v666_v62  ;;  %v826_v2 = vmul.f32 %v1667_v63, %v1986_v22  ;;  %v1683_v3 = vpop.f32.mrb[6].mxu1  ;;  %v605_v4 = vpop.f32.mrb[7].mxu0 }
  0xf2   : > { %1749 = vpow2.f32 %v1464_v53  ;;  %v2042_v5 = vadd.f32 %v1991_v24, %v841_v60  ;;  %v2045_v6 = vadd.f32 %v1991_v24, %v823_v61  ;;  %v669_v7 = vpop.f32.mrb[7].mxu1  ;;  %v842_v13 = vmul.f32 %v1683_v3, %v1986_v22 }
  0xf3   : > { %1751 = vpow2.f32 %v1446_v55  ;;  %v1451_v8 = vmul.f32 -1.442695, %v2037_v0  ;;  %v2049_v9 = vadd.f32 %v1991_v24, %v839_v1  ;;  %v2052_v10 = vadd.f32 %v1991_v24, %v826_v2 }
  0xf4   : > { %1753 = vpow2.f32 %v1462_v59  ;;  %v1467_v11 = vmul.f32 -1.442695, %v2042_v5  ;;  %v1449_v12 = vmul.f32 -1.442695, %v2045_v6  ;;  %v2060_v23 = vadd.f32 %v1991_v24, %v842_v13 }
  0xf5   : > { %1755 = vpow2.f32 %v1451_v8  ;;  %v1465_v14 = vmul.f32 -1.442695, %v2049_v9  ;;  %v1452_v15 = vmul.f32 -1.442695, %v2052_v10  ;;  %v824_v25 = vmul.f32 %v1986_v22, %v605_v4 }
  0xf6   : > { %1757 = vpow2.f32 %v1467_v11  ;;  %v1670_v16 = vpop.f32.mrb[8].mxu0  ;;  %v840_v30 = vmul.f32 %v1986_v22, %v669_v7  ;;  %v1468_v45 = vmul.f32 -1.442695, %v2060_v23 }
  0xf7   : > { %v1740_v17 = vpop.eup %1739  ;;  %1759 = vpow2.f32 %v1449_v12  ;;  %v1686_v18 = vpop.f32.mrb[8].mxu1  ;;  %v2066_v46 = vadd.f32 %v1991_v24, %v824_v25  ;;  %v829_v53 = vmul.f32 %v1670_v16, %v1986_v22 }
  0xf8   : > { %v618_v19 = vpop.f32.mrb[9].mxu0  ;;  %v1742_v20 = vpop.eup %1741  ;;  %v988_v21 = vadd.f32 1.0, %v1740_v17  ;;  %1761 = vpow2.f32 %v1465_v14  ;;  %v2069_v51 = vadd.f32 %v1991_v24, %v840_v30  ;;  %v845_v56 = vmul.f32 %v1686_v18, %v1986_v22 }
  0xf9   : > { %v682_v26 = vpop.f32.mrb[9].mxu1  ;;  %v1671_v27 = vpop.f32.mrb[10].mxu0  ;;  %v1004_v29 = vadd.f32 1.0, %v1742_v20  ;;  %1763 = vpow2.f32 %v1452_v15  ;;  %v827_v57 = vmul.f32 %v1986_v22, %v618_v19  ;;  %v1450_v4 = vmul.f32 -1.442695, %v2066_v46 }
  0xfa   : > { %v1744_v28 = vpop.eup %1743  ;;  %v1687_v31 = vpop.f32.mrb[10].mxu1  ;;  %1765 = vrcp.f32 %v988_v21  ;;  %v843_v61 = vmul.f32 %v1986_v22, %v682_v26  ;;  %v830_v62 = vmul.f32 %v1671_v27, %v1986_v22  ;;  %v2085_v14 = vadd.f32 %v1991_v24, %v829_v53 }
  0xfb   : > { %v621_v33 = vpop.f32.mrb[11].mxu0  ;;  %v1746_v34 = vpop.eup %1745  ;;  %v986_v35 = vadd.f32 1.0, %v1744_v28  ;;  %1767 = vrcp.f32 %v1004_v29  ;;  %v846_v7 = vmul.f32 %v1687_v31, %v1986_v22  ;;  %v2093_v20 = vadd.f32 %v1991_v24, %v845_v56 }
  0xfc   : > { %v685_v36 = vpop.f32.mrb[11].mxu1  ;;  %v1748_v39 = vpop.eup %1747  ;;  %v1002_v40 = vadd.f32 1.0, %v1746_v34  ;;  %v828_v15 = vmul.f32 %v1986_v22, %v621_v33  ;;  %v2096_v21 = vadd.f32 %v1991_v24, %v827_v57  ;;  %v2101_v28 = vadd.f32 %v1991_v24, %v843_v61 }
  0xfd   : > { %v1750_v41 = vpop.eup %1749  ;;  %1769 = vrcp.f32 %v986_v35  ;;  %v989_v42 = vadd.f32 1.0, %v1748_v39  ;;  %v2104_v29 = vadd.f32 %v1991_v24, %v830_v62  ;;  %v2107_v33 = vadd.f32 %v1991_v24, %v846_v7 }
  0xfe   : > { %v1752_v47 = vpop.eup %1751  ;;  %1771 = vrcp.f32 %v1002_v40  ;;  %v1005_v50 = vadd.f32 1.0, %v1750_v41  ;;  %v1674_v58 = vpop.f32.mrb[12].mxu0  ;;  %v844_v34 = vmul.f32 %v1986_v22, %v685_v36  ;;  %v1466_v39 = vmul.f32 -1.442695, %v2069_v51 }
  0xff   : > { %v1754_v54 = vpop.eup %1753  ;;  %1773 = vrcp.f32 %v989_v42  ;;  %v987_v55 = vadd.f32 1.0, %v1752_v47  ;;  %v1690_v63 = vpop.f32.mrb[12].mxu1  ;;  %v2112_v40 = vadd.f32 %v1991_v24, %v828_v15  ;;  %v833_v41 = vmul.f32 %v1674_v58, %v1986_v22 }
 0x100   : > { %v1756_v59 = vpop.eup %1755  ;;  %1775 = vrcp.f32 %v1005_v50  ;;  %v1003_v60 = vadd.f32 1.0, %v1754_v54  ;;  %v2076_v1 = vpop.f32.mrb[13].mxu0  ;;  %v1455_v47 = vmul.f32 -1.442695, %v2085_v14  ;;  %v1471_v50 = vmul.f32 -1.442695, %v2093_v20 }
 0x101   : > { %v1758_v2 = vpop.eup %1757  ;;  %1777 = vrcp.f32 %v987_v55  ;;  %v992_v3 = vadd.f32 1.0, %v1756_v59  ;;  %v2080_v8 = vpop.f32.mrb[13].mxu1  ;;  %v849_v53 = vmul.f32 %v1690_v63, %v1986_v22  ;;  %v1453_v36 = vmul.f32 -1.442695, %v2096_v21 }
 0x102   : > { %v2082_v11 = vpop.f32.mrb[14].mxu0  ;;  %v1760_v12 = vpop.eup %1759  ;;  %1779 = vrcp.f32 %v1003_v60  ;;  %v1008_v13 = vadd.f32 1.0, %v1758_v2  ;;  %v1469_v55 = vmul.f32 -1.442695, %v2101_v28  ;;  %v1456_v56 = vmul.f32 -1.442695, %v2104_v29 }
 0x103   : > { %v2088_v16 = vpop.f32.mrb[14].mxu1  ;;  %v2090_v17 = vpop.f32.mrb[15].mxu0  ;;  %1781 = vrcp.f32 %v992_v3  ;;  %v990_v19 = vadd.f32 1.0, %v1760_v12  ;;  %v1472_v59 = vmul.f32 -1.442695, %v2107_v33  ;;  %v2124_v60 = vadd.f32 %v1991_v24, %v844_v34 }
 0x104   : > { %v1762_v18 = vpop.eup %1761  ;;  %v2098_v25 = vpop.f32.mrb[15].mxu1  ;;  %1783 = vrcp.f32 %v1008_v13  ;;  %v2129_v63 = vadd.f32 %v1991_v24, %v833_v41 }
 0x105   : > { %v1764_v26 = vpop.eup %1763  ;;  %v1006_v27 = vadd.f32 1.0, %v1762_v18  ;;  %1785 = vrcp.f32 %v990_v19 }
 0x106   : > { %v1766_v30 = vpop.eup %1765  ;;  %v993_v31 = vadd.f32 1.0, %v1764_v26 }
 0x107   : > { %v1768_v35 = vpop.eup %1767  ;;  %1787 = vrcp.f32 %v1006_v27  ;;  %v1084_v58 = vmul.f32 %v1766_v30, %v1997_v32  ;;  %v1459_v30 = vmul.f32 -1.442695, %v2129_v63 }
 0x108   : > { %v1770_v42 = vpop.eup %1769  ;;  %1789 = vrcp.f32 %v993_v31  ;;  %v1100_v3 = vmul.f32 %v1768_v35, %v2002_v37 }
 0x109   : > { %v1772_v54 = vpop.eup %1771  ;;  %1791 = vpow2.f32 %v1468_v45  ;;  %v1454_v45 = vmul.f32 -1.442695, %v2112_v40  ;;  %v1082_v7 = vmul.f32 %v1770_v42, %v2005_v38  ;;  %v1470_v38 = vmul.f32 -1.442695, %v2124_v60 }
 0x10a   : > { %v1774_v57 = vpop.eup %1773  ;;  %1793 = vpow2.f32 %v1450_v4  ;;  %v1098_v15 = vmul.f32 %v1772_v54, %v2011_v43 }
 0x10b   : > { %v1776_v61 = vpop.eup %1775  ;;  %v1085_v62 = vmul.f32 %v1774_v57, %v2014_v44  ;;  %1795 = vpow2.f32 %v1466_v39  ;;  %v2141_v44 = vadd.f32 %v1991_v24, %v849_v53 }
 0x10c   : > { %v1778_v2 = vpop.eup %1777  ;;  %v1101_v32 = vmul.f32 %v1776_v61, %v2020_v48  ;;  %1797 = vpow2.f32 %v1455_v47 }
 0x10d   : > { %v1780_v4 = vpop.eup %1779  ;;  %v1551_v12 = vpack.c.bf16 %v1085_v62, %v1084_v58  ;;  %v1083_v37 = vmul.f32 %v1778_v2, %v2023_v49  ;;  %1799 = vpow2.f32 %v1471_v50  ;;  %v847_v58 = vmul.f32 %v1986_v22, %v2080_v8 }
 0x10e   : > { %v1782_v13 = vpop.eup %1781  ;;  %v1591_v18 = vpack.c.bf16 %v1101_v32, %v1100_v3  ;;  %v1099_v19 = vmul.f32 %v1780_v4, %v2028_v52  ;;  %1801 = vpow2.f32 %v1453_v36  ;;  %v1475_v52 = vmul.f32 -1.442695, %v2141_v44 }
 0x10f   : > { %v2147_v48 = vpop.eup %1783  ;;  %1623 = vst [vmem:[%s2137_s8 + $0x8] sm:$0xff] %v1551_v12   ;;  %v1546_v26 = vpack.c.bf16 %v1083_v37, %v1082_v7  ;;  %1803 = vpow2.f32 %v1469_v55  ;;  %v1088_v35 = vmul.f32 %v1782_v13, %v2037_v0  ;;  %v831_v0 = vmul.f32 %v1986_v22, %v2076_v1 }
 0x110   : > { %v2151_v27 = vpop.eup %1785  ;;  %1631 = vst [vmem:[%s2137_s8 + $0x48] sm:$0xff] %v1591_v18   ;;  %v1586_v49 = vpack.c.bf16 %v1099_v19, %v1098_v15  ;;  %1805 = vpow2.f32 %v1456_v56  ;;  %v834_v62 = vmul.f32 %v2082_v11, %v1986_v22  ;;  %v850_v3 = vmul.f32 %v2088_v16, %v1986_v22 }
 0x111   : > { %v2155_v43 = vpop.eup %1787  ;;  %1547 = vst [vmem:[%s2137_s8] sm:$0xff] %v1546_v26   ;;  %1807 = vpow2.f32 %v1472_v59  ;;  %v2172_v4 = vadd.f32 %v1991_v24, %v831_v0  ;;  %v832_v8 = vmul.f32 %v1986_v22, %v2090_v17  ;;  %v2177_v11 = vadd.f32 %v1991_v24, %v847_v58 }
 0x112   : > { %v1790_v31 = vpop.eup %1789  ;;  %1630 = vst [vmem:[%s2137_s8 + $0x40] sm:$0xff] %v1586_v49   ;;  %1809 = vpow2.f32 %v1454_v45  ;;  %v848_v37 = vmul.f32 %v1986_v22, %v2098_v25  ;;  %v2182_v15 = vadd.f32 %v1991_v24, %v834_v62  ;;  %v2185_v17 = vadd.f32 %v1991_v24, %v850_v3 }
 0x113   : > { %v1792_v34 = vpop.eup %1791  ;;  %v1089_v39 = vmul.f32 %v1790_v31, %v2052_v10  ;;  %1811 = vpow2.f32 %v1470_v38  ;;  %v1457_v38 = vmul.f32 -1.442695, %v2172_v4  ;;  %v2189_v49 = vadd.f32 %v1991_v24, %v832_v8 }
 0x114   : > { %v1794_v41 = vpop.eup %1793  ;;  %v1009_v42 = vadd.f32 1.0, %v1792_v34  ;;  %1813 = vpow2.f32 %v1459_v30  ;;  %v1473_v25 = vmul.f32 -1.442695, %v2177_v11  ;;  %v2193_v30 = vadd.f32 %v1991_v24, %v848_v37 }
 0x115   : > { %v1796_v47 = vpop.eup %1795  ;;  %v1561_v50 = vpack.c.bf16 %v1089_v39, %v1088_v35  ;;  %v991_v53 = vadd.f32 1.0, %v1794_v41  ;;  %1815 = vpow2.f32 %v1475_v52  ;;  %v1104_v31 = vmul.f32 %v2147_v48, %v2042_v5 }
 0x116   : > { %v1798_v54 = vpop.eup %1797  ;;  %1817 = vrcp.f32 %v1009_v42  ;;  %v1007_v36 = vadd.f32 1.0, %v1796_v47  ;;  %v1460_v35 = vmul.f32 -1.442695, %v2182_v15  ;;  %v1086_v41 = vmul.f32 %v2151_v27, %v2045_v6 }
 0x117   : > { %v1800_v55 = vpop.eup %1799  ;;  %1625 = vst [vmem:[%s2137_s8 + $0x18] sm:$0xff] %v1561_v50   ;;  %1819 = vrcp.f32 %v991_v53  ;;  %v996_v56 = vadd.f32 1.0, %v1798_v54  ;;  %v1102_v42 = vmul.f32 %v2155_v43, %v2049_v9  ;;  %v1476_v24 = vmul.f32 -1.442695, %v2185_v17 }
 0x118   : > { %v1802_v57 = vpop.eup %1801  ;;  %1821 = vrcp.f32 %v1007_v36  ;;  %v1012_v10 = vadd.f32 1.0, %v1800_v55  ;;  %v1474_v6 = vmul.f32 -1.442695, %v2193_v30 }
 0x119   : > { %v1804_v59 = vpop.eup %1803  ;;  %1823 = vrcp.f32 %v996_v56  ;;  %v994_v61 = vadd.f32 1.0, %v1802_v57 }
 0x11a   : > { %v1806_v45 = vpop.eup %1805  ;;  %1825 = vrcp.f32 %v1012_v10  ;;  %v1010_v2 = vadd.f32 1.0, %v1804_v59 }
 0x11b   : > { %v1808_v32 = vpop.eup %1807  ;;  %1827 = vrcp.f32 %v994_v61  ;;  %v997_v1 = vadd.f32 1.0, %v1806_v45 }
 0x11c   : > { %v1810_v7 = vpop.eup %1809  ;;  %1829 = vrcp.f32 %v1010_v2  ;;  %v1013_v12 = vadd.f32 1.0, %v1808_v32 }
 0x11d   : > { %v1812_v13 = vpop.eup %1811  ;;  %1831 = vrcp.f32 %v997_v1  ;;  %v995_v16 = vadd.f32 1.0, %v1810_v7 }
 0x11e   : > { %v1814_v18 = vpop.eup %1813  ;;  %1833 = vrcp.f32 %v1013_v12  ;;  %v1011_v19 = vadd.f32 1.0, %v1812_v13 }
 0x11f   : > { %v1816_v26 = vpop.eup %1815  ;;  %1835 = vrcp.f32 %v995_v16  ;;  %v1000_v62 = vadd.f32 1.0, %v1814_v18 }
 0x120   : > { %v1818_v22 = vpop.eup %1817  ;;  %1837 = vrcp.f32 %v1011_v19  ;;  %v1016_v2 = vadd.f32 1.0, %v1816_v26 }
 0x121   : > { %v1820_v52 = vpop.eup %1819  ;;  %v1105_v34 = vmul.f32 %v1818_v22, %v2060_v23  ;;  %1839 = vpow2.f32 %v1457_v38  ;;  %v1458_v23 = vmul.f32 -1.442695, %v2189_v49 }
 0x122   : > { %v1822_v39 = vpop.eup %1821  ;;  %v1087_v47 = vmul.f32 %v1820_v52, %v2066_v46  ;;  %1841 = vpow2.f32 %v1473_v25 }
 0x123   : > { %v1824_v50 = vpop.eup %1823  ;;  %v1601_v53 = vpack.c.bf16 %v1105_v34, %v1104_v31  ;;  %v1103_v5 = vmul.f32 %v1822_v39, %v2069_v51  ;;  %1843 = vpow2.f32 %v1460_v35 }
 0x124   : > { %v1826_v48 = vpop.eup %1825  ;;  %v1556_v54 = vpack.c.bf16 %v1087_v47, %v1086_v41  ;;  %1845 = vpow2.f32 %v1476_v24  ;;  %v1092_v51 = vmul.f32 %v1824_v50, %v2085_v14 }
 0x125   : > { %v1828_v27 = vpop.eup %1827  ;;  %1633 = vst [vmem:[%s2137_s8 + $0x58] sm:$0xff] %v1601_v53   ;;  %v1596_v9 = vpack.c.bf16 %v1103_v5, %v1102_v42  ;;  %1847 = vpow2.f32 %v1458_v23  ;;  %v1108_v0 = vmul.f32 %v1826_v48, %v2093_v20 }
 0x126   : > { %v1830_v46 = vpop.eup %1829  ;;  %1624 = vst [vmem:[%s2137_s8 + $0x10] sm:$0xff] %v1556_v54   ;;  %1849 = vpow2.f32 %v1474_v6  ;;  %v1090_v58 = vmul.f32 %v1828_v27, %v2096_v21 }
 0x127   : > { %v1832_v43 = vpop.eup %1831  ;;  %1632 = vst [vmem:[%s2137_s8 + $0x50] sm:$0xff] %v1596_v9   ;;  %v1106_v14 = vmul.f32 %v1830_v46, %v2101_v28  ;;  %1851 = vrcp.f32 %v1000_v62 }
 0x128   : > { %v1834_v36 = vpop.eup %1833  ;;  %v1093_v55 = vmul.f32 %v1832_v43, %v2104_v29  ;;  %1853 = vrcp.f32 %v1016_v2 }
 0x129   : > { %v1836_v56 = vpop.eup %1835  ;;  %v1109_v57 = vmul.f32 %v1834_v36, %v2107_v33 }
 0x12a   : > { %v1838_v10 = vpop.eup %1837  ;;  %v1571_v59 = vpack.c.bf16 %v1093_v55, %v1092_v51  ;;  %v1091_v61 = vmul.f32 %v1836_v56, %v2112_v40 }
 0x12b   : > { %v1611_v45 = vpack.c.bf16 %v1109_v57, %v1108_v0  ;;  %v1107_v29 = vmul.f32 %v1838_v10, %v2124_v60  ;;  %v1840_v20 = vpop.eup %1839 }
 0x12c   : > { %1627 = vst [vmem:[%s2137_s8 + $0x28] sm:$0xff] %v1571_v59   ;;  %v1566_v3 = vpack.c.bf16 %v1091_v61, %v1090_v58  ;;  %v1842_v32 = vpop.eup %1841  ;;  %v998_v21 = vadd.f32 1.0, %v1840_v20 }
 0x12d   : > { %1635 = vst [vmem:[%s2137_s8 + $0x68] sm:$0xff] %v1611_v45   ;;  %v1606_v33 = vpack.c.bf16 %v1107_v29, %v1106_v14  ;;  %v1844_v1 = vpop.eup %1843  ;;  %v1014_v40 = vadd.f32 1.0, %v1842_v32 }
 0x12e   : > { %1626 = vst [vmem:[%s2137_s8 + $0x20] sm:$0xff] %v1566_v3   ;;  %v1846_v8 = vpop.eup %1845  ;;  %1855 = vrcp.f32 %v998_v21  ;;  %v1001_v28 = vadd.f32 1.0, %v1844_v1 }
 0x12f   : > { %1634 = vst [vmem:[%s2137_s8 + $0x60] sm:$0xff] %v1606_v33   ;;  %v1848_v7 = vpop.eup %1847  ;;  %1857 = vrcp.f32 %v1014_v40  ;;  %v1017_v60 = vadd.f32 1.0, %v1846_v8 }
 0x130   : > { %v1850_v12 = vpop.eup %1849  ;;  %1859 = vrcp.f32 %v1001_v28  ;;  %v999_v37 = vadd.f32 1.0, %v1848_v7 }
 0x131   : > { %1861 = vrcp.f32 %v1017_v60  ;;  %v1015_v13 = vadd.f32 1.0, %v1850_v12  ;;  %v1852_v16 = vpop.eup %1851 }
 0x132   : > { %1863 = vrcp.f32 %v999_v37  ;;  %v1854_v18 = vpop.eup %1853  ;;  %v1096_v25 = vmul.f32 %v1852_v16, %v2129_v63 }
 0x133   : > { %1865 = vrcp.f32 %v1015_v13  ;;  %v1112_v34 = vmul.f32 %v1854_v18, %v2141_v44 }
 0x138   : > { %v1856_v19 = vpop.eup %1855 }
 0x139   : > { %v1858_v26 = vpop.eup %1857  ;;  %v1094_v41 = vmul.f32 %v1856_v19, %v2172_v4 }
 0x13a   : > { %v1860_v38 = vpop.eup %1859  ;;  %v1110_v24 = vmul.f32 %v1858_v26, %v2177_v11 }
 0x13b   : > { %v1862_v22 = vpop.eup %1861  ;;  %v1097_v52 = vmul.f32 %v1860_v38, %v2182_v15 }
 0x13c   : > { %v1864_v31 = vpop.eup %1863  ;;  %v1113_v35 = vmul.f32 %v1862_v22, %v2185_v17 }
 0x13d   : > { %v1866_v39 = vpop.eup %1865  ;;  %v1581_v42 = vpack.c.bf16 %v1097_v52, %v1096_v25  ;;  %v1095_v47 = vmul.f32 %v1864_v31, %v2189_v49 }
 0x13e   : > { %v1621_v50 = vpack.c.bf16 %v1113_v35, %v1112_v34  ;;  %v1111_v63 = vmul.f32 %v1866_v39, %v2193_v30 }
 0x13f   : > { %1629 = vst [vmem:[%s2137_s8 + $0x38] sm:$0xff] %v1581_v42   ;;  %v1576_v53 = vpack.c.bf16 %v1095_v47, %v1094_v41 }
 0x140   : > { %1637 = vst [vmem:[%s2137_s8 + $0x78] sm:$0xff] %v1621_v50   ;;  %v1616_v15 = vpack.c.bf16 %v1111_v63, %v1110_v24 }
 0x141   : > { %1628 = vst [vmem:[%s2137_s8 + $0x30] sm:$0xff] %v1576_v53  }
 0x142   : > { %1636 = vst [vmem:[%s2137_s8 + $0x70] sm:$0xff] %v1616_v15  }
 0x143 PF: > { %s14_s17 = sadd.s32 1, %s1889_s17   ;;  %s2249_s15 = smov %s1885_s16 }
 0x144   : > { %p11_p5 = scmp.ge.s32.totalorder %s14_s17, 4   ;;  %s2250_s16 = smov %s2252_s18 }
 0x146   :  { %13 = sbr.rel (!%p11_p5) target bundleno = 2 (0x2), region = 83 }

// kernel: efficientnet_encoder_forward.15
= control target key start
LH: loop header
LB: loop body
LE: loop exit
PB: predicated region body
PF: predicated region fallthrough
CT: control target
= control target key end

     0   :  { %s906_s15 = smov 0   ;;  %s908_s16 = smov 0   ;;  %s982_s0 = inlined_call_operand.vmem [shape: bf16[128,128], index: 0, kind: input, shape index: {}]   ;;  %s983_s1 = inlined_call_operand.vmem [shape: bf16[128,128], index: 1, kind: input, shape index: {}]   ;;  %s984_s2 = inlined_call_operand.vmem [shape: f32[1,128], index: 2, kind: input, shape index: {}]   ;;  %s985_s3 = inlined_call_operand.vmem [shape: f32[1,128], index: 3, kind: input, shape index: {}]   ;;  %s986_s4 = inlined_call_operand.vmem [shape: bf16[128,128], index: 4, kind: output, shape index: {}]  }
   0x1   :  { %s910_s17 = smov 0  }
   0x2 LB: > { %s33_s18 = sadd.s32 1, %s875_s16  ;;  %p709_p0 = scmp.ge.s32.totalorder %s879_s17, 1  ;;  %s879_s17 = sphi %s910_s17, %s14_s17   ;;  %s875_s16 = sphi %s908_s16, %s988_s16   ;;  %s871_s15 = sphi %s906_s15, %s987_s15  }
   0x3   : > { %p35_p1 = scmp.ge.s32.totalorder %s33_s18, 2  ;;  %p221_p2 = scmp.lt.s32.totalorder %s879_s17, 3 }
   0x5   : > { %s990_s18 = smov (%p35_p1, %s33_s18), 0  ;;  %p222_p3 = pnand %p709_p0, %p221_p2 }
   0x6   : > { %v845_v0 = vld [vmem:[%s983_s1] sm:$0xff] (!%p222_p3)   ;;  %s710_s21 = sshll.u32 (!%p222_p3), %s871_s15, 3  ;;  %v846_v1 = vld [vmem:[%s983_s1 + $0x8] sm:$0xff] (!%p222_p3)   ;;  %v847_v2 = vld [vmem:[%s983_s1 + $0x10] sm:$0xff] (!%p222_p3)  }
   0x7   : > { %225 = sbr.rel (%p222_p3) target bundleno = 261 (0x105), region = 36  ;;  %p268_p4 = scmp.lt.s32.totalorder (!%p222_p3), %s710_s21, 15  ;;  %781 = vmatprep.subr.bf16.mxu0 (!%p222_p3), %v845_v0  ;;  %805 = vmatprep.subr.bf16.mxu1 (!%p222_p3), %v845_v0  ;;  %v848_v3 = vld [vmem:[%s983_s1 + $0x18] sm:$0xff] (!%p222_p3)   ;;  %v849_v6 = vld [vmem:[%s983_s1 + $0x20] sm:$0xff] (!%p222_p3)   ;;  %v850_v7 = vld [vmem:[%s983_s1 + $0x28] sm:$0xff] (!%p222_p3)  }
   0x8   : > { %782 = vmatpush3.bf16.msra.mxu0 (!%p222_p3), %v845_v0  ;;  %813 = vmatpush3.bf16.msra.mxu1 (!%p222_p3), %v845_v0  ;;  %v851_v8 = vld [vmem:[%s983_s1 + $0x30] sm:$0xff] (!%p222_p3)   ;;  %v852_v9 = vld [vmem:[%s983_s1 + $0x38] sm:$0xff] (!%p222_p3)   ;;  %v726_v12 = vld [vmem:[%s984_s2] ss:$0 sm:$0xff] (!%p222_p3) }
   0x9   : > { %783 = vmatprep.subr.bf16.mxu0 (!%p222_p3), %v846_v1  ;;  %806 = vmatprep.subr.bf16.mxu1 (!%p222_p3), %v846_v1  ;;  %v727_v19 = vld [vmem:[%s985_s3] ss:$0 sm:$0xff] (!%p222_p3) }
   0xc   : > { %784 = vmatpush3.bf16.msra.mxu0 (!%p222_p3), %v846_v1  ;;  %814 = vmatpush3.bf16.msra.mxu1 (!%p222_p3), %v846_v1 }
   0xd   : > { %785 = vmatprep.subr.bf16.mxu0 (!%p222_p3), %v847_v2  ;;  %807 = vmatprep.subr.bf16.mxu1 (!%p222_p3), %v847_v2 }
   0xe   : > { %s992_s21 = smov (!%p268_p4, %s710_s21), 15 }
   0xf   : > { %s711_s26 = sshll.u32 %s992_s21, 2 }
  0x10   : > { %s941_s29 = scalar_lea.vmem %s982_s0, %s711_s26  ;;  %786 = vmatpush3.bf16.msra.mxu0 %v847_v2  ;;  %815 = vmatpush3.bf16.msra.mxu1 %v847_v2  ;;  %s298_s24 = scalar_lea.vmem %s986_s4, %s711_s26 }
  0x11   : > { %v853_v4 = vld [vmem:[%s941_s29] sm:$0xff]   ;;  %v854_v5 = vld [vmem:[%s941_s29 + $0x10] sm:$0xff]   ;;  %787 = vmatprep.subr.bf16.mxu0 %v848_v3  ;;  %808 = vmatprep.subr.bf16.mxu1 %v848_v3  ;;  %v855_v10 = vld [vmem:[%s941_s29 + $0x8] sm:$0xff]  }
  0x12   : > { %797 = vmatprep.mubr.bf16.mxu0 %v853_v4  ;;  %801 = vmatprep.mubr.bf16.mxu1 %v854_v5  ;;  %v856_v11 = vld [vmem:[%s941_s29 + $0x18] sm:$0xff]  }
  0x14   : > { %788 = vmatpush3.bf16.msra.mxu0 %v848_v3  ;;  %816 = vmatpush3.bf16.msra.mxu1 %v848_v3 }
  0x15   : > { %789 = vmatprep.subr.bf16.mxu0 %v849_v6  ;;  %809 = vmatprep.subr.bf16.mxu1 %v849_v6 }
  0x18   : > { %790 = vmatpush3.bf16.msra.mxu0 %v849_v6  ;;  %817 = vmatpush3.bf16.msra.mxu1 %v849_v6 }
  0x19   : > { %791 = vmatprep.subr.bf16.mxu0 %v850_v7  ;;  %810 = vmatprep.subr.bf16.mxu1 %v850_v7 }
  0x1c   : > { %792 = vmatpush3.bf16.msra.mxu0 %v850_v7  ;;  %818 = vmatpush3.bf16.msra.mxu1 %v850_v7 }
  0x1d   : > { %793 = vmatprep.subr.bf16.mxu0 %v851_v8  ;;  %811 = vmatprep.subr.bf16.mxu1 %v851_v8 }
  0x20   : > { %794 = vmatpush3.bf16.msra.mxu0 %v851_v8  ;;  %819 = vmatpush3.bf16.msra.mxu1 %v851_v8 }
  0x21   : > { %795 = vmatprep.subr.bf16.mxu0 %v852_v9  ;;  %812 = vmatprep.subr.bf16.mxu1 %v852_v9 }
  0x24   : > { %796 = vmatpush3.bf16.msra.mxu0 %v852_v9  ;;  %820 = vmatpush3.bf16.msra.mxu1 %v852_v9 }
  0x27   : > { %798 = vmatmul.mubr.bf16.vlgmr.msra.gmra.mrb[0].mxu0 %v855_v10  ;;  %802 = vmatmul.mubr.bf16.vlgmr.msra.gmra.mrb[0].mxu1 %v856_v11 }
  0xfa   : > { %v799_v13 = vpop.f32.mrb[0].mxu0  ;;  %v803_v14 = vpop.f32.mrb[0].mxu1 }
  0xfb   : > { %v518_v15 = vmul.f32 %v799_v13, %v726_v12  ;;  %v522_v16 = vmul.f32 %v803_v14, %v726_v12  ;;  %v451_v17 = vpop.f32.mrb[1].mxu0  ;;  %v467_v18 = vpop.f32.mrb[1].mxu1 }
  0xfc   : > { %v516_v20 = vmul.f32 %v726_v12, %v451_v17  ;;  %v520_v21 = vmul.f32 %v726_v12, %v467_v18  ;;  %v800_v22 = vpop.f32.mrb[2].mxu0  ;;  %v804_v23 = vpop.f32.mrb[2].mxu1 }
  0xfd   : > { %v519_v24 = vmul.f32 %v800_v22, %v726_v12  ;;  %v523_v25 = vmul.f32 %v804_v23, %v726_v12  ;;  %v454_v26 = vpop.f32.mrb[3].mxu0  ;;  %v470_v27 = vpop.f32.mrb[3].mxu1  ;;  %v533_v30 = vadd.f32 %v727_v19, %v518_v15  ;;  %v537_v31 = vadd.f32 %v727_v19, %v522_v16 }
  0xfe   : > { %v517_v28 = vmul.f32 %v726_v12, %v454_v26  ;;  %v521_v29 = vmul.f32 %v726_v12, %v470_v27  ;;  %v531_v34 = vadd.f32 %v727_v19, %v516_v20  ;;  %v535_v35 = vadd.f32 %v727_v19, %v520_v21 }
  0xff   : > { %v534_v32 = vadd.f32 %v727_v19, %v519_v24  ;;  %v538_v33 = vadd.f32 %v727_v19, %v523_v25 }
 0x100   : > { %v532_v36 = vadd.f32 %v727_v19, %v517_v28  ;;  %v536_v37 = vadd.f32 %v727_v19, %v521_v29 }
 0x101   : > { %v754_v38 = vpack.c.bf16 %v534_v32, %v533_v30  ;;  %v764_v39 = vpack.c.bf16 %v538_v33, %v537_v31 }
 0x102   : > { %v749_v40 = vpack.c.bf16 %v532_v36, %v531_v34  ;;  %v759_v41 = vpack.c.bf16 %v536_v37, %v535_v35 }
 0x103   : > { %766 = vst [vmem:[%s298_s24 + $0x8] sm:$0xff] %v754_v38   ;;  %768 = vst [vmem:[%s298_s24 + $0x18] sm:$0xff] %v764_v39  }
 0x104   : > { %750 = vst [vmem:[%s298_s24] sm:$0xff] %v749_v40   ;;  %767 = vst [vmem:[%s298_s24 + $0x10] sm:$0xff] %v759_v41  }
 0x105 PF: > { %s14_s17 = sadd.s32 1, %s879_s17   ;;  %s987_s15 = smov %s875_s16 }
 0x106   : > { %p11_p5 = scmp.ge.s32.totalorder %s14_s17, 4   ;;  %s988_s16 = smov %s990_s18 }
 0x108   :  { %13 = sbr.rel (!%p11_p5) target bundleno = 2 (0x2), region = 83 }

// kernel: efficientnet_encoder_forward.14
= control target key start
LH: loop header
LB: loop body
LE: loop exit
PB: predicated region body
PF: predicated region fallthrough
CT: control target
= control target key end

     0   :  { %s1471_s15 = smov 0   ;;  %s1473_s16 = smov 0   ;;  %s1635_s0 = inlined_call_operand.vmem [shape: bf16[128,1152], index: 0, kind: input, shape index: {}]   ;;  %s1636_s1 = inlined_call_operand.vmem [shape: bf16[1152,128], index: 1, kind: input, shape index: {}]   ;;  %s1637_s2 = inlined_call_operand.vmem [shape: f32[1,128], index: 2, kind: input, shape index: {}]   ;;  %s1638_s3 = inlined_call_operand.vmem [shape: f32[1,128], index: 3, kind: input, shape index: {}]   ;;  %s1639_s4 = inlined_call_operand.vmem [shape: bf16[128,128], index: 4, kind: output, shape index: {}]  }
   0x1   :  { %s1475_s17 = smov 0   ;;  %s1477_s18 = smov 0  }
   0x2   :  { %s1479_s19 = smov 0   ;;  %s1481_s20 = smov 0  }
   0x3   :  { %s1483_s21 = smov 0  }
   0x4 LB: > { %s26_s22 = sadd.s32 1, %s1435_s19  ;;  %s33_s23 = sadd.s32 1, %s1439_s20  ;;  %s1443_s21 = sphi %s1483_s21, %s14_s21   ;;  %s1439_s20 = sphi %s1481_s20, %s1645_s20   ;;  %s1435_s19 = sphi %s1479_s19, %s1644_s19   ;;  %s1431_s18 = sphi %s1477_s18, %s1643_s18   ;;  %s1427_s17 = sphi %s1475_s17, %s1642_s17   ;;  %s1423_s16 = sphi %s1473_s16, %s1641_s16   ;;  %s1419_s15 = sphi %s1471_s15, %s1640_s15  }
   0x5   : > { %p27_p0 = scmp.ge.s32.totalorder %s26_s22, 3  ;;  %p49_p1 = scmp.ne.s32.totalorder %s1423_s16, %s1419_s15 }
   0x6   : > { %p50_p2 = scmp.eq.s32.totalorder %s1443_s21, 0  ;;  %s42_s27 = sadd.s32 1, %s1423_s16 }
   0x7   : > { %s1647_s22 = smov (%p27_p0, %s26_s22), 0  ;;  %s1649_s23 = smov (!%p27_p0, %s33_s23), %s1439_s20 }
   0x8   : > { %p51_p3 = por %p50_p2, %p49_p1  ;;  %p35_p4 = scmp.ge.s32.totalorder %s1649_s23, 2 }
   0x9   : > { %s38_s24 = ssub.s32 %s1435_s19, %s1647_s22  ;;  %p1068_p6 = scmp.ge.s32.totalorder %s1443_s21, 6 }
   0xa   : > { %s1651_s23 = smov (%p35_p4, %s1649_s23), 0 }
   0xb   : > { %s37_s25 = ssub.s32 %s1439_s20, %s1651_s23  ;;  %195 = sbr.rel (%p1068_p6) target bundleno = 36 (0x24), region = 24 }
   0xc   : > { %s39_s26 = sor.u32 %s38_s24, %s37_s25 }
   0xd   : > { %p40_p5 = scmp.eq.s32.totalorder %s39_s26, 0 }
   0xf   : > { %s1522_s28 = scalar_select %p40_p5, %s1423_s16, %s42_s27  }
  0x12   : > { %198 = sbr.rel (!%p51_p3) target bundleno = 36 (0x24), region = 28  ;;  %s200_s29 = sand.u32 (%p51_p3), 1, %s1423_s16  }
  0x13   : > { %s204_s30 = smul.u32 (%p51_p3), 3, %s1435_s19 }
  0x14   : > { %s1257_s5 = smul.u32 (%p51_p3), 96, %s200_s29 }
  0x15   : > { %s1258_s6 = smul.u32 (%p51_p3), 72, %s1439_s20 }
  0x16   : > { %s202_s12 = scalar_lea.vmem (%p51_p3), [#allocation3], %s1257_s5 }
  0x17   : > { %s206_s7 = sadd.s32 (%p51_p3), %s1258_s6, %s204_s30 }
  0x18   : > { %s1071_s8 = sshll.u32 (%p51_p3), %s206_s7, 2 }
  0x19   : > { %s1531_s11 = scalar_lea.vmem %s1635_s0, %s1071_s8 }
  0x1a   : > { %v223_v0 = vld [vmem:[%s1531_s11] sm:$0xff]  ;;  %v227_v2 = vld [vmem:[%s1531_s11 + $0x48] sm:$0xff]  ;;  %v231_v4 = vld [vmem:[%s1531_s11 + $0x90] sm:$0xff] }
  0x1b   : > { %v225_v1 = vld [vmem:[%s1531_s11 + $0x24] sm:$0xff]  ;;  %224 = vst [vmem:[%s202_s12] sm:$0xff] %v223_v0  ;;  %228 = vst [vmem:[%s202_s12 + $0x18] sm:$0xff] %v227_v2  ;;  %v229_v3 = vld [vmem:[%s1531_s11 + $0x6c] sm:$0xff] }
  0x1c   : > { %226 = vst [vmem:[%s202_s12 + $0xc] sm:$0xff] %v225_v1  ;;  %v233_v5 = vld [vmem:[%s1531_s11 + $0xb4] sm:$0xff]  ;;  %230 = vst [vmem:[%s202_s12 + $0x24] sm:$0xff] %v229_v3  ;;  %v237_v7 = vld [vmem:[%s1531_s11 + $0xfc] sm:$0xff] }
  0x1d   : > { %232 = vst [vmem:[%s202_s12 + $0x30] sm:$0xff] %v231_v4  ;;  %234 = vst [vmem:[%s202_s12 + $0x3c] sm:$0xff] %v233_v5  ;;  %v235_v6 = vld [vmem:[%s1531_s11 + $0xd8] sm:$0xff]  ;;  %v1072_v8 = vld [vmem:[%s1531_s11 + $0x8] sm:$0xf] }
  0x1e   : > { %236 = vst [vmem:[%s202_s12 + $0x48] sm:$0xff] %v235_v6  ;;  %238 = vst [vmem:[%s202_s12 + $0x54] sm:$0xff] %v237_v7  ;;  %v1074_v9 = vld [vmem:[%s1531_s11 + $0x2c] sm:$0xf]  ;;  %v1076_v10 = vld [vmem:[%s1531_s11 + $0x50] sm:$0xf] }
  0x1f   : > { %1073 = vst [vmem:[%s202_s12 + $0x8] sm:$0xf] %v1072_v8  ;;  %v1078_v11 = vld [vmem:[%s1531_s11 + $0x74] sm:$0xf]  ;;  %1075 = vst [vmem:[%s202_s12 + $0x14] sm:$0xf] %v1074_v9 }
  0x20   : > { %1077 = vst [vmem:[%s202_s12 + $0x20] sm:$0xf] %v1076_v10  ;;  %1079 = vst [vmem:[%s202_s12 + $0x2c] sm:$0xf] %v1078_v11  ;;  %v1080_v12 = vld [vmem:[%s1531_s11 + $0x98] sm:$0xf] }
  0x21   : > { %v1082_v13 = vld [vmem:[%s1531_s11 + $0xbc] sm:$0xf]  ;;  %v1084_v14 = vld [vmem:[%s1531_s11 + $0xe0] sm:$0xf]  ;;  %1081 = vst [vmem:[%s202_s12 + $0x38] sm:$0xf] %v1080_v12 }
  0x22   : > { %1083 = vst [vmem:[%s202_s12 + $0x44] sm:$0xf] %v1082_v13  ;;  %1085 = vst [vmem:[%s202_s12 + $0x50] sm:$0xf] %v1084_v14  ;;  %v1086_v15 = vld [vmem:[%s1531_s11 + $0x104] sm:$0xf] }
  0x23   : > { %1087 = vst [vmem:[%s202_s12 + $0x5c] sm:$0xf] %v1086_v15 }
  0x24 PF: > { %p1088_p7 = scmp.ge.s32.totalorder %s1443_s21, 1  ;;  %p278_p8 = scmp.lt.s32.totalorder %s1443_s21, 7 }
  0x26   : > { %p279_p9 = pnand %p1088_p7, %p278_p8 }
  0x27   : > { %s285_s13 = sand.u32 (!%p279_p9), 1, %s1419_s15   ;;  %s329_s14 = smul.u32 (!%p279_p9), 48, %s1427_s17 }
  0x28   : > { %282 = sbr.rel (%p279_p9) target bundleno = 378 (0x17a), region = 58  ;;  %s1090_s25 = sshll.u32 (!%p279_p9), %s1431_s18, 3 }
  0x29   : > { %s1259_s24 = smul.u32 (!%p279_p9), 96, %s285_s13  ;;  %p330_p10 = scmp.lt.s32.totalorder (!%p279_p9), %s329_s14, 143 }
  0x2a   : > { %p345_p11 = scmp.lt.s32.totalorder (!%p279_p9), %s1090_s25, 15  ;;  %p1092_p12 = scmp.ne.s32.totalorder (!%p279_p9), %s1427_s17, 0 }
  0x2b   : > { %s1564_s15 = scalar_lea.vmem (!%p279_p9), [#allocation3], %s1259_s24 }
  0x2f   : > { %s1653_s14 = smov (!%p330_p10, %s329_s14), 143  ;;  %s1655_s25 = smov (!%p345_p11, %s1090_s25), 15 }
  0x30   : > { %s1089_s26 = sshll.u32 %s1653_s14, 2  ;;  %s1091_s5 = sshll.u32 %s1655_s25, 2  ;;  %v1445_v16 = vmov (!%p1092_p12), 0.0  }
  0x31   : > { %s1557_s30 = scalar_lea.vmem %s1636_s1, %s1089_s26  ;;  %s1562_s8 = scalar_lea.vmem %s1639_s4, %s1091_s5  ;;  %358 = vst [vmem:[#allocation2] sm:$0xff] (!%p1092_p12), %v1445_v16  ;;  %359 = vst [vmem:[#allocation2 + $0x8] sm:$0xff] (!%p1092_p12), %v1445_v16 }
  0x32   : > { %357 = sbr.rel (%p1092_p12) target bundleno = 57 (0x39), region = 66  ;;  %360 = vst [vmem:[#allocation2 + $0x10] sm:$0xff] (!%p1092_p12), %v1445_v16  ;;  %361 = vst [vmem:[#allocation2 + $0x18] sm:$0xff] (!%p1092_p12), %v1445_v16 }
  0x33   : > { %362 = vst [vmem:[#allocation2 + $0x20] sm:$0xff] (!%p1092_p12), %v1445_v16  ;;  %363 = vst [vmem:[#allocation2 + $0x28] sm:$0xff] (!%p1092_p12), %v1445_v16 }
  0x34   : > { %364 = vst [vmem:[#allocation2 + $0x30] sm:$0xff] (!%p1092_p12), %v1445_v16  ;;  %365 = vst [vmem:[#allocation2 + $0x38] sm:$0xff] (!%p1092_p12), %v1445_v16 }
  0x39 PF: > { %v1317_v17 = vld [vmem:[%s1557_s30 + $0x40] sm:$0xff]   ;;  %v1320_v20 = vld [vmem:[%s1557_s30 + $0x48] sm:$0xff]   ;;  %v1323_v23 = vld [vmem:[%s1557_s30 + $0x50] sm:$0xff]   ;;  %p1129_p13 = scmp.ne.s32.totalorder %s1427_s17, 2 }
  0x3a   : > { %v1318_v18 = vld [vmem:[%s1557_s30] sm:$0xff]   ;;  %1181 = vmatprep.subr.bf16.mxu0 %v1317_v17  ;;  %v1321_v21 = vld [vmem:[%s1557_s30 + $0x8] sm:$0xff]   ;;  %v1324_v24 = vld [vmem:[%s1557_s30 + $0x10] sm:$0xff]  }
  0x3b   : > { %v1319_v19 = vld [vmem:[%s1557_s30 + $0x80] sm:$0xff]   ;;  %1182 = vmatpush3.bf16.msra.mxu0 %v1318_v18  ;;  %v1322_v22 = vld [vmem:[%s1557_s30 + $0x88] sm:$0xff]   ;;  %v1325_v25 = vld [vmem:[%s1557_s30 + $0x90] sm:$0xff]  }
  0x3c   : > { %1233 = vmatprep.subr.bf16.mxu1 %v1319_v19  ;;  %1183 = vmatprep.subr.bf16.mxu0 %v1320_v20  ;;  %v1326_v26 = vld [vmem:[%s1557_s30 + $0x58] sm:$0xff]   ;;  %v1329_v29 = vld [vmem:[%s1557_s30 + $0x60] sm:$0xff]   ;;  %v1332_v32 = vld [vmem:[%s1557_s30 + $0x68] sm:$0xff]  }
  0x3d   : > { %1234 = vmatpush3.bf16.msra.mxu1 %v1319_v19  ;;  %v1327_v27 = vld [vmem:[%s1557_s30 + $0x18] sm:$0xff]   ;;  %v1331_v30 = vld [vmem:[%s1557_s30 + $0xa0] sm:$0xff]   ;;  %v1334_v33 = vld [vmem:[%s1557_s30 + $0xa8] sm:$0xff]  }
  0x3e   : > { %1235 = vmatprep.subr.bf16.mxu1 %v1322_v22  ;;  %v1328_v28 = vld [vmem:[%s1557_s30 + $0x98] sm:$0xff]   ;;  %v1330_v31 = vld [vmem:[%s1557_s30 + $0x20] sm:$0xff]   ;;  %v1333_v34 = vld [vmem:[%s1557_s30 + $0x28] sm:$0xff]  }
  0x3f   : > { %1184 = vmatpush3.bf16.msra.mxu0 %v1321_v21  ;;  %v1335_v35 = vld [vmem:[%s1557_s30 + $0x70] sm:$0xff]   ;;  %v1338_v38 = vld [vmem:[%s1557_s30 + $0x78] sm:$0xff]   ;;  %v1341_v43 = vld [vmem:[%s1564_s15] ss:$12 sps:$4 sm:$0xff]  }
  0x40   : > { %1185 = vmatprep.subr.bf16.mxu0 %v1323_v23  ;;  %v1336_v36 = vld [vmem:[%s1557_s30 + $0x30] sm:$0xff]   ;;  %v1340_v39 = vld [vmem:[%s1557_s30 + $0xb8] sm:$0xff]   ;;  %v1345_v45 = vld [vmem:[%s1564_s15 + $0x20] ss:$12 sps:$4 sm:$0xff]  }
  0x41   : > { %1236 = vmatpush3.bf16.msra.mxu1 %v1322_v22  ;;  %v1337_v37 = vld [vmem:[%s1557_s30 + $0xb0] sm:$0xff]   ;;  %v1339_v42 = vld [vmem:[%s1557_s30 + $0x38] sm:$0xff]   ;;  %v382_v59 = vld [vmem:[#allocation2] sm:$0xff] }
  0x42   : > { %1237 = vmatprep.subr.bf16.mxu1 %v1325_v25  ;;  %v1343_v40 = vld [vmem:[%s1564_s15 + $0x4] ss:$12 sps:$4 sm:$0xff]   ;;  %v1344_v41 = vld [vmem:[%s1564_s15 + $0x8] ss:$12 sps:$4 sm:$0xff]   ;;  %v1354_v51 = vld [vmem:[%s1564_s15 + $0x4c] ss:$12 sps:$4 sm:$0xff]  }
  0x43   : > { %1186 = vmatpush3.bf16.msra.mxu0 %v1324_v24  ;;  %678 = vmatprep.mubr.bf16.mxu0 %v1343_v40  ;;  %v1346_v44 = vld [vmem:[%s1564_s15 + $0x1c] ss:$12 sps:$4 sm:$0xff]   ;;  %v1352_v46 = vld [vmem:[%s1564_s15 + $0x38] ss:$12 sps:$4 sm:$0xff]   ;;  %v1349_v48 = vld [vmem:[%s1564_s15 + $0x34] ss:$12 sps:$4 sm:$0xff]  }
  0x44   : > { %1187 = vmatprep.subr.bf16.mxu0 %v1326_v26  ;;  %1249 = vmatprep.mubr.bf16.mxu1 %v1344_v41  ;;  %v1348_v47 = vld [vmem:[%s1564_s15 + $0x18] ss:$12 sps:$4 sm:$0xff]   ;;  %v1353_v49 = vld [vmem:[%s1564_s15 + $0x50] ss:$12 sps:$4 sm:$0xff]   ;;  %v1356_v52 = vld [vmem:[%s1564_s15 + $0x48] ss:$12 sps:$4 sm:$0xff]  }
  0x45   : > { %1238 = vmatpush3.bf16.msra.mxu1 %v1325_v25  ;;  %v1351_v50 = vld [vmem:[%s1564_s15 + $0x30] ss:$12 sps:$4 sm:$0xff]   ;;  %v383_v0 = vld [vmem:[#allocation2 + $0x8] sm:$0xff]  ;;  %v386_v26 = vld [vmem:[#allocation2 + $0x20] sm:$0xff] }
  0x46   : > { %1239 = vmatprep.subr.bf16.mxu1 %v1328_v28  ;;  %v384_v10 = vld [vmem:[#allocation2 + $0x10] sm:$0xff]  ;;  %v385_v16 = vld [vmem:[#allocation2 + $0x18] sm:$0xff] }
  0x47   : > { %1188 = vmatpush3.bf16.msra.mxu0 %v1327_v27  ;;  %v389_v41 = vld [vmem:[#allocation2 + $0x38] sm:$0xff] }
  0x48   : > { %1189 = vmatprep.subr.bf16.mxu0 %v1329_v29  ;;  %v387_v29 = vld [vmem:[#allocation2 + $0x28] sm:$0xff] }
  0x49   : > { %1240 = vmatpush3.bf16.msra.mxu1 %v1328_v28 }
  0x4a   : > { %1241 = vmatprep.subr.bf16.mxu1 %v1331_v30 }
  0x4b   : > { %1190 = vmatpush3.bf16.msra.mxu0 %v1330_v31 }
  0x4c   : > { %1191 = vmatprep.subr.bf16.mxu0 %v1332_v32 }
  0x4d   : > { %1242 = vmatpush3.bf16.msra.mxu1 %v1331_v30 }
  0x4e   : > { %1243 = vmatprep.subr.bf16.mxu1 %v1334_v33 }
  0x4f   : > { %1192 = vmatpush3.bf16.msra.mxu0 %v1333_v34 }
  0x50   : > { %1193 = vmatprep.subr.bf16.mxu0 %v1335_v35 }
  0x51   : > { %1244 = vmatpush3.bf16.msra.mxu1 %v1334_v33 }
  0x52   : > { %1245 = vmatprep.subr.bf16.mxu1 %v1337_v37 }
  0x53   : > { %1194 = vmatpush3.bf16.msra.mxu0 %v1336_v36 }
  0x54   : > { %1195 = vmatprep.subr.bf16.mxu0 %v1338_v38 }
  0x55   : > { %1246 = vmatpush3.bf16.msra.mxu1 %v1337_v37  ;;  %v388_v37 = vld [vmem:[#allocation2 + $0x30] sm:$0xff] }
  0x56   : > { %1247 = vmatprep.subr.bf16.mxu1 %v1340_v39 }
  0x57   : > { %1196 = vmatpush3.bf16.msra.mxu0 %v1339_v42 }
  0x59   : > { %1248 = vmatpush3.bf16.msra.mxu1 %v1340_v39 }
  0x5a   : > { %679 = vmatmul.mubr.bf16.vlgmr.msra.gmra.mrb[0].mxu0 %v1341_v43 }
  0x5b   : > { %686 = vmatprep.mubr.bf16.mxu0 %v1346_v44 }
  0x5c   : > { %1250 = vmatmul.mubr.bf16.vlgmr.msra.gmra.mrb[0].mxu1 %v1345_v45 }
  0x5d   : > { %1253 = vmatprep.mubr.bf16.mxu1 %v1352_v46 }
  0x62   : > { %687 = vmatmul.mubr.bf16.gmra.mrb[4].mxu0 %v1348_v47  ;;  %v1130_v47 = vld [vmem:[%s1637_s2] ss:$0 sm:$0xff] (!%p1129_p13) }
  0x63   : > { %694 = vmatprep.mubr.bf16.mxu0 %v1349_v48 }
  0x64   : > { %1254 = vmatmul.mubr.bf16.gmra.mrb[4].mxu1 %v1353_v49 }
  0x6a   : > { %695 = vmatmul.mubr.bf16.gmra.mrb[8].mxu0 %v1351_v50  ;;  %v1131_v50 = vld [vmem:[%s1638_s3] ss:$0 sm:$0xff] (!%p1129_p13) }
  0x6b   : > { %702 = vmatprep.mubr.bf16.mxu0 %v1354_v51 }
  0x72   : > { %703 = vmatmul.mubr.bf16.gmra.mrb[12].mxu0 %v1356_v52 }
 0x12d   : > { %v1197_v53 = vpop.f32.mrb[0].mxu0 }
 0x12e   : > { %v1198_v54 = vpop.f32.mrb[1].mxu0 }
 0x12f   : > { %v1199_v55 = vadd.f32 %v1198_v54, %v1197_v53  ;;  %v1200_v56 = vpop.f32.mrb[2].mxu0  ;;  %v1251_v57 = vpop.f32.mrb[0].mxu1 }
 0x130   : > { %v1201_v58 = vpop.f32.mrb[3].mxu0  ;;  %v745_v60 = vpop.f32.mrb[1].mxu1 }
 0x131   : > { %v1202_v61 = vadd.f32 %v1201_v58, %v1200_v56  ;;  %v746_v62 = vadd.f32 %v1199_v55, %v745_v60  ;;  %v1252_v63 = vpop.f32.mrb[2].mxu1 }
 0x132   : > { %v748_v1 = vpop.f32.mrb[3].mxu1 }
 0x133   : > { %v776_v2 = vadd.f32 %v746_v62, %v382_v59  ;;  %v749_v3 = vadd.f32 %v1202_v61, %v748_v1 }
 0x135   : > { %784 = vst [vmem:[#allocation2] sm:$0xff] %v776_v2  ;;  %v777_v4 = vadd.f32 %v749_v3, %v383_v0  ;;  %v1203_v5 = vpop.f32.mrb[4].mxu0 }
 0x136   : > { %v1204_v6 = vpop.f32.mrb[5].mxu0 }
 0x137   : > { %785 = vst [vmem:[#allocation2 + $0x8] sm:$0xff] %v777_v4  ;;  %v1205_v7 = vadd.f32 %v1204_v6, %v1203_v5  ;;  %v1206_v8 = vpop.f32.mrb[6].mxu0  ;;  %v1255_v9 = vpop.f32.mrb[4].mxu1 }
 0x138   : > { %v1207_v11 = vpop.f32.mrb[7].mxu0  ;;  %v761_v12 = vpop.f32.mrb[5].mxu1 }
 0x139   : > { %v754_v13 = vadd.f32 %v1251_v57, %v1205_v7  ;;  %v1208_v14 = vadd.f32 %v1207_v11, %v1206_v8  ;;  %v1256_v15 = vpop.f32.mrb[6].mxu1 }
 0x13a   : > { %v764_v17 = vpop.f32.mrb[7].mxu1 }
 0x13b   : > { %v778_v18 = vadd.f32 %v754_v13, %v384_v10  ;;  %v757_v19 = vadd.f32 %v1252_v63, %v1208_v14 }
 0x13c   : > { %v796_v45 = vld [vmem:[#allocation2] sm:$0xff] (!%p1129_p13) }
 0x13d   : > { %786 = vst [vmem:[#allocation2 + $0x10] sm:$0xff] %v778_v18  ;;  %v779_v20 = vadd.f32 %v757_v19, %v385_v16  ;;  %v1209_v21 = vpop.f32.mrb[8].mxu0  ;;  %v811_v48 = vmul.f32 (!%p1129_p13), %v1130_v47, %v796_v45 }
 0x13e   : > { %v1210_v22 = vpop.f32.mrb[9].mxu0  ;;  %v797_v46 = vld [vmem:[#allocation2 + $0x8] sm:$0xff] (!%p1129_p13) }
 0x13f   : > { %787 = vst [vmem:[#allocation2 + $0x18] sm:$0xff] %v779_v20  ;;  %v1211_v23 = vadd.f32 %v1210_v22, %v1209_v21  ;;  %v1212_v24 = vpop.f32.mrb[10].mxu0  ;;  %v812_v49 = vmul.f32 (!%p1129_p13), %v1130_v47, %v797_v46  ;;  %v826_v58 = vadd.f32 (!%p1129_p13), %v1131_v50, %v811_v48 }
 0x140   : > { %v1213_v25 = vpop.f32.mrb[11].mxu0 }
 0x141   : > { %v1214_v27 = vadd.f32 %v1213_v25, %v1212_v24  ;;  %v762_v28 = vadd.f32 %v1211_v23, %v761_v12  ;;  %v827_v59 = vadd.f32 (!%p1129_p13), %v1131_v50, %v812_v49  ;;  %v1132_v3 = vmul.f32 (!%p1129_p13), -1.442695, %v826_v58 }
 0x143   : > { %v780_v30 = vadd.f32 %v762_v28, %v386_v26  ;;  %v765_v31 = vadd.f32 %v1214_v27, %v764_v17  ;;  %v1133_v4 = vmul.f32 (!%p1129_p13), -1.442695, %v827_v59  ;;  %1357 = vpow2.f32 (!%p1129_p13), %v1132_v3 }
 0x144   : > { %v798_v51 = vld [vmem:[#allocation2 + $0x10] sm:$0xff] (!%p1129_p13) }
 0x145   : > { %788 = vst [vmem:[#allocation2 + $0x20] sm:$0xff] %v780_v30  ;;  %v781_v32 = vadd.f32 %v765_v31, %v387_v29  ;;  %v1215_v33 = vpop.f32.mrb[12].mxu0  ;;  %v813_v53 = vmul.f32 (!%p1129_p13), %v1130_v47, %v798_v51  ;;  %1359 = vpow2.f32 (!%p1129_p13), %v1133_v4 }
 0x146   : > { %v1216_v34 = vpop.f32.mrb[13].mxu0  ;;  %v799_v52 = vld [vmem:[#allocation2 + $0x18] sm:$0xff] (!%p1129_p13) }
 0x147   : > { %789 = vst [vmem:[#allocation2 + $0x28] sm:$0xff] %v781_v32  ;;  %v1217_v35 = vadd.f32 %v1216_v34, %v1215_v33  ;;  %v1218_v36 = vpop.f32.mrb[14].mxu0  ;;  %v814_v54 = vmul.f32 (!%p1129_p13), %v1130_v47, %v799_v52  ;;  %v828_v63 = vadd.f32 (!%p1129_p13), %v1131_v50, %v813_v53 }
 0x148   : > { %v1219_v38 = vpop.f32.mrb[15].mxu0 }
 0x149   : > { %v770_v39 = vadd.f32 %v1255_v9, %v1217_v35  ;;  %v1220_v40 = vadd.f32 %v1219_v38, %v1218_v36  ;;  %795 = sbr.rel (%p1129_p13) target bundleno = 378 (0x17a), region = 70  ;;  %v829_v0 = vadd.f32 (!%p1129_p13), %v1131_v50, %v814_v54  ;;  %v1134_v7 = vmul.f32 (!%p1129_p13), -1.442695, %v828_v63 }
 0x14b   : > { %v782_v42 = vadd.f32 %v770_v39, %v388_v37  ;;  %v773_v43 = vadd.f32 %v1256_v15, %v1220_v40  ;;  %v1135_v8 = vmul.f32 (!%p1129_p13), -1.442695, %v829_v0  ;;  %1361 = vpow2.f32 (!%p1129_p13), %v1134_v7 }
 0x14c   : > { %v800_v55 = vld [vmem:[#allocation2 + $0x20] sm:$0xff] (!%p1129_p13) }
 0x14d   : > { %790 = vst [vmem:[#allocation2 + $0x30] sm:$0xff] %v782_v42  ;;  %v783_v44 = vadd.f32 %v773_v43, %v389_v41  ;;  %v815_v60 = vmul.f32 (!%p1129_p13), %v1130_v47, %v800_v55  ;;  %1363 = vpow2.f32 (!%p1129_p13), %v1135_v8  ;;  %v1358_v15 = vpop.eup (!%p1129_p13), %1357 }
 0x14e   : > { %v801_v56 = vld [vmem:[#allocation2 + $0x28] sm:$0xff] (!%p1129_p13)  ;;  %v858_v17 = vadd.f32 (!%p1129_p13), 1.0, %v1358_v15 }
 0x14f   : > { %791 = vst [vmem:[#allocation2 + $0x38] sm:$0xff] %v783_v44  ;;  %v816_v61 = vmul.f32 (!%p1129_p13), %v1130_v47, %v801_v56  ;;  %v830_v5 = vadd.f32 (!%p1129_p13), %v1131_v50, %v815_v60  ;;  %v1360_v16 = vpop.eup (!%p1129_p13), %1359 }
 0x150   : > { %v859_v19 = vadd.f32 1.0, %v1360_v16 }
 0x151   : > { %v831_v6 = vadd.f32 %v1131_v50, %v816_v61  ;;  %v1136_v11 = vmul.f32 -1.442695, %v830_v5 }
 0x153   : > { %v1137_v12 = vmul.f32 -1.442695, %v831_v6  ;;  %1365 = vpow2.f32 %v1136_v11 }
 0x154   : > { %v802_v57 = vld [vmem:[#allocation2 + $0x30] sm:$0xff] }
 0x155   : > { %v817_v1 = vmul.f32 %v1130_v47, %v802_v57  ;;  %1367 = vpow2.f32 %v1137_v12  ;;  %v1362_v18 = vpop.eup %1361 }
 0x156   : > { %v803_v62 = vld [vmem:[#allocation2 + $0x38] sm:$0xff]  ;;  %v860_v21 = vadd.f32 1.0, %v1362_v18 }
 0x157   : > { %v818_v2 = vmul.f32 %v1130_v47, %v803_v62  ;;  %v832_v9 = vadd.f32 %v1131_v50, %v817_v1  ;;  %v1364_v20 = vpop.eup %1363 }
 0x158   : > { %v861_v23 = vadd.f32 1.0, %v1364_v20 }
 0x159   : > { %v833_v10 = vadd.f32 %v1131_v50, %v818_v2  ;;  %v1138_v13 = vmul.f32 -1.442695, %v832_v9 }
 0x15b   : > { %v1139_v14 = vmul.f32 -1.442695, %v833_v10  ;;  %1369 = vpow2.f32 %v1138_v13 }
 0x15d   : > { %1371 = vpow2.f32 %v1139_v14  ;;  %v1366_v22 = vpop.eup %1365 }
 0x15e   : > { %1373 = vrcp.f32 %v858_v17  ;;  %v862_v25 = vadd.f32 1.0, %v1366_v22 }
 0x15f   : > { %1375 = vrcp.f32 %v859_v19  ;;  %v1368_v24 = vpop.eup %1367 }
 0x160   : > { %1377 = vrcp.f32 %v860_v21  ;;  %v863_v27 = vadd.f32 1.0, %v1368_v24 }
 0x161   : > { %1379 = vrcp.f32 %v861_v23 }
 0x162   : > { %1381 = vrcp.f32 %v862_v25 }
 0x163   : > { %1383 = vrcp.f32 %v863_v27 }
 0x165   : > { %v1370_v26 = vpop.eup %1369 }
 0x166   : > { %v864_v29 = vadd.f32 1.0, %v1370_v26 }
 0x167   : > { %v1372_v28 = vpop.eup %1371 }
 0x168   : > { %v865_v30 = vadd.f32 1.0, %v1372_v28  ;;  %1385 = vrcp.f32 %v864_v29  ;;  %v1374_v31 = vpop.eup %1373 }
 0x169   : > { %v1376_v32 = vpop.eup %1375  ;;  %v882_v33 = vmul.f32 %v1374_v31, %v826_v58 }
 0x16a   : > { %1387 = vrcp.f32 %v865_v30  ;;  %v1378_v34 = vpop.eup %1377  ;;  %v883_v35 = vmul.f32 %v1376_v32, %v827_v59 }
 0x16b   : > { %v1380_v36 = vpop.eup %1379  ;;  %v884_v37 = vmul.f32 %v1378_v34, %v828_v63 }
 0x16c   : > { %v1382_v38 = vpop.eup %1381  ;;  %v1161_v39 = vpack.c.bf16 %v883_v35, %v882_v33  ;;  %v885_v40 = vmul.f32 %v1380_v36, %v829_v0 }
 0x16d   : > { %v1384_v41 = vpop.eup %1383  ;;  %v886_v42 = vmul.f32 %v1382_v38, %v830_v5 }
 0x16e   : > { %1162 = vst [vmem:[%s1562_s8] sm:$0xff] %v1161_v39   ;;  %v1166_v44 = vpack.c.bf16 %v885_v40, %v884_v37  ;;  %v887_v45 = vmul.f32 %v1384_v41, %v831_v6 }
 0x170   : > { %1178 = vst [vmem:[%s1562_s8 + $0x8] sm:$0xff] %v1166_v44   ;;  %v1171_v48 = vpack.c.bf16 %v887_v45, %v886_v42 }
 0x172   : > { %v1386_v43 = vpop.eup %1385  ;;  %1179 = vst [vmem:[%s1562_s8 + $0x10] sm:$0xff] %v1171_v48  }
 0x173   : > { %v888_v47 = vmul.f32 %v1386_v43, %v832_v9 }
 0x174   : > { %v1388_v46 = vpop.eup %1387 }
 0x175   : > { %v889_v49 = vmul.f32 %v1388_v46, %v833_v10 }
 0x177   : > { %v1176_v50 = vpack.c.bf16 %v889_v49, %v888_v47 }
 0x179   : > { %1180 = vst [vmem:[%s1562_s8 + $0x18] sm:$0xff] %v1176_v50  }
 0x17a PF: > { %s14_s21 = sadd.s32 1, %s1443_s21   ;;  %s1640_s15 = smov %s1423_s16 }
 0x17b   : > { %p11_p0 = scmp.ge.s32.totalorder %s14_s21, 8   ;;  %s1641_s16 = smov %s1522_s28 }
 0x17c   : > { %s1642_s17 = smov %s1435_s19  ;;  %s1643_s18 = smov %s1439_s20 }
 0x17d   : > { %s1644_s19 = smov %s1647_s22  ;;  %s1645_s20 = smov %s1651_s23 }
 0x17e   :  { %13 = sbr.rel (!%p11_p0) target bundleno = 4 (0x4), region = 120 }

// kernel: efficientnet_encoder_forward.12
= control target key start
LH: loop header
LB: loop body
LE: loop exit
PB: predicated region body
PF: predicated region fallthrough
CT: control target
= control target key end

     0   :  { %s3208_s18 = smov 0   ;;  %s3210_s19 = smov 0   ;;  %s3869_s0 = inlined_call_operand.vmem [shape: bf16[512,1152], index: 0, kind: input, shape index: {}]   ;;  %s3870_s1 = inlined_call_operand.vmem [shape: bf16[1152,128], index: 1, kind: input, shape index: {}]   ;;  %s3871_s2 = inlined_call_operand.vmem [shape: f32[1,128], index: 2, kind: input, shape index: {}]   ;;  %s3872_s3 = inlined_call_operand.vmem [shape: f32[1,128], index: 3, kind: input, shape index: {}]   ;;  %s3873_s4 = inlined_call_operand.vmem [shape: bf16[512,128], index: 4, kind: input, shape index: {}]   ;;  %s3874_s5 = inlined_call_operand.vmem [shape: bf16[512,128], index: 5, kind: output, shape index: {}]  }
   0x1   :  { %s3212_s20 = smov 0   ;;  %s3214_s21 = smov 0  }
   0x2   :  { %s3216_s22 = smov 0   ;;  %s3218_s23 = smov 0  }
   0x3   :  { %s3220_s24 = smov 0  }
   0x4 LB: > { %s27_s25 = sadd.s32 1, %s3167_s22  ;;  %s34_s26 = sadd.s32 1, %s3171_s23  ;;  %s3175_s24 = sphi %s3220_s24, %s15_s24   ;;  %s3171_s23 = sphi %s3218_s23, %s3880_s23   ;;  %s3167_s22 = sphi %s3216_s22, %s3879_s22   ;;  %s3163_s21 = sphi %s3214_s21, %s3878_s21   ;;  %s3159_s20 = sphi %s3212_s20, %s3877_s20   ;;  %s3155_s19 = sphi %s3210_s19, %s3876_s19   ;;  %s3151_s18 = sphi %s3208_s18, %s3875_s18  }
   0x5   : > { %p28_p0 = scmp.ge.s32.totalorder %s27_s25, 3  ;;  %p50_p1 = scmp.ne.s32.totalorder %s3155_s19, %s3151_s18 }
   0x6   : > { %p51_p2 = scmp.eq.s32.totalorder %s3175_s24, 0  ;;  %s43_s30 = sadd.s32 1, %s3155_s19 }
   0x7   : > { %s3882_s25 = smov (%p28_p0, %s27_s25), 0  ;;  %s3884_s26 = smov (!%p28_p0, %s34_s26), %s3171_s23 }
   0x8   : > { %p52_p3 = por %p51_p2, %p50_p1  ;;  %p36_p4 = scmp.ge.s32.totalorder %s3884_s26, 2 }
   0x9   : > { %s39_s27 = ssub.s32 %s3167_s22, %s3882_s25  ;;  %p2223_p6 = scmp.ge.s32.totalorder %s3175_s24, 6 }
   0xa   : > { %s3886_s26 = smov (%p36_p4, %s3884_s26), 0 }
   0xb   : > { %s38_s28 = ssub.s32 %s3171_s23, %s3886_s26  ;;  %224 = sbr.rel (%p2223_p6) target bundleno = 64 (0x40), region = 24 }
   0xc   : > { %s40_s29 = sor.u32 %s39_s27, %s38_s28 }
   0xd   : > { %p41_p5 = scmp.eq.s32.totalorder %s40_s29, 0 }
   0xf   : > { %s3259_s6 = scalar_select %p41_p5, %s3155_s19, %s43_s30  }
  0x12   : > { %227 = sbr.rel (!%p52_p3) target bundleno = 64 (0x40), region = 28  ;;  %s229_s7 = sand.u32 (%p52_p3), 1, %s3155_s19  }
  0x13   : > { %s233_s8 = smul.u32 (%p52_p3), 3, %s3167_s22 }
  0x14   : > { %s2845_s9 = smul.u32 (%p52_p3), 384, %s229_s7 }
  0x15   : > { %s2846_s10 = smul.u32 (%p52_p3), 288, %s3171_s23 }
  0x16   : > { %s3273_s16 = scalar_lea.vmem (%p52_p3), [#allocation3], %s2845_s9 }
  0x17   : > { %s235_s11 = sadd.s32 (%p52_p3), %s2846_s10, %s233_s8 }
  0x18   : > { %s2226_s12 = sshll.u32 (%p52_p3), %s235_s11, 2 }
  0x19   : > { %s3268_s15 = scalar_lea.vmem %s3869_s0, %s2226_s12 }
  0x1a   : > { %v252_v0 = vld [vmem:[%s3268_s15] sm:$0xff]  ;;  %v256_v2 = vld [vmem:[%s3268_s15 + $0x48] sm:$0xff]  ;;  %v260_v4 = vld [vmem:[%s3268_s15 + $0x90] sm:$0xff] }
  0x1b   : > { %v254_v1 = vld [vmem:[%s3268_s15 + $0x24] sm:$0xff]  ;;  %253 = vst [vmem:[%s3273_s16] sm:$0xff] %v252_v0  ;;  %257 = vst [vmem:[%s3273_s16 + $0x18] sm:$0xff] %v256_v2  ;;  %v258_v3 = vld [vmem:[%s3268_s15 + $0x6c] sm:$0xff] }
  0x1c   : > { %255 = vst [vmem:[%s3273_s16 + $0xc] sm:$0xff] %v254_v1  ;;  %v262_v5 = vld [vmem:[%s3268_s15 + $0xb4] sm:$0xff]  ;;  %259 = vst [vmem:[%s3273_s16 + $0x24] sm:$0xff] %v258_v3  ;;  %v266_v7 = vld [vmem:[%s3268_s15 + $0xfc] sm:$0xff] }
  0x1d   : > { %261 = vst [vmem:[%s3273_s16 + $0x30] sm:$0xff] %v260_v4  ;;  %263 = vst [vmem:[%s3273_s16 + $0x3c] sm:$0xff] %v262_v5  ;;  %v264_v6 = vld [vmem:[%s3268_s15 + $0xd8] sm:$0xff]  ;;  %v268_v8 = vld [vmem:[%s3268_s15 + $0x120] sm:$0xff] }
  0x1e   : > { %265 = vst [vmem:[%s3273_s16 + $0x48] sm:$0xff] %v264_v6  ;;  %267 = vst [vmem:[%s3273_s16 + $0x54] sm:$0xff] %v266_v7  ;;  %v270_v9 = vld [vmem:[%s3268_s15 + $0x144] sm:$0xff]  ;;  %v274_v11 = vld [vmem:[%s3268_s15 + $0x18c] sm:$0xff] }
  0x1f   : > { %269 = vst [vmem:[%s3273_s16 + $0x60] sm:$0xff] %v268_v8  ;;  %v272_v10 = vld [vmem:[%s3268_s15 + $0x168] sm:$0xff]  ;;  %271 = vst [vmem:[%s3273_s16 + $0x6c] sm:$0xff] %v270_v9  ;;  %v276_v12 = vld [vmem:[%s3268_s15 + $0x1b0] sm:$0xff] }
  0x20   : > { %273 = vst [vmem:[%s3273_s16 + $0x78] sm:$0xff] %v272_v10  ;;  %275 = vst [vmem:[%s3273_s16 + $0x84] sm:$0xff] %v274_v11  ;;  %v278_v13 = vld [vmem:[%s3268_s15 + $0x1d4] sm:$0xff]  ;;  %v282_v15 = vld [vmem:[%s3268_s15 + $0x21c] sm:$0xff] }
  0x21   : > { %v280_v14 = vld [vmem:[%s3268_s15 + $0x1f8] sm:$0xff]  ;;  %277 = vst [vmem:[%s3273_s16 + $0x90] sm:$0xff] %v276_v12  ;;  %279 = vst [vmem:[%s3273_s16 + $0x9c] sm:$0xff] %v278_v13  ;;  %v284_v16 = vld [vmem:[%s3268_s15 + $0x240] sm:$0xff] }
  0x22   : > { %281 = vst [vmem:[%s3273_s16 + $0xa8] sm:$0xff] %v280_v14  ;;  %v286_v17 = vld [vmem:[%s3268_s15 + $0x264] sm:$0xff]  ;;  %283 = vst [vmem:[%s3273_s16 + $0xb4] sm:$0xff] %v282_v15  ;;  %v290_v19 = vld [vmem:[%s3268_s15 + $0x2ac] sm:$0xff] }
  0x23   : > { %285 = vst [vmem:[%s3273_s16 + $0xc0] sm:$0xff] %v284_v16  ;;  %287 = vst [vmem:[%s3273_s16 + $0xcc] sm:$0xff] %v286_v17  ;;  %v288_v18 = vld [vmem:[%s3268_s15 + $0x288] sm:$0xff]  ;;  %v292_v20 = vld [vmem:[%s3268_s15 + $0x2d0] sm:$0xff] }
  0x24   : > { %289 = vst [vmem:[%s3273_s16 + $0xd8] sm:$0xff] %v288_v18  ;;  %291 = vst [vmem:[%s3273_s16 + $0xe4] sm:$0xff] %v290_v19  ;;  %v294_v21 = vld [vmem:[%s3268_s15 + $0x2f4] sm:$0xff]  ;;  %v298_v23 = vld [vmem:[%s3268_s15 + $0x33c] sm:$0xff] }
  0x25   : > { %293 = vst [vmem:[%s3273_s16 + $0xf0] sm:$0xff] %v292_v20  ;;  %v296_v22 = vld [vmem:[%s3268_s15 + $0x318] sm:$0xff]  ;;  %295 = vst [vmem:[%s3273_s16 + $0xfc] sm:$0xff] %v294_v21  ;;  %v300_v24 = vld [vmem:[%s3268_s15 + $0x360] sm:$0xff] }
  0x26   : > { %297 = vst [vmem:[%s3273_s16 + $0x108] sm:$0xff] %v296_v22  ;;  %299 = vst [vmem:[%s3273_s16 + $0x114] sm:$0xff] %v298_v23  ;;  %v302_v25 = vld [vmem:[%s3268_s15 + $0x384] sm:$0xff]  ;;  %v306_v27 = vld [vmem:[%s3268_s15 + $0x3cc] sm:$0xff] }
  0x27   : > { %v304_v26 = vld [vmem:[%s3268_s15 + $0x3a8] sm:$0xff]  ;;  %301 = vst [vmem:[%s3273_s16 + $0x120] sm:$0xff] %v300_v24  ;;  %303 = vst [vmem:[%s3273_s16 + $0x12c] sm:$0xff] %v302_v25  ;;  %v308_v28 = vld [vmem:[%s3268_s15 + $0x3f0] sm:$0xff] }
  0x28   : > { %305 = vst [vmem:[%s3273_s16 + $0x138] sm:$0xff] %v304_v26  ;;  %v310_v29 = vld [vmem:[%s3268_s15 + $0x414] sm:$0xff]  ;;  %307 = vst [vmem:[%s3273_s16 + $0x144] sm:$0xff] %v306_v27  ;;  %v314_v31 = vld [vmem:[%s3268_s15 + $0x45c] sm:$0xff] }
  0x29   : > { %309 = vst [vmem:[%s3273_s16 + $0x150] sm:$0xff] %v308_v28  ;;  %311 = vst [vmem:[%s3273_s16 + $0x15c] sm:$0xff] %v310_v29  ;;  %v312_v30 = vld [vmem:[%s3268_s15 + $0x438] sm:$0xff]  ;;  %v2227_v32 = vld [vmem:[%s3268_s15 + $0x8] sm:$0xf] }
  0x2a   : > { %313 = vst [vmem:[%s3273_s16 + $0x168] sm:$0xff] %v312_v30  ;;  %315 = vst [vmem:[%s3273_s16 + $0x174] sm:$0xff] %v314_v31  ;;  %v2229_v33 = vld [vmem:[%s3268_s15 + $0x2c] sm:$0xf]  ;;  %v2231_v34 = vld [vmem:[%s3268_s15 + $0x50] sm:$0xf] }
  0x2b   : > { %2228 = vst [vmem:[%s3273_s16 + $0x8] sm:$0xf] %v2227_v32  ;;  %v2233_v35 = vld [vmem:[%s3268_s15 + $0x74] sm:$0xf]  ;;  %2230 = vst [vmem:[%s3273_s16 + $0x14] sm:$0xf] %v2229_v33 }
  0x2c   : > { %2232 = vst [vmem:[%s3273_s16 + $0x20] sm:$0xf] %v2231_v34  ;;  %2234 = vst [vmem:[%s3273_s16 + $0x2c] sm:$0xf] %v2233_v35  ;;  %v2235_v36 = vld [vmem:[%s3268_s15 + $0x98] sm:$0xf] }
  0x2d   : > { %v2237_v37 = vld [vmem:[%s3268_s15 + $0xbc] sm:$0xf]  ;;  %v2239_v38 = vld [vmem:[%s3268_s15 + $0xe0] sm:$0xf]  ;;  %2236 = vst [vmem:[%s3273_s16 + $0x38] sm:$0xf] %v2235_v36 }
  0x2e   : > { %2238 = vst [vmem:[%s3273_s16 + $0x44] sm:$0xf] %v2237_v37  ;;  %2240 = vst [vmem:[%s3273_s16 + $0x50] sm:$0xf] %v2239_v38  ;;  %v2241_v39 = vld [vmem:[%s3268_s15 + $0x104] sm:$0xf] }
  0x2f   : > { %v2243_v40 = vld [vmem:[%s3268_s15 + $0x128] sm:$0xf]  ;;  %v2245_v41 = vld [vmem:[%s3268_s15 + $0x14c] sm:$0xf]  ;;  %2242 = vst [vmem:[%s3273_s16 + $0x5c] sm:$0xf] %v2241_v39 }
  0x30   : > { %2244 = vst [vmem:[%s3273_s16 + $0x68] sm:$0xf] %v2243_v40  ;;  %2246 = vst [vmem:[%s3273_s16 + $0x74] sm:$0xf] %v2245_v41  ;;  %v2247_v42 = vld [vmem:[%s3268_s15 + $0x170] sm:$0xf] }
  0x31   : > { %v2249_v43 = vld [vmem:[%s3268_s15 + $0x194] sm:$0xf]  ;;  %v2251_v44 = vld [vmem:[%s3268_s15 + $0x1b8] sm:$0xf]  ;;  %2248 = vst [vmem:[%s3273_s16 + $0x80] sm:$0xf] %v2247_v42 }
  0x32   : > { %2250 = vst [vmem:[%s3273_s16 + $0x8c] sm:$0xf] %v2249_v43  ;;  %2252 = vst [vmem:[%s3273_s16 + $0x98] sm:$0xf] %v2251_v44  ;;  %v2253_v45 = vld [vmem:[%s3268_s15 + $0x1dc] sm:$0xf] }
  0x33   : > { %v2255_v46 = vld [vmem:[%s3268_s15 + $0x200] sm:$0xf]  ;;  %v2257_v47 = vld [vmem:[%s3268_s15 + $0x224] sm:$0xf]  ;;  %2254 = vst [vmem:[%s3273_s16 + $0xa4] sm:$0xf] %v2253_v45 }
  0x34   : > { %2256 = vst [vmem:[%s3273_s16 + $0xb0] sm:$0xf] %v2255_v46  ;;  %2258 = vst [vmem:[%s3273_s16 + $0xbc] sm:$0xf] %v2257_v47  ;;  %v2259_v48 = vld [vmem:[%s3268_s15 + $0x248] sm:$0xf] }
  0x35   : > { %v2261_v49 = vld [vmem:[%s3268_s15 + $0x26c] sm:$0xf]  ;;  %v2263_v50 = vld [vmem:[%s3268_s15 + $0x290] sm:$0xf]  ;;  %2260 = vst [vmem:[%s3273_s16 + $0xc8] sm:$0xf] %v2259_v48 }
  0x36   : > { %2262 = vst [vmem:[%s3273_s16 + $0xd4] sm:$0xf] %v2261_v49  ;;  %2264 = vst [vmem:[%s3273_s16 + $0xe0] sm:$0xf] %v2263_v50  ;;  %v2265_v51 = vld [vmem:[%s3268_s15 + $0x2b4] sm:$0xf] }
  0x37   : > { %v2267_v52 = vld [vmem:[%s3268_s15 + $0x2d8] sm:$0xf]  ;;  %v2269_v53 = vld [vmem:[%s3268_s15 + $0x2fc] sm:$0xf]  ;;  %2266 = vst [vmem:[%s3273_s16 + $0xec] sm:$0xf] %v2265_v51 }
  0x38   : > { %2268 = vst [vmem:[%s3273_s16 + $0xf8] sm:$0xf] %v2267_v52  ;;  %2270 = vst [vmem:[%s3273_s16 + $0x104] sm:$0xf] %v2269_v53  ;;  %v2271_v54 = vld [vmem:[%s3268_s15 + $0x320] sm:$0xf] }
  0x39   : > { %v2273_v55 = vld [vmem:[%s3268_s15 + $0x344] sm:$0xf]  ;;  %v2275_v56 = vld [vmem:[%s3268_s15 + $0x368] sm:$0xf]  ;;  %2272 = vst [vmem:[%s3273_s16 + $0x110] sm:$0xf] %v2271_v54 }
  0x3a   : > { %2274 = vst [vmem:[%s3273_s16 + $0x11c] sm:$0xf] %v2273_v55  ;;  %2276 = vst [vmem:[%s3273_s16 + $0x128] sm:$0xf] %v2275_v56  ;;  %v2277_v57 = vld [vmem:[%s3268_s15 + $0x38c] sm:$0xf] }
  0x3b   : > { %v2279_v58 = vld [vmem:[%s3268_s15 + $0x3b0] sm:$0xf]  ;;  %v2281_v59 = vld [vmem:[%s3268_s15 + $0x3d4] sm:$0xf]  ;;  %2278 = vst [vmem:[%s3273_s16 + $0x134] sm:$0xf] %v2277_v57 }
  0x3c   : > { %2280 = vst [vmem:[%s3273_s16 + $0x140] sm:$0xf] %v2279_v58  ;;  %2282 = vst [vmem:[%s3273_s16 + $0x14c] sm:$0xf] %v2281_v59  ;;  %v2283_v60 = vld [vmem:[%s3268_s15 + $0x3f8] sm:$0xf] }
  0x3d   : > { %v2285_v61 = vld [vmem:[%s3268_s15 + $0x41c] sm:$0xf]  ;;  %v2287_v62 = vld [vmem:[%s3268_s15 + $0x440] sm:$0xf]  ;;  %2284 = vst [vmem:[%s3273_s16 + $0x158] sm:$0xf] %v2283_v60 }
  0x3e   : > { %2286 = vst [vmem:[%s3273_s16 + $0x164] sm:$0xf] %v2285_v61  ;;  %2288 = vst [vmem:[%s3273_s16 + $0x170] sm:$0xf] %v2287_v62  ;;  %v2289_v63 = vld [vmem:[%s3268_s15 + $0x464] sm:$0xf] }
  0x3f   : > { %2290 = vst [vmem:[%s3273_s16 + $0x17c] sm:$0xf] %v2289_v63 }
  0x40 PF: > { %p2291_p7 = scmp.ge.s32.totalorder %s3175_s24, 1  ;;  %p415_p8 = scmp.lt.s32.totalorder %s3175_s24, 7 }
  0x42   : > { %p416_p9 = pnand %p2291_p7, %p415_p8 }
  0x43   : > { %s422_s17 = sand.u32 (!%p416_p9), 1, %s3151_s18   ;;  %s476_s27 = smul.u32 (!%p416_p9), 48, %s3159_s20 }
  0x44   : > { %419 = sbr.rel (%p416_p9) target bundleno = 527 (0x20f), region = 62  ;;  %s2293_s29 = sshll.u32 (!%p416_p9), %s3163_s21, 5 }
  0x45   : > { %s2847_s28 = smul.u32 (!%p416_p9), 384, %s422_s17  ;;  %p477_p10 = scmp.lt.s32.totalorder (!%p416_p9), %s476_s27, 143 }
  0x46   : > { %p492_p11 = scmp.lt.s32.totalorder (!%p416_p9), %s2293_s29, 63  ;;  %p2297_p12 = scmp.ne.s32.totalorder (!%p416_p9), %s3159_s20, 0 }
  0x47   : > { %s3420_s15 = scalar_lea.vmem (!%p416_p9), [#allocation3], %s2847_s28 }
  0x4b   : > { %s3888_s27 = smov (!%p477_p10, %s476_s27), 143  ;;  %s3890_s29 = smov (!%p492_p11, %s2293_s29), 63 }
  0x4c   : > { %s2292_s30 = sshll.u32 %s3888_s27, 2  ;;  %s2294_s10 = sshll.u32 %s3890_s29, 2  ;;  %v3177_v0 = vmov (!%p2297_p12), 0.0  }
  0x4d   : > { %s3408_s9 = scalar_lea.vmem %s3870_s1, %s2292_s30  ;;  %s3413_s13 = scalar_lea.vmem %s3873_s4, %s2294_s10  ;;  %514 = vst [vmem:[#allocation2] sm:$0xff] (!%p2297_p12), %v3177_v0  ;;  %515 = vst [vmem:[#allocation2 + $0x8] sm:$0xff] (!%p2297_p12), %v3177_v0 }
  0x4e   : > { %s3418_s21 = scalar_lea.vmem %s3874_s5, %s2294_s10  ;;  %513 = sbr.rel (%p2297_p12) target bundleno = 93 (0x5d), region = 70  ;;  %516 = vst [vmem:[#allocation2 + $0x10] sm:$0xff] (!%p2297_p12), %v3177_v0  ;;  %517 = vst [vmem:[#allocation2 + $0x18] sm:$0xff] (!%p2297_p12), %v3177_v0 }
  0x4f   : > { %518 = vst [vmem:[#allocation2 + $0x20] sm:$0xff] (!%p2297_p12), %v3177_v0  ;;  %519 = vst [vmem:[#allocation2 + $0x28] sm:$0xff] (!%p2297_p12), %v3177_v0 }
  0x50   : > { %520 = vst [vmem:[#allocation2 + $0x30] sm:$0xff] (!%p2297_p12), %v3177_v0  ;;  %521 = vst [vmem:[#allocation2 + $0x38] sm:$0xff] (!%p2297_p12), %v3177_v0 }
  0x51   : > { %522 = vst [vmem:[#allocation2 + $0x40] sm:$0xff] (!%p2297_p12), %v3177_v0  ;;  %523 = vst [vmem:[#allocation2 + $0x48] sm:$0xff] (!%p2297_p12), %v3177_v0 }
  0x52   : > { %524 = vst [vmem:[#allocation2 + $0x50] sm:$0xff] (!%p2297_p12), %v3177_v0  ;;  %525 = vst [vmem:[#allocation2 + $0x58] sm:$0xff] (!%p2297_p12), %v3177_v0 }
  0x53   : > { %526 = vst [vmem:[#allocation2 + $0x60] sm:$0xff] (!%p2297_p12), %v3177_v0  ;;  %527 = vst [vmem:[#allocation2 + $0x68] sm:$0xff] (!%p2297_p12), %v3177_v0 }
  0x54   : > { %528 = vst [vmem:[#allocation2 + $0x70] sm:$0xff] (!%p2297_p12), %v3177_v0  ;;  %529 = vst [vmem:[#allocation2 + $0x78] sm:$0xff] (!%p2297_p12), %v3177_v0 }
  0x55   : > { %530 = vst [vmem:[#allocation2 + $0x80] sm:$0xff] %v3177_v0  ;;  %531 = vst [vmem:[#allocation2 + $0x88] sm:$0xff] %v3177_v0 }
  0x56   : > { %532 = vst [vmem:[#allocation2 + $0x90] sm:$0xff] %v3177_v0  ;;  %533 = vst [vmem:[#allocation2 + $0x98] sm:$0xff] %v3177_v0 }
  0x57   : > { %534 = vst [vmem:[#allocation2 + $0xa0] sm:$0xff] %v3177_v0  ;;  %535 = vst [vmem:[#allocation2 + $0xa8] sm:$0xff] %v3177_v0 }
  0x58   : > { %536 = vst [vmem:[#allocation2 + $0xb0] sm:$0xff] %v3177_v0  ;;  %537 = vst [vmem:[#allocation2 + $0xb8] sm:$0xff] %v3177_v0 }
  0x59   : > { %538 = vst [vmem:[#allocation2 + $0xc0] sm:$0xff] %v3177_v0  ;;  %539 = vst [vmem:[#allocation2 + $0xc8] sm:$0xff] %v3177_v0 }
  0x5a   : > { %540 = vst [vmem:[#allocation2 + $0xd0] sm:$0xff] %v3177_v0  ;;  %541 = vst [vmem:[#allocation2 + $0xd8] sm:$0xff] %v3177_v0 }
  0x5b   : > { %542 = vst [vmem:[#allocation2 + $0xe0] sm:$0xff] %v3177_v0  ;;  %543 = vst [vmem:[#allocation2 + $0xe8] sm:$0xff] %v3177_v0 }
  0x5c   : > { %544 = vst [vmem:[#allocation2 + $0xf0] sm:$0xff] %v3177_v0  ;;  %545 = vst [vmem:[#allocation2 + $0xf8] sm:$0xff] %v3177_v0 }
  0x5d PF: > { %v2905_v1 = vld [vmem:[%s3408_s9 + $0x40] sm:$0xff]   ;;  %v2907_v3 = vld [vmem:[%s3408_s9 + $0x48] sm:$0xff]   ;;  %v2909_v5 = vld [vmem:[%s3408_s9 + $0x50] sm:$0xff]   ;;  %p2370_p13 = scmp.ne.s32.totalorder %s3159_s20, 2 }
  0x5e   : > { %v2906_v2 = vld [vmem:[%s3408_s9] sm:$0xff]   ;;  %2645 = vmatprep.subr.bf16.mxu0 %v2905_v1  ;;  %2829 = vmatprep.subr.bf16.mxu1 %v2905_v1  ;;  %v2908_v4 = vld [vmem:[%s3408_s9 + $0x8] sm:$0xff]   ;;  %v2910_v6 = vld [vmem:[%s3408_s9 + $0x10] sm:$0xff]  }
  0x5f   : > { %2646 = vmatpush3.bf16.msra.mxu0 %v2906_v2  ;;  %2837 = vmatpush3.bf16.msra.mxu1 %v2906_v2  ;;  %v2911_v7 = vld [vmem:[%s3408_s9 + $0x58] sm:$0xff]   ;;  %v2913_v9 = vld [vmem:[%s3408_s9 + $0x60] sm:$0xff]   ;;  %v2915_v11 = vld [vmem:[%s3408_s9 + $0x68] sm:$0xff]  }
  0x60   : > { %2647 = vmatprep.subr.bf16.mxu0 %v2907_v3  ;;  %2830 = vmatprep.subr.bf16.mxu1 %v2907_v3  ;;  %v2912_v8 = vld [vmem:[%s3408_s9 + $0x18] sm:$0xff]   ;;  %v2914_v10 = vld [vmem:[%s3408_s9 + $0x20] sm:$0xff]   ;;  %v2916_v14 = vld [vmem:[%s3408_s9 + $0x28] sm:$0xff]  }
  0x61   : > { %v2923_v12 = vld [vmem:[%s3420_s15 + $0x4] ss:$12 sps:$4 sm:$0xff]   ;;  %v2919_v17 = vld [vmem:[%s3408_s9 + $0x78] sm:$0xff]   ;;  %v2921_v20 = vld [vmem:[%s3420_s15] ss:$12 sps:$4 sm:$0xff]  }
  0x62   : > { %v2926_v13 = vld [vmem:[%s3420_s15 + $0x124] ss:$12 sps:$4 sm:$0xff]   ;;  %1122 = vmatprep.mubr.bf16.mxu0 %v2923_v12  ;;  %v2920_v18 = vld [vmem:[%s3408_s9 + $0x38] sm:$0xff]   ;;  %v2924_v21 = vld [vmem:[%s3420_s15 + $0x120] ss:$12 sps:$4 sm:$0xff]  }
  0x63   : > { %2648 = vmatpush3.bf16.msra.mxu0 %v2908_v4  ;;  %2838 = vmatpush3.bf16.msra.mxu1 %v2908_v4  ;;  %v2917_v15 = vld [vmem:[%s3408_s9 + $0x70] sm:$0xff]   ;;  %v2927_v19 = vld [vmem:[%s3408_s9 + $0x80] sm:$0xff]   ;;  %v2929_v22 = vld [vmem:[%s3420_s15 + $0x1c] ss:$12 sps:$4 sm:$0xff]  }
  0x64   : > { %2649 = vmatprep.subr.bf16.mxu0 %v2909_v5  ;;  %2831 = vmatprep.subr.bf16.mxu1 %v2909_v5  ;;  %v2918_v16 = vld [vmem:[%s3408_s9 + $0x30] sm:$0xff]   ;;  %v2928_v23 = vld [vmem:[%s3408_s9 + $0x88] sm:$0xff]   ;;  %v2933_v25 = vld [vmem:[%s3420_s15 + $0x18] ss:$12 sps:$4 sm:$0xff]  }
  0x65   : > { %1218 = vmatprep.mubr.bf16.mxu1 %v2926_v13  ;;  %v2931_v24 = vld [vmem:[%s3420_s15 + $0x13c] ss:$12 sps:$4 sm:$0xff]   ;;  %v2935_v26 = vld [vmem:[%s3408_s9 + $0x90] sm:$0xff]   ;;  %v2934_v27 = vld [vmem:[%s3420_s15 + $0x138] ss:$12 sps:$4 sm:$0xff]  }
  0x66   : > { %v2936_v28 = vld [vmem:[%s3408_s9 + $0x98] sm:$0xff]   ;;  %v2937_v29 = vld [vmem:[%s3420_s15 + $0x34] ss:$12 sps:$4 sm:$0xff]   ;;  %v2944_v34 = vld [vmem:[%s3408_s9 + $0xa8] sm:$0xff]  }
  0x67   : > { %2650 = vmatpush3.bf16.msra.mxu0 %v2910_v6  ;;  %2839 = vmatpush3.bf16.msra.mxu1 %v2910_v6  ;;  %v2939_v30 = vld [vmem:[%s3420_s15 + $0x154] ss:$12 sps:$4 sm:$0xff]   ;;  %v2941_v32 = vld [vmem:[%s3420_s15 + $0x30] ss:$12 sps:$4 sm:$0xff]   ;;  %v2945_v35 = vld [vmem:[%s3420_s15 + $0x4c] ss:$12 sps:$4 sm:$0xff]  }
  0x68   : > { %2651 = vmatprep.subr.bf16.mxu0 %v2911_v7  ;;  %2832 = vmatprep.subr.bf16.mxu1 %v2911_v7  ;;  %v2943_v31 = vld [vmem:[%s3408_s9 + $0xa0] sm:$0xff]   ;;  %v2942_v33 = vld [vmem:[%s3420_s15 + $0x150] ss:$12 sps:$4 sm:$0xff]   ;;  %v2947_v36 = vld [vmem:[%s3420_s15 + $0x16c] ss:$12 sps:$4 sm:$0xff]  }
  0x69   : > { %v2951_v37 = vld [vmem:[%s3408_s9 + $0xb0] sm:$0xff]   ;;  %v2952_v41 = vld [vmem:[%s3408_s9 + $0xb8] sm:$0xff]   ;;  %v2956_v43 = vld [vmem:[%s3420_s15 + $0x60] ss:$12 sps:$4 sm:$0xff]  }
  0x6a   : > { %v2949_v38 = vld [vmem:[%s3420_s15 + $0x48] ss:$12 sps:$4 sm:$0xff]   ;;  %v2953_v40 = vld [vmem:[%s3420_s15 + $0x64] ss:$12 sps:$4 sm:$0xff]   ;;  %v2957_v44 = vld [vmem:[%s3420_s15 + $0x20] ss:$12 sps:$4 sm:$0xff]  }
  0x6b   : > { %2652 = vmatpush3.bf16.msra.mxu0 %v2912_v8  ;;  %2840 = vmatpush3.bf16.msra.mxu1 %v2912_v8  ;;  %v2950_v39 = vld [vmem:[%s3420_s15 + $0x168] ss:$12 sps:$4 sm:$0xff]   ;;  %v2960_v46 = vld [vmem:[%s3420_s15 + $0x38] ss:$12 sps:$4 sm:$0xff]   ;;  %v2962_v48 = vld [vmem:[%s3420_s15 + $0x50] ss:$12 sps:$4 sm:$0xff]  }
  0x6c   : > { %2653 = vmatprep.subr.bf16.mxu0 %v2913_v9  ;;  %2833 = vmatprep.subr.bf16.mxu1 %v2913_v9  ;;  %v2955_v42 = vld [vmem:[%s3420_s15 + $0x8] ss:$12 sps:$4 sm:$0xff]   ;;  %v2961_v47 = vld [vmem:[%s3420_s15 + $0x78] ss:$12 sps:$4 sm:$0xff]   ;;  %v2966_v51 = vld [vmem:[%s3420_s15 + $0x90] ss:$12 sps:$4 sm:$0xff]  }
  0x6d   : > { %v2958_v45 = vld [vmem:[%s3420_s15 + $0x7c] ss:$12 sps:$4 sm:$0xff]   ;;  %v2963_v49 = vld [vmem:[%s3420_s15 + $0x94] ss:$12 sps:$4 sm:$0xff]   ;;  %v2968_v53 = vld [vmem:[%s3420_s15 + $0xac] ss:$12 sps:$4 sm:$0xff]  }
  0x6e   : > { %v2965_v50 = vld [vmem:[%s3420_s15 + $0x68] ss:$12 sps:$4 sm:$0xff]   ;;  %v2967_v52 = vld [vmem:[%s3420_s15 + $0x80] ss:$12 sps:$4 sm:$0xff]   ;;  %v2970_v54 = vld [vmem:[%s3420_s15 + $0x98] ss:$12 sps:$4 sm:$0xff]  }
  0x6f   : > { %2654 = vmatpush3.bf16.msra.mxu0 %v2914_v10  ;;  %2841 = vmatpush3.bf16.msra.mxu1 %v2914_v10  ;;  %v2971_v55 = vld [vmem:[%s3420_s15 + $0xa8] ss:$12 sps:$4 sm:$0xff]   ;;  %v2972_v56 = vld [vmem:[%s3420_s15 + $0xb0] ss:$12 sps:$4 sm:$0xff]   ;;  %v2976_v59 = vld [vmem:[%s3420_s15 + $0xc0] ss:$12 sps:$4 sm:$0xff]  }
  0x70   : > { %2655 = vmatprep.subr.bf16.mxu0 %v2915_v11  ;;  %2834 = vmatprep.subr.bf16.mxu1 %v2915_v11  ;;  %v2973_v57 = vld [vmem:[%s3420_s15 + $0xc4] ss:$12 sps:$4 sm:$0xff]   ;;  %v2975_v58 = vld [vmem:[%s3420_s15 + $0xc8] ss:$12 sps:$4 sm:$0xff]   ;;  %v2977_v60 = vld [vmem:[%s3420_s15 + $0xe0] ss:$12 sps:$4 sm:$0xff]  }
  0x71   : > { %v2978_v61 = vld [vmem:[%s3420_s15 + $0xdc] ss:$12 sps:$4 sm:$0xff]   ;;  %v2980_v62 = vld [vmem:[%s3420_s15 + $0xf8] ss:$12 sps:$4 sm:$0xff]   ;;  %v2983_v1 = vld [vmem:[%s3420_s15 + $0xf4] ss:$12 sps:$4 sm:$0xff]  }
  0x72   : > { %v2981_v63 = vld [vmem:[%s3420_s15 + $0xd8] ss:$12 sps:$4 sm:$0xff]   ;;  %v2982_v0 = vld [vmem:[%s3420_s15 + $0x110] ss:$12 sps:$4 sm:$0xff]   ;;  %v2985_v2 = vld [vmem:[%s3420_s15 + $0x128] ss:$12 sps:$4 sm:$0xff]  }
  0x73   : > { %2656 = vmatpush3.bf16.msra.mxu0 %v2916_v14  ;;  %2842 = vmatpush3.bf16.msra.mxu1 %v2916_v14  ;;  %v2986_v3 = vld [vmem:[%s3420_s15 + $0xf0] ss:$12 sps:$4 sm:$0xff]   ;;  %v2987_v4 = vld [vmem:[%s3420_s15 + $0x140] ss:$12 sps:$4 sm:$0xff]   ;;  %v2990_v6 = vld [vmem:[%s3420_s15 + $0x158] ss:$12 sps:$4 sm:$0xff]  }
  0x74   : > { %2657 = vmatprep.subr.bf16.mxu0 %v2917_v15  ;;  %2835 = vmatprep.subr.bf16.mxu1 %v2917_v15  ;;  %v2988_v5 = vld [vmem:[%s3420_s15 + $0x10c] ss:$12 sps:$4 sm:$0xff]   ;;  %v2991_v7 = vld [vmem:[%s3420_s15 + $0x108] ss:$12 sps:$4 sm:$0xff]   ;;  %v2992_v8 = vld [vmem:[%s3420_s15 + $0x170] ss:$12 sps:$4 sm:$0xff]  }
  0x77   : > { %2658 = vmatpush3.bf16.msra.mxu0 %v2918_v16  ;;  %2843 = vmatpush3.bf16.msra.mxu1 %v2918_v16 }
  0x78   : > { %2659 = vmatprep.subr.bf16.mxu0 %v2919_v17  ;;  %2836 = vmatprep.subr.bf16.mxu1 %v2919_v17 }
  0x7b   : > { %2660 = vmatpush3.bf16.msra.mxu0 %v2920_v18  ;;  %2844 = vmatpush3.bf16.msra.mxu1 %v2920_v18 }
  0x7c   : > { %2781 = vmatprep.subr.bf16.mxu1 %v2927_v19 }
  0x7e   : > { %1123 = vmatmul.mubr.bf16.vlgmr.msra.gmra.mrb[0].mxu0 %v2921_v20  ;;  %1219 = vmatmul.mubr.bf16.vlgmr.msra.gmra.mrb[0].mxu1 %v2924_v21 }
  0x7f   : > { %2782 = vmatpush3.bf16.msra.mxu1 %v2927_v19  ;;  %1130 = vmatprep.mubr.bf16.mxu0 %v2929_v22 }
  0x80   : > { %2783 = vmatprep.subr.bf16.mxu1 %v2928_v23  ;;  %1226 = vmatprep.mubr.bf16.mxu1 %v2931_v24 }
  0x83   : > { %2784 = vmatpush3.bf16.msra.mxu1 %v2928_v23 }
  0x84   : > { %2785 = vmatprep.subr.bf16.mxu1 %v2935_v26 }
  0x86   : > { %1131 = vmatmul.mubr.bf16.gmra.mrb[4].mxu0 %v2933_v25  ;;  %1227 = vmatmul.mubr.bf16.gmra.mrb[4].mxu1 %v2934_v27 }
  0x87   : > { %2786 = vmatpush3.bf16.msra.mxu1 %v2935_v26  ;;  %1138 = vmatprep.mubr.bf16.mxu0 %v2937_v29 }
  0x88   : > { %2787 = vmatprep.subr.bf16.mxu1 %v2936_v28  ;;  %1234 = vmatprep.mubr.bf16.mxu1 %v2939_v30 }
  0x8b   : > { %2788 = vmatpush3.bf16.msra.mxu1 %v2936_v28 }
  0x8c   : > { %2789 = vmatprep.subr.bf16.mxu1 %v2943_v31 }
  0x8e   : > { %1139 = vmatmul.mubr.bf16.gmra.mrb[8].mxu0 %v2941_v32  ;;  %1235 = vmatmul.mubr.bf16.gmra.mrb[8].mxu1 %v2942_v33 }
  0x8f   : > { %2790 = vmatpush3.bf16.msra.mxu1 %v2943_v31  ;;  %1146 = vmatprep.mubr.bf16.mxu0 %v2945_v35 }
  0x90   : > { %2791 = vmatprep.subr.bf16.mxu1 %v2944_v34  ;;  %1242 = vmatprep.mubr.bf16.mxu1 %v2947_v36 }
  0x93   : > { %2792 = vmatpush3.bf16.msra.mxu1 %v2944_v34 }
  0x94   : > { %2793 = vmatprep.subr.bf16.mxu1 %v2951_v37 }
  0x96   : > { %1147 = vmatmul.mubr.bf16.gmra.mrb[12].mxu0 %v2949_v38  ;;  %1243 = vmatmul.mubr.bf16.gmra.mrb[12].mxu1 %v2950_v39 }
  0x97   : > { %2794 = vmatpush3.bf16.msra.mxu1 %v2951_v37  ;;  %1154 = vmatprep.mubr.bf16.mxu0 %v2953_v40 }
  0x98   : > { %2795 = vmatprep.subr.bf16.mxu1 %v2952_v41  ;;  %2797 = vmatprep.mubr.bf16.mxu1 %v2955_v42 }
  0x9b   : > { %2796 = vmatpush3.bf16.msra.mxu1 %v2952_v41 }
  0x9e   : > { %1155 = vmatmul.mubr.bf16.gmra.mrb[16].mxu0 %v2956_v43  ;;  %2798 = vmatmul.mubr.bf16.vlgmr.msra.gmra.mrb[16].mxu1 %v2957_v44 }
  0x9f   : > { %1162 = vmatprep.mubr.bf16.mxu0 %v2958_v45  ;;  %2801 = vmatprep.mubr.bf16.mxu1 %v2960_v46 }
  0xa6   : > { %1163 = vmatmul.mubr.bf16.gmra.mrb[20].mxu0 %v2961_v47  ;;  %2802 = vmatmul.mubr.bf16.gmra.mrb[20].mxu1 %v2962_v48 }
  0xa7   : > { %1170 = vmatprep.mubr.bf16.mxu0 %v2963_v49  ;;  %2805 = vmatprep.mubr.bf16.mxu1 %v2965_v50 }
  0xae   : > { %1171 = vmatmul.mubr.bf16.gmra.mrb[24].mxu0 %v2966_v51  ;;  %2806 = vmatmul.mubr.bf16.gmra.mrb[24].mxu1 %v2967_v52 }
  0xaf   : > { %1178 = vmatprep.mubr.bf16.mxu0 %v2968_v53  ;;  %2809 = vmatprep.mubr.bf16.mxu1 %v2970_v54 }
  0xb6   : > { %1179 = vmatmul.mubr.bf16.gmra.mrb[28].mxu0 %v2971_v55  ;;  %2810 = vmatmul.mubr.bf16.gmra.mrb[28].mxu1 %v2972_v56 }
  0xb7   : > { %1186 = vmatprep.mubr.bf16.mxu0 %v2973_v57  ;;  %2813 = vmatprep.mubr.bf16.mxu1 %v2975_v58  ;;  %v612_v58 = vld [vmem:[#allocation2 + $0x10] sm:$0xff] }
  0xbe   : > { %1187 = vmatmul.mubr.bf16.gmra.mrb[32].mxu0 %v2976_v59  ;;  %2814 = vmatmul.mubr.bf16.gmra.mrb[32].mxu1 %v2977_v60 }
  0xbf   : > { %1194 = vmatprep.mubr.bf16.mxu0 %v2978_v61  ;;  %2817 = vmatprep.mubr.bf16.mxu1 %v2980_v62  ;;  %v610_v62 = vld [vmem:[#allocation2] sm:$0xff] }
  0xc6   : > { %1195 = vmatmul.mubr.bf16.gmra.mrb[36].mxu0 %v2981_v63  ;;  %2818 = vmatmul.mubr.bf16.gmra.mrb[36].mxu1 %v2982_v0 }
  0xc7   : > { %1202 = vmatprep.mubr.bf16.mxu0 %v2983_v1  ;;  %2821 = vmatprep.mubr.bf16.mxu1 %v2985_v2 }
  0xce   : > { %1203 = vmatmul.mubr.bf16.gmra.mrb[40].mxu0 %v2986_v3  ;;  %2822 = vmatmul.mubr.bf16.gmra.mrb[40].mxu1 %v2987_v4  ;;  %v613_v3 = vld [vmem:[#allocation2 + $0x18] sm:$0xff] }
  0xcf   : > { %1210 = vmatprep.mubr.bf16.mxu0 %v2988_v5  ;;  %2825 = vmatprep.mubr.bf16.mxu1 %v2990_v6 }
  0xd6   : > { %1211 = vmatmul.mubr.bf16.gmra.mrb[44].mxu0 %v2991_v7  ;;  %2826 = vmatmul.mubr.bf16.gmra.mrb[44].mxu1 %v2992_v8  ;;  %v611_v8 = vld [vmem:[#allocation2 + $0x8] sm:$0xff] }
 0x151   : > { %v2661_v9 = vpop.f32.mrb[0].mxu0  ;;  %v2733_v10 = vpop.f32.mrb[0].mxu1 }
 0x152   : > { %v2662_v11 = vpop.f32.mrb[1].mxu0  ;;  %v2734_v12 = vpop.f32.mrb[1].mxu1 }
 0x153   : > { %v2663_v13 = vadd.f32 %v2662_v11, %v2661_v9  ;;  %v3495_v14 = vadd.f32 %v2734_v12, %v2733_v10  ;;  %v2664_v15 = vpop.f32.mrb[2].mxu0  ;;  %v2736_v16 = vpop.f32.mrb[2].mxu1 }
 0x154   : > { %v2665_v17 = vpop.f32.mrb[3].mxu0  ;;  %v2737_v18 = vpop.f32.mrb[3].mxu1 }
 0x155   : > { %v2666_v19 = vadd.f32 %v2665_v17, %v2664_v15  ;;  %v3497_v20 = vadd.f32 %v2737_v18, %v2736_v16  ;;  %v616_v18 = vld [vmem:[#allocation2 + $0x30] sm:$0xff] }
 0x159   : > { %v2667_v21 = vpop.f32.mrb[4].mxu0  ;;  %v2739_v22 = vpop.f32.mrb[4].mxu1 }
 0x15a   : > { %v2668_v23 = vpop.f32.mrb[5].mxu0  ;;  %v2740_v24 = vpop.f32.mrb[5].mxu1 }
 0x15b   : > { %v2669_v25 = vadd.f32 %v2668_v23, %v2667_v21  ;;  %v3499_v26 = vadd.f32 %v2740_v24, %v2739_v22  ;;  %v2670_v27 = vpop.f32.mrb[6].mxu0  ;;  %v2742_v28 = vpop.f32.mrb[6].mxu1  ;;  %v614_v23 = vld [vmem:[#allocation2 + $0x20] sm:$0xff] }
 0x15c   : > { %v2671_v29 = vpop.f32.mrb[7].mxu0  ;;  %v2743_v30 = vpop.f32.mrb[7].mxu1 }
 0x15d   : > { %v2672_v31 = vadd.f32 %v2671_v29, %v2670_v27  ;;  %v3501_v32 = vadd.f32 %v2743_v30, %v2742_v28  ;;  %v617_v29 = vld [vmem:[#allocation2 + $0x38] sm:$0xff] }
 0x161   : > { %v2673_v33 = vpop.f32.mrb[8].mxu0  ;;  %v2745_v34 = vpop.f32.mrb[8].mxu1 }
 0x162   : > { %v2674_v35 = vpop.f32.mrb[9].mxu0  ;;  %v2746_v36 = vpop.f32.mrb[9].mxu1 }
 0x163   : > { %v2675_v37 = vadd.f32 %v2674_v35, %v2673_v33  ;;  %v3503_v38 = vadd.f32 %v2746_v36, %v2745_v34  ;;  %v2676_v39 = vpop.f32.mrb[10].mxu0  ;;  %v2748_v40 = vpop.f32.mrb[10].mxu1  ;;  %v615_v34 = vld [vmem:[#allocation2 + $0x28] sm:$0xff] }
 0x164   : > { %v2677_v41 = vpop.f32.mrb[11].mxu0  ;;  %v2749_v42 = vpop.f32.mrb[11].mxu1 }
 0x165   : > { %v2678_v43 = vadd.f32 %v2677_v41, %v2676_v39  ;;  %v3505_v44 = vadd.f32 %v2749_v42, %v2748_v40 }
 0x169   : > { %v2679_v45 = vpop.f32.mrb[12].mxu0  ;;  %v2751_v46 = vpop.f32.mrb[12].mxu1 }
 0x16a   : > { %v2680_v47 = vpop.f32.mrb[13].mxu0  ;;  %v2752_v48 = vpop.f32.mrb[13].mxu1 }
 0x16b   : > { %v2681_v49 = vadd.f32 %v2680_v47, %v2679_v45  ;;  %v3507_v50 = vadd.f32 %v2752_v48, %v2751_v46  ;;  %v2682_v51 = vpop.f32.mrb[14].mxu0  ;;  %v2754_v52 = vpop.f32.mrb[14].mxu1  ;;  %v620_v46 = vld [vmem:[#allocation2 + $0x50] sm:$0xff] }
 0x16c   : > { %v2683_v53 = vpop.f32.mrb[15].mxu0  ;;  %v2755_v54 = vpop.f32.mrb[15].mxu1 }
 0x16d   : > { %v2684_v55 = vadd.f32 %v2683_v53, %v2682_v51  ;;  %v3509_v56 = vadd.f32 %v2755_v54, %v2754_v52 }
 0x171   : > { %v2685_v57 = vpop.f32.mrb[16].mxu0  ;;  %v2799_v59 = vpop.f32.mrb[16].mxu1 }
 0x172   : > { %v1294_v60 = vadd.f32 %v2799_v59, %v2669_v25  ;;  %v2686_v61 = vpop.f32.mrb[17].mxu0  ;;  %v1285_v63 = vpop.f32.mrb[17].mxu1 }
 0x173   : > { %v2687_v0 = vadd.f32 %v2686_v61, %v2685_v57  ;;  %v1286_v1 = vadd.f32 %v2663_v13, %v1285_v63  ;;  %v2688_v2 = vpop.f32.mrb[18].mxu0  ;;  %v2800_v4 = vpop.f32.mrb[18].mxu1 }
 0x174   : > { %v1414_v5 = vadd.f32 %v1294_v60, %v612_v58  ;;  %v1297_v6 = vadd.f32 %v2800_v4, %v2672_v31  ;;  %v2689_v7 = vpop.f32.mrb[19].mxu0  ;;  %v1288_v9 = vpop.f32.mrb[19].mxu1  ;;  %v619_v60 = vld [vmem:[#allocation2 + $0x48] sm:$0xff] }
 0x175   : > { %v1412_v10 = vadd.f32 %v1286_v1, %v610_v62  ;;  %v2690_v11 = vadd.f32 %v2689_v7, %v2688_v2  ;;  %v1289_v12 = vadd.f32 %v2666_v19, %v1288_v9 }
 0x176   : > { %1446 = vst [vmem:[#allocation2 + $0x10] sm:$0xff] %v1414_v5  ;;  %v1415_v15 = vadd.f32 %v1297_v6, %v613_v3  ;;  %v622_v6 = vld [vmem:[#allocation2 + $0x60] sm:$0xff] }
 0x177   : > { %1444 = vst [vmem:[#allocation2] sm:$0xff] %v1412_v10  ;;  %v1413_v16 = vadd.f32 %v1289_v12, %v611_v8 }
 0x178   : > { %1447 = vst [vmem:[#allocation2 + $0x18] sm:$0xff] %v1415_v15  ;;  %v624_v15 = vld [vmem:[#allocation2 + $0x70] sm:$0xff] }
 0x179   : > { %1445 = vst [vmem:[#allocation2 + $0x8] sm:$0xff] %v1413_v16  ;;  %v2691_v17 = vpop.f32.mrb[20].mxu0  ;;  %v2803_v13 = vpop.f32.mrb[20].mxu1 }
 0x17a   : > { %v1310_v21 = vadd.f32 %v2803_v13, %v2681_v49  ;;  %v2692_v22 = vpop.f32.mrb[21].mxu0  ;;  %v1301_v24 = vpop.f32.mrb[21].mxu1  ;;  %v618_v49 = vld [vmem:[#allocation2 + $0x40] sm:$0xff] }
 0x17b   : > { %v2693_v25 = vadd.f32 %v2692_v22, %v2691_v17  ;;  %v1302_v27 = vadd.f32 %v2675_v37, %v1301_v24  ;;  %v2694_v28 = vpop.f32.mrb[22].mxu0  ;;  %v2804_v30 = vpop.f32.mrb[22].mxu1  ;;  %v623_v17 = vld [vmem:[#allocation2 + $0x68] sm:$0xff] }
 0x17c   : > { %v1418_v31 = vadd.f32 %v1310_v21, %v616_v18  ;;  %v1313_v19 = vadd.f32 %v2804_v30, %v2684_v55  ;;  %v2695_v33 = vpop.f32.mrb[23].mxu0  ;;  %v1304_v35 = vpop.f32.mrb[23].mxu1  ;;  %v621_v55 = vld [vmem:[#allocation2 + $0x58] sm:$0xff] }
 0x17d   : > { %v1416_v36 = vadd.f32 %v1302_v27, %v614_v23  ;;  %v2696_v39 = vadd.f32 %v2695_v33, %v2694_v28  ;;  %v1305_v40 = vadd.f32 %v2678_v43, %v1304_v35  ;;  %v625_v23 = vld [vmem:[#allocation2 + $0x78] sm:$0xff] }
 0x17e   : > { %1450 = vst [vmem:[#allocation2 + $0x30] sm:$0xff] %v1418_v31  ;;  %v1419_v41 = vadd.f32 %v1313_v19, %v617_v29 }
 0x17f   : > { %1448 = vst [vmem:[#allocation2 + $0x20] sm:$0xff] %v1416_v36  ;;  %v1417_v42 = vadd.f32 %v1305_v40, %v615_v34  ;;  %v626_v36 = vld [vmem:[#allocation2 + $0x80] sm:$0xff] }
 0x180   : > { %1451 = vst [vmem:[#allocation2 + $0x38] sm:$0xff] %v1419_v41 }
 0x181   : > { %1449 = vst [vmem:[#allocation2 + $0x28] sm:$0xff] %v1417_v42  ;;  %v2697_v45 = vpop.f32.mrb[24].mxu0  ;;  %v2807_v37 = vpop.f32.mrb[24].mxu1 }
 0x182   : > { %v1326_v47 = vadd.f32 %v2807_v37, %v2693_v25  ;;  %v2698_v48 = vpop.f32.mrb[25].mxu0  ;;  %v1317_v51 = vpop.f32.mrb[25].mxu1 }
 0x183   : > { %v2699_v52 = vadd.f32 %v2698_v48, %v2697_v45  ;;  %v1318_v53 = vadd.f32 %v2687_v0, %v1317_v51  ;;  %v2700_v54 = vpop.f32.mrb[26].mxu0  ;;  %v2808_v57 = vpop.f32.mrb[26].mxu1  ;;  %v627_v45 = vld [vmem:[#allocation2 + $0x88] sm:$0xff] }
 0x184   : > { %v1422_v58 = vadd.f32 %v1326_v47, %v620_v46  ;;  %v1329_v43 = vadd.f32 %v2808_v57, %v2696_v39  ;;  %v2701_v59 = vpop.f32.mrb[27].mxu0  ;;  %v1320_v61 = vpop.f32.mrb[27].mxu1  ;;  %v628_v57 = vld [vmem:[#allocation2 + $0x90] sm:$0xff] }
 0x185   : > { %v1420_v62 = vadd.f32 %v1318_v53, %v618_v49  ;;  %v2702_v63 = vadd.f32 %v2701_v59, %v2700_v54  ;;  %v1321_v1 = vadd.f32 %v2690_v11, %v1320_v61  ;;  %v629_v61 = vld [vmem:[#allocation2 + $0x98] sm:$0xff] }
 0x186   : > { %1454 = vst [vmem:[#allocation2 + $0x50] sm:$0xff] %v1422_v58  ;;  %v1423_v2 = vadd.f32 %v1329_v43, %v621_v55 }
 0x187   : > { %1452 = vst [vmem:[#allocation2 + $0x40] sm:$0xff] %v1420_v62  ;;  %v1421_v3 = vadd.f32 %v1321_v1, %v619_v60 }
 0x188   : > { %1455 = vst [vmem:[#allocation2 + $0x58] sm:$0xff] %v1423_v2 }
 0x189   : > { %1453 = vst [vmem:[#allocation2 + $0x48] sm:$0xff] %v1421_v3  ;;  %v2703_v4 = vpop.f32.mrb[28].mxu0  ;;  %v2811_v5 = vpop.f32.mrb[28].mxu1  ;;  %v636_v3 = vld [vmem:[#allocation2 + $0xd0] sm:$0xff] }
 0x18a   : > { %v2704_v0 = vpop.f32.mrb[29].mxu0  ;;  %v1333_v7 = vpop.f32.mrb[29].mxu1 }
 0x18b   : > { %v2705_v8 = vadd.f32 %v2704_v0, %v2703_v4  ;;  %v1334_v9 = vadd.f32 %v2699_v52, %v1333_v7  ;;  %v2706_v10 = vpop.f32.mrb[30].mxu0  ;;  %v2812_v12 = vpop.f32.mrb[30].mxu1 }
 0x18c   : > { %v2707_v16 = vpop.f32.mrb[31].mxu0  ;;  %v1336_v18 = vpop.f32.mrb[31].mxu1 }
 0x18d   : > { %v1342_v11 = vadd.f32 %v2811_v5, %v2705_v8  ;;  %v1424_v13 = vadd.f32 %v1334_v9, %v622_v6  ;;  %v2708_v21 = vadd.f32 %v2707_v16, %v2706_v10  ;;  %v1337_v22 = vadd.f32 %v2702_v63, %v1336_v18  ;;  %v634_v6 = vld [vmem:[#allocation2 + $0xc0] sm:$0xff] }
 0x18f   : > { %v1426_v24 = vadd.f32 %v1342_v11, %v624_v15  ;;  %1456 = vst [vmem:[#allocation2 + $0x60] sm:$0xff] %v1424_v13  ;;  %v1345_v25 = vadd.f32 %v2812_v12, %v2708_v21  ;;  %v1425_v27 = vadd.f32 %v1337_v22, %v623_v17  ;;  %v637_v12 = vld [vmem:[#allocation2 + $0xd8] sm:$0xff]  ;;  %v630_v17 = vld [vmem:[#allocation2 + $0xa0] sm:$0xff]  ;;  %v635_v13 = vld [vmem:[#allocation2 + $0xc8] sm:$0xff] }
 0x191   : > { %1458 = vst [vmem:[#allocation2 + $0x70] sm:$0xff] %v1426_v24  ;;  %v1427_v28 = vadd.f32 %v1345_v25, %v625_v23  ;;  %1457 = vst [vmem:[#allocation2 + $0x68] sm:$0xff] %v1425_v27  ;;  %v2709_v29 = vpop.f32.mrb[32].mxu0  ;;  %v2815_v30 = vpop.f32.mrb[32].mxu1  ;;  %v631_v27 = vld [vmem:[#allocation2 + $0xa8] sm:$0xff] }
 0x192   : > { %v2710_v31 = vpop.f32.mrb[33].mxu0  ;;  %v1349_v19 = vpop.f32.mrb[33].mxu1 }
 0x193   : > { %1459 = vst [vmem:[#allocation2 + $0x78] sm:$0xff] %v1427_v28  ;;  %v2711_v33 = vadd.f32 %v2710_v31, %v2709_v29  ;;  %v2712_v34 = vpop.f32.mrb[34].mxu0  ;;  %v2816_v35 = vpop.f32.mrb[34].mxu1  ;;  %v640_v31 = vld [vmem:[#allocation2 + $0xf0] sm:$0xff] }
 0x194   : > { %v2713_v39 = vpop.f32.mrb[35].mxu0  ;;  %v1352_v40 = vpop.f32.mrb[35].mxu1 }
 0x195   : > { %v1350_v41 = vadd.f32 %v2711_v33, %v1349_v19  ;;  %v2714_v42 = vadd.f32 %v2713_v39, %v2712_v34 }
 0x197   : > { %v1428_v46 = vadd.f32 %v1350_v41, %v626_v36  ;;  %v1353_v37 = vadd.f32 %v2714_v42, %v1352_v40  ;;  %v641_v41 = vld [vmem:[#allocation2 + $0xf8] sm:$0xff] }
 0x199   : > { %1460 = vst [vmem:[#allocation2 + $0x80] sm:$0xff] %v1428_v46  ;;  %v1429_v47 = vadd.f32 %v1353_v37, %v627_v45  ;;  %v2715_v48 = vpop.f32.mrb[36].mxu0  ;;  %v3511_v49 = vpop.f32.mrb[36].mxu1  ;;  %v632_v46 = vld [vmem:[#allocation2 + $0xb0] sm:$0xff] }
 0x19a   : > { %v2716_v51 = vpop.f32.mrb[37].mxu0  ;;  %v1365_v52 = vpop.f32.mrb[37].mxu1 }
 0x19b   : > { %1461 = vst [vmem:[#allocation2 + $0x88] sm:$0xff] %v1429_v47  ;;  %v2717_v53 = vadd.f32 %v2716_v51, %v2715_v48  ;;  %v2718_v54 = vpop.f32.mrb[38].mxu0  ;;  %v3513_v55 = vpop.f32.mrb[38].mxu1  ;;  %v639_v48 = vld [vmem:[#allocation2 + $0xe8] sm:$0xff] }
 0x19c   : > { %v2719_v58 = vpop.f32.mrb[39].mxu0  ;;  %v1368_v43 = vpop.f32.mrb[39].mxu1 }
 0x19d   : > { %v1358_v59 = vadd.f32 %v2815_v30, %v2717_v53  ;;  %v2720_v60 = vadd.f32 %v2719_v58, %v2718_v54  ;;  %v633_v58 = vld [vmem:[#allocation2 + $0xb8] sm:$0xff] }
 0x19f   : > { %v1430_v62 = vadd.f32 %v1358_v59, %v628_v57  ;;  %v1361_v63 = vadd.f32 %v2816_v35, %v2720_v60  ;;  %v638_v35 = vld [vmem:[#allocation2 + $0xe0] sm:$0xff]  ;;  %v1481_v60 = vld [vmem:[#allocation2 + $0x8] sm:$0xff] (!%p2370_p13) }
 0x1a1   : > { %1462 = vst [vmem:[#allocation2 + $0x90] sm:$0xff] %v1430_v62  ;;  %v1431_v1 = vadd.f32 %v1361_v63, %v629_v61  ;;  %v2721_v2 = vpop.f32.mrb[40].mxu0  ;;  %v2823_v4 = vpop.f32.mrb[40].mxu1  ;;  %v3536_v62 = vld [vmem:[%s3872_s3] ss:$0 sm:$0xff] (!%p2370_p13)  ;;  %v1482_v63 = vld [vmem:[#allocation2 + $0x10] sm:$0xff] (!%p2370_p13) }
 0x1a2   : > { %v1390_v5 = vadd.f32 %v2823_v4, %v3499_v26  ;;  %v2722_v0 = vpop.f32.mrb[41].mxu0  ;;  %v1381_v7 = vpop.f32.mrb[41].mxu1 }
 0x1a3   : > { %1463 = vst [vmem:[#allocation2 + $0x98] sm:$0xff] %v1431_v1  ;;  %v2723_v8 = vadd.f32 %v2722_v0, %v2721_v2  ;;  %v1382_v9 = vadd.f32 %v3495_v14, %v1381_v7  ;;  %v2724_v10 = vpop.f32.mrb[42].mxu0  ;;  %v2824_v15 = vpop.f32.mrb[42].mxu1  ;;  %v1483_v1 = vld [vmem:[#allocation2 + $0x18] sm:$0xff] (!%p2370_p13) }
 0x1a4   : > { %v1438_v16 = vadd.f32 %v1390_v5, %v636_v3  ;;  %v1393_v18 = vadd.f32 %v2824_v15, %v3501_v32  ;;  %v2725_v11 = vpop.f32.mrb[43].mxu0  ;;  %v1384_v21 = vpop.f32.mrb[43].mxu1  ;;  %v1484_v3 = vld [vmem:[#allocation2 + $0x20] sm:$0xff] (!%p2370_p13) }
 0x1a5   : > { %v1366_v22 = vadd.f32 %v2723_v8, %v1365_v52  ;;  %v1436_v23 = vadd.f32 %v1382_v9, %v634_v6  ;;  %v2726_v26 = vadd.f32 %v2725_v11, %v2724_v10  ;;  %v1385_v24 = vadd.f32 %v3497_v20, %v1384_v21  ;;  %v1485_v6 = vld [vmem:[#allocation2 + $0x28] sm:$0xff] (!%p2370_p13)  ;;  %v1486_v10 = vld [vmem:[#allocation2 + $0x30] sm:$0xff] (!%p2370_p13)  ;;  %v3564_v21 = vld [vmem:[%s3413_s13] sm:$0xff] (!%p2370_p13)  }
 0x1a6   : > { %1470 = vst [vmem:[#allocation2 + $0xd0] sm:$0xff] %v1438_v16  ;;  %v1439_v25 = vadd.f32 %v1393_v18, %v637_v12  ;;  %v1487_v12 = vld [vmem:[#allocation2 + $0x38] sm:$0xff] (!%p2370_p13) }
 0x1a7   : > { %v1432_v28 = vadd.f32 %v1366_v22, %v630_v17  ;;  %1468 = vst [vmem:[#allocation2 + $0xc0] sm:$0xff] %v1436_v23  ;;  %v1369_v14 = vadd.f32 %v2726_v26, %v1368_v43  ;;  %v1437_v29 = vadd.f32 %v1385_v24, %v635_v13  ;;  %v1488_v24 = vld [vmem:[#allocation2 + $0x40] sm:$0xff] (!%p2370_p13) }
 0x1a8   : > { %1471 = vst [vmem:[#allocation2 + $0xd8] sm:$0xff] %v1439_v25  ;;  %v1489_v25 = vld [vmem:[#allocation2 + $0x48] sm:$0xff] (!%p2370_p13) }
 0x1a9   : > { %1464 = vst [vmem:[#allocation2 + $0xa0] sm:$0xff] %v1432_v28  ;;  %v1433_v30 = vadd.f32 %v1369_v14, %v631_v27  ;;  %1469 = vst [vmem:[#allocation2 + $0xc8] sm:$0xff] %v1437_v29  ;;  %v2727_v32 = vpop.f32.mrb[44].mxu0  ;;  %v2827_v19 = vpop.f32.mrb[44].mxu1 }
 0x1aa   : > { %v1406_v33 = vadd.f32 %v2827_v19, %v3507_v50  ;;  %v2728_v34 = vpop.f32.mrb[45].mxu0  ;;  %v1397_v36 = vpop.f32.mrb[45].mxu1 }
 0x1ab   : > { %1465 = vst [vmem:[#allocation2 + $0xa8] sm:$0xff] %v1433_v30  ;;  %v2729_v20 = vadd.f32 %v2728_v34, %v2727_v32  ;;  %v1398_v39 = vadd.f32 %v3503_v38, %v1397_v36  ;;  %v2730_v40 = vpop.f32.mrb[46].mxu0  ;;  %v2828_v42 = vpop.f32.mrb[46].mxu1  ;;  %v1490_v30 = vld [vmem:[#allocation2 + $0x50] sm:$0xff] (!%p2370_p13)  ;;  %v2473_v32 = vunpack.c.l.bf16 (!%p2370_p13), %v3564_v21  ;;  %v1491_v34 = vld [vmem:[#allocation2 + $0x58] sm:$0xff] (!%p2370_p13) }
 0x1ac   : > { %v1442_v45 = vadd.f32 %v1406_v33, %v640_v31  ;;  %v1409_v37 = vadd.f32 %v2828_v42, %v3509_v56  ;;  %v2731_v47 = vpop.f32.mrb[47].mxu0  ;;  %v1400_v51 = vpop.f32.mrb[47].mxu1  ;;  %v3579_v31 = vld [vmem:[%s3413_s13 + $0x8] sm:$0xff] (!%p2370_p13)  }
 0x1ad   : > { %v1374_v52 = vadd.f32 %v3511_v49, %v2729_v20  ;;  %v1440_v50 = vadd.f32 %v1398_v39, %v638_v35  ;;  %v2732_v53 = vadd.f32 %v2731_v47, %v2730_v40  ;;  %v1401_v54 = vadd.f32 %v3505_v44, %v1400_v51  ;;  %1479 = sbr.rel (%p2370_p13) target bundleno = 527 (0x20f), region = 74  ;;  %v1480_v49 = vld [vmem:[#allocation2] sm:$0xff] (!%p2370_p13)  ;;  %v3587_v39 = vld [vmem:[%s3413_s13 + $0x10] sm:$0xff] (!%p2370_p13)   ;;  %v3590_v40 = vld [vmem:[%s3413_s13 + $0x18] sm:$0xff] (!%p2370_p13)  }
 0x1ae   : > { %1474 = vst [vmem:[#allocation2 + $0xf0] sm:$0xff] %v1442_v45  ;;  %v1443_v57 = vadd.f32 %v1409_v37, %v641_v41  ;;  %v3529_v44 = vld [vmem:[%s3871_s2] ss:$0 sm:$0xff] (!%p2370_p13)  ;;  %v2474_v35 = vunpack.c.h.bf16 (!%p2370_p13), %v3564_v21  ;;  %v2478_v37 = vunpack.c.h.bf16 (!%p2370_p13), %v3579_v31 }
 0x1af   : > { %v1434_v38 = vadd.f32 %v1374_v52, %v632_v46  ;;  %1472 = vst [vmem:[#allocation2 + $0xe0] sm:$0xff] %v1440_v50  ;;  %v1377_v43 = vadd.f32 %v3513_v55, %v2732_v53  ;;  %v1441_v59 = vadd.f32 %v1401_v54, %v639_v48  ;;  %v1519_v61 = vmul.f32 (!%p2370_p13), %v3529_v44, %v1480_v49  ;;  %v1492_v48 = vld [vmem:[#allocation2 + $0x60] sm:$0xff] (!%p2370_p13) }
 0x1b0   : > { %1475 = vst [vmem:[#allocation2 + $0xf8] sm:$0xff] %v1443_v57  ;;  %v1520_v55 = vmul.f32 (!%p2370_p13), %v3529_v44, %v1481_v60  ;;  %v1521_v2 = vmul.f32 (!%p2370_p13), %v3529_v44, %v1482_v63  ;;  %v1522_v0 = vmul.f32 (!%p2370_p13), %v3529_v44, %v1483_v1  ;;  %v1523_v8 = vmul.f32 (!%p2370_p13), %v3529_v44, %v1484_v3  ;;  %v3605_v50 = vld [vmem:[%s3413_s13 + $0x20] sm:$0xff] (!%p2370_p13)   ;;  %v1495_v3 = vld [vmem:[#allocation2 + $0x78] sm:$0xff] (!%p2370_p13) }
 0x1b1   : > { %1466 = vst [vmem:[#allocation2 + $0xb0] sm:$0xff] %v1434_v38  ;;  %v1435_v56 = vadd.f32 %v1377_v43, %v633_v58  ;;  %1473 = vst [vmem:[#allocation2 + $0xe8] sm:$0xff] %v1441_v59  ;;  %v3540_v4 = vadd.f32 (!%p2370_p13), %v3536_v62, %v1519_v61  ;;  %v1524_v9 = vmul.f32 (!%p2370_p13), %v3529_v44, %v1485_v6  ;;  %v2477_v46 = vunpack.c.l.bf16 (!%p2370_p13), %v3579_v31  ;;  %v3617_v43 = vld [vmem:[%s3413_s13 + $0x28] sm:$0xff] (!%p2370_p13)   ;;  %v1494_v61 = vld [vmem:[#allocation2 + $0x70] sm:$0xff] (!%p2370_p13) }
 0x1b2   : > { %v3543_v5 = vadd.f32 (!%p2370_p13), %v3536_v62, %v1520_v55  ;;  %v3547_v7 = vadd.f32 (!%p2370_p13), %v3536_v62, %v1521_v2  ;;  %v3554_v17 = vadd.f32 (!%p2370_p13), %v3536_v62, %v1522_v0  ;;  %v3558_v11 = vadd.f32 (!%p2370_p13), %v3536_v62, %v1523_v8  ;;  %v1493_v59 = vld [vmem:[#allocation2 + $0x68] sm:$0xff] (!%p2370_p13) }
 0x1b3   : > { %1467 = vst [vmem:[#allocation2 + $0xb8] sm:$0xff] %v1435_v56  ;;  %v2373_v15 = vmul.f32 (!%p2370_p13), -1.442695, %v3540_v4  ;;  %v3561_v13 = vadd.f32 (!%p2370_p13), %v3536_v62, %v1524_v9  ;;  %v1525_v23 = vmul.f32 (!%p2370_p13), %v3529_v44, %v1486_v10  ;;  %v1526_v26 = vmul.f32 (!%p2370_p13), %v3529_v44, %v1487_v12  ;;  %v3628_v10 = vld [vmem:[%s3413_s13 + $0x30] sm:$0xff] (!%p2370_p13)  }
 0x1b4   : > { %v2374_v16 = vmul.f32 -1.442695, %v3543_v5  ;;  %v2375_v18 = vmul.f32 -1.442695, %v3547_v7  ;;  %v2376_v22 = vmul.f32 -1.442695, %v3554_v17  ;;  %v1527_v19 = vmul.f32 %v3529_v44, %v1488_v24 }
 0x1b5   : > { %2993 = vpow2.f32 %v2373_v15  ;;  %v2377_v27 = vmul.f32 -1.442695, %v3558_v11  ;;  %v2378_v28 = vmul.f32 -1.442695, %v3561_v13  ;;  %v3572_v14 = vadd.f32 %v3536_v62, %v1525_v23 }
 0x1b6   : > { %2995 = vpow2.f32 %v2374_v16  ;;  %v3575_v29 = vadd.f32 %v3536_v62, %v1526_v26  ;;  %v1528_v33 = vmul.f32 %v3529_v44, %v1489_v25  ;;  %v3593_v41 = vadd.f32 %v3536_v62, %v1527_v19 }
 0x1b7   : > { %2997 = vpow2.f32 %v2375_v18  ;;  %v2379_v36 = vmul.f32 -1.442695, %v3572_v14  ;;  %v1529_v45 = vmul.f32 %v3529_v44, %v1490_v30  ;;  %v1530_v47 = vmul.f32 %v3529_v44, %v1491_v34 }
 0x1b8   : > { %2999 = vpow2.f32 %v2376_v22  ;;  %v2380_v20 = vmul.f32 -1.442695, %v3575_v29  ;;  %v3596_v42 = vadd.f32 %v3536_v62, %v1528_v33  ;;  %v2381_v51 = vmul.f32 -1.442695, %v3593_v41  ;;  %v1496_v22 = vld [vmem:[#allocation2 + $0x80] sm:$0xff] }
 0x1b9   : > { %3001 = vpow2.f32 %v2377_v27  ;;  %v3608_v53 = vadd.f32 %v3536_v62, %v1529_v45  ;;  %v2481_v54 = vunpack.c.l.bf16 %v3587_v39  ;;  %v2482_v57 = vunpack.c.h.bf16 %v3587_v39  ;;  %v1497_v27 = vld [vmem:[#allocation2 + $0x88] sm:$0xff] }
 0x1ba   : > { %3003 = vpow2.f32 %v2378_v28  ;;  %v2382_v52 = vmul.f32 -1.442695, %v3596_v42  ;;  %v2485_v58 = vunpack.c.l.bf16 %v3590_v40  ;;  %v3614_v38 = vadd.f32 %v3536_v62, %v1530_v47  ;;  %v1498_v47 = vld [vmem:[#allocation2 + $0x90] sm:$0xff] }
 0x1bb   : > { %3005 = vpow2.f32 %v2379_v36  ;;  %v2486_v56 = vunpack.c.h.bf16 %v3590_v40  ;;  %v2383_v49 = vmul.f32 -1.442695, %v3608_v53  ;;  %v1531_v60 = vmul.f32 %v3529_v44, %v1492_v48 }
 0x1bc   : > { %3007 = vpow2.f32 %v2380_v20  ;;  %v2489_v63 = vunpack.c.l.bf16 %v3605_v50  ;;  %v2490_v1 = vunpack.c.h.bf16 %v3605_v50  ;;  %v2384_v2 = vmul.f32 -1.442695, %v3614_v38  ;;  %v3735_v50 = vld [vmem:[%s3413_s13 + $0x40] sm:$0xff]  }
 0x1bd   : > { %3009 = vpow2.f32 %v2381_v51  ;;  %v2493_v8 = vunpack.c.l.bf16 %v3617_v43  ;;  %v1532_v9 = vmul.f32 %v3529_v44, %v1493_v59  ;;  %v2494_v16 = vunpack.c.h.bf16 %v3617_v43 }
 0x1be   : > { %3011 = vpow2.f32 %v2382_v52  ;;  %v1533_v18 = vmul.f32 %v3529_v44, %v1494_v61  ;;  %v3633_v24 = vadd.f32 %v3536_v62, %v1531_v60  ;;  %v1534_v25 = vmul.f32 %v3529_v44, %v1495_v3 }
 0x1bf   : > { %v2994_v55 = vpop.eup %2993  ;;  %3013 = vpow2.f32 %v2383_v49  ;;  %v2497_v19 = vunpack.c.l.bf16 %v3628_v10  ;;  %v2498_v33 = vunpack.c.h.bf16 %v3628_v10  ;;  %v3639_v20 = vadd.f32 %v3536_v62, %v1532_v9  ;;  %v1499_v49 = vld [vmem:[#allocation2 + $0x98] sm:$0xff] }
 0x1c0   : > { %v2996_v0 = vpop.eup %2995  ;;  %v1686_v6 = vadd.f32 1.0, %v2994_v55  ;;  %3015 = vpow2.f32 %v2384_v2  ;;  %v1535_v45 = vmul.f32 %v3529_v44, %v1496_v22  ;;  %v3643_v52 = vadd.f32 %v3536_v62, %v1533_v18  ;;  %v1500_v22 = vld [vmem:[#allocation2 + $0xa0] sm:$0xff] }
 0x1c1   : > { %v2998_v12 = vpop.eup %2997  ;;  %v1687_v15 = vadd.f32 1.0, %v2996_v0  ;;  %v1536_v59 = vmul.f32 %v3529_v44, %v1497_v27  ;;  %v2385_v55 = vmul.f32 -1.442695, %v3633_v24  ;;  %v3648_v2 = vadd.f32 %v3536_v62, %v1534_v25 }
 0x1c2   : > { %v3000_v23 = vpop.eup %2999  ;;  %3017 = vrcp.f32 %v1686_v6  ;;  %v1688_v26 = vadd.f32 1.0, %v2998_v12  ;;  %v3651_v0 = vadd.f32 %v3536_v62, %v1535_v45  ;;  %v1537_v6 = vmul.f32 %v3529_v44, %v1498_v47 }
 0x1c3   : > { %v3002_v28 = vpop.eup %3001  ;;  %3019 = vrcp.f32 %v1687_v15  ;;  %v1689_v30 = vadd.f32 1.0, %v3000_v23  ;;  %v2386_v12 = vmul.f32 -1.442695, %v3639_v20  ;;  %v3656_v15 = vadd.f32 %v3536_v62, %v1536_v59 }
 0x1c4   : > { %v3004_v34 = vpop.eup %3003  ;;  %3021 = vrcp.f32 %v1688_v26  ;;  %v1690_v36 = vadd.f32 1.0, %v3002_v28  ;;  %v1538_v18 = vmul.f32 %v3529_v44, %v1499_v49  ;;  %v2387_v25 = vmul.f32 -1.442695, %v3643_v52  ;;  %v1501_v28 = vld [vmem:[#allocation2 + $0xa8] sm:$0xff] }
 0x1c5   : > { %v3006_v48 = vpop.eup %3005  ;;  %3023 = vrcp.f32 %v1689_v30  ;;  %v1691_v51 = vadd.f32 1.0, %v3004_v34  ;;  %v3661_v27 = vadd.f32 %v3536_v62, %v1537_v6  ;;  %v1539_v59 = vmul.f32 %v3529_v44, %v1500_v22 }
 0x1c6   : > { %v3008_v60 = vpop.eup %3007  ;;  %3025 = vrcp.f32 %v1690_v36  ;;  %v1692_v61 = vadd.f32 1.0, %v3006_v48  ;;  %v2388_v36 = vmul.f32 -1.442695, %v3648_v2  ;;  %v3665_v45 = vadd.f32 %v3536_v62, %v1538_v18 }
 0x1c7   : > { %3027 = vrcp.f32 %v1691_v51  ;;  %v1693_v3 = vadd.f32 1.0, %v3008_v60  ;;  %v3010_v9 = vpop.eup %3009  ;;  %v2389_v51 = vmul.f32 -1.442695, %v3651_v0  ;;  %v3674_v18 = vadd.f32 %v3536_v62, %v1539_v59 }
 0x1c8   : > { %3029 = vrcp.f32 %v1692_v61  ;;  %v3012_v23 = vpop.eup %3011  ;;  %v1694_v26 = vadd.f32 1.0, %v3010_v9  ;;  %v2390_v61 = vmul.f32 -1.442695, %v3656_v15  ;;  %v2391_v9 = vmul.f32 -1.442695, %v3661_v27 }
 0x1c9   : > { %3031 = vrcp.f32 %v1693_v3  ;;  %v3014_v30 = vpop.eup %3013  ;;  %v1695_v34 = vadd.f32 1.0, %v3012_v23  ;;  %v1540_v3 = vmul.f32 %v3529_v44, %v1501_v28  ;;  %v2392_v22 = vmul.f32 -1.442695, %v3665_v45 }
 0x1ca   : > { %3033 = vpow2.f32 %v2385_v55  ;;  %v3016_v47 = vpop.eup %3015  ;;  %v1696_v48 = vadd.f32 1.0, %v3014_v30  ;;  %v2505_v43 = vunpack.c.l.bf16 %v3735_v50 }
 0x1cb   : > { %3035 = vrcp.f32 %v1694_v26  ;;  %v1697_v60 = vadd.f32 1.0, %v3016_v47  ;;  %v3679_v30 = vadd.f32 %v3536_v62, %v1540_v3  ;;  %v1503_v3 = vld [vmem:[#allocation2 + $0xb8] sm:$0xff] }
 0x1cc   : > { %v3018_v49 = vpop.eup %3017  ;;  %3037 = vrcp.f32 %v1695_v34  ;;  %v1502_v34 = vld [vmem:[#allocation2 + $0xb0] sm:$0xff] }
 0x1cd   : > { %v3020_v55 = vpop.eup %3019  ;;  %v1782_v6 = vmul.f32 %v3018_v49, %v3540_v4  ;;  %3039 = vrcp.f32 %v1696_v48  ;;  %v2393_v48 = vmul.f32 -1.442695, %v3674_v18 }
 0x1ce   : > { %v3022_v23 = vpop.eup %3021  ;;  %v1783_v26 = vmul.f32 %v3020_v55, %v3543_v5  ;;  %3041 = vrcp.f32 %v1697_v60  ;;  %v2394_v60 = vmul.f32 -1.442695, %v3679_v30 }
 0x1cf   : > { %v3024_v28 = vpop.eup %3023  ;;  %v1878_v4 = vadd.f32 %v2473_v32, %v1782_v6  ;;  %v1784_v47 = vmul.f32 %v3022_v23, %v3547_v7  ;;  %3043 = vpow2.f32 %v2386_v12  ;;  %v1541_v12 = vmul.f32 %v3529_v44, %v1502_v34 }
 0x1d0   : > { %v3026_v59 = vpop.eup %3025  ;;  %v1879_v5 = vadd.f32 %v2474_v35, %v1783_v26  ;;  %v1785_v49 = vmul.f32 %v3024_v28, %v3554_v17  ;;  %3045 = vpow2.f32 %v2387_v25 }
 0x1d1   : > { %v3028_v55 = vpop.eup %3027  ;;  %v1880_v32 = vadd.f32 %v2477_v46, %v1784_v47  ;;  %v1786_v7 = vmul.f32 %v3026_v59, %v3558_v11  ;;  %3047 = vpow2.f32 %v2388_v36  ;;  %v1542_v11 = vmul.f32 %v3529_v44, %v1503_v3 }
 0x1d2   : > { %v3030_v6 = vpop.eup %3029  ;;  %v2538_v23 = vpack.c.bf16 %v1879_v5, %v1878_v4  ;;  %v1881_v21 = vadd.f32 %v2478_v37, %v1785_v49  ;;  %v1787_v17 = vmul.f32 %v3028_v55, %v3561_v13  ;;  %3049 = vpow2.f32 %v2389_v51  ;;  %v1504_v5 = vld [vmem:[#allocation2 + $0xc0] sm:$0xff]  ;;  %v1505_v49 = vld [vmem:[#allocation2 + $0xc8] sm:$0xff] }
 0x1d3   : > { %v3032_v35 = vpop.eup %3031  ;;  %v1882_v25 = vadd.f32 %v2481_v54, %v1786_v7  ;;  %v1788_v46 = vmul.f32 %v3030_v6, %v3572_v14  ;;  %3051 = vpow2.f32 %v2390_v61  ;;  %v3707_v14 = vadd.f32 %v3536_v62, %v1541_v12 }
 0x1d4   : > { %v3034_v36 = vpop.eup %3033  ;;  %2539 = vst [vmem:[%s3418_s21] sm:$0xff] %v2538_v23   ;;  %v2543_v26 = vpack.c.bf16 %v1881_v21, %v1880_v32  ;;  %v1883_v31 = vadd.f32 %v2482_v57, %v1787_v17  ;;  %v1789_v37 = vmul.f32 %v3032_v35, %v3575_v29  ;;  %3053 = vpow2.f32 %v2391_v9  ;;  %v1506_v21 = vld [vmem:[#allocation2 + $0xd0] sm:$0xff] }
 0x1d5   : > { %v3036_v13 = vpop.eup %3035  ;;  %v1884_v54 = vadd.f32 %v2485_v58, %v1788_v46  ;;  %v1698_v51 = vadd.f32 1.0, %v3034_v36  ;;  %3055 = vpow2.f32 %v2392_v22  ;;  %v3715_v58 = vld [vmem:[%s3413_s13 + $0x38] sm:$0xff]   ;;  %v3718_v22 = vadd.f32 %v3536_v62, %v1542_v11 }
 0x1d6   : > { %v3038_v61 = vpop.eup %3037  ;;  %2630 = vst [vmem:[%s3418_s21 + $0x8] sm:$0xff] %v2543_v26   ;;  %v2548_v34 = vpack.c.bf16 %v1883_v31, %v1882_v25  ;;  %v1885_v39 = vadd.f32 %v2486_v56, %v1789_v37  ;;  %v1790_v29 = vmul.f32 %v3036_v13, %v3593_v41  ;;  %3057 = vpow2.f32 %v2393_v48  ;;  %v1507_v31 = vld [vmem:[#allocation2 + $0xd8] sm:$0xff] }
 0x1d7   : > { %v3040_v57 = vpop.eup %3039  ;;  %v1791_v9 = vmul.f32 %v3038_v61, %v3596_v42  ;;  %3059 = vrcp.f32 %v1698_v51  ;;  %v2395_v28 = vmul.f32 -1.442695, %v3707_v14  ;;  %v2396_v59 = vmul.f32 -1.442695, %v3718_v22 }
 0x1d8   : > { %v3042_v4 = vpop.eup %3041  ;;  %2631 = vst [vmem:[%s3418_s21 + $0x10] sm:$0xff] %v2548_v34   ;;  %v2553_v47 = vpack.c.bf16 %v1885_v39, %v1884_v54  ;;  %v1886_v40 = vadd.f32 %v2489_v63, %v1790_v29  ;;  %v1792_v41 = vmul.f32 %v3040_v57, %v3608_v53  ;;  %3061 = vpow2.f32 %v2394_v60  ;;  %v3752_v54 = vld [vmem:[%s3413_s13 + $0x50] sm:$0xff]  }
 0x1d9   : > { %v3044_v42 = vpop.eup %3043  ;;  %v1887_v56 = vadd.f32 %v2490_v1, %v1791_v9  ;;  %v1793_v48 = vmul.f32 %v3042_v4, %v3614_v38  ;;  %3063 = vpow2.f32 %v2395_v28  ;;  %v2501_v53 = vunpack.c.l.bf16 %v3715_v58 }
 0x1da   : > { %v3046_v3 = vpop.eup %3045  ;;  %2632 = vst [vmem:[%s3418_s21 + $0x18] sm:$0xff] %v2553_v47   ;;  %v1888_v63 = vadd.f32 %v2493_v8, %v1792_v41  ;;  %v1699_v55 = vadd.f32 1.0, %v3044_v42  ;;  %v2502_v60 = vunpack.c.h.bf16 %v3715_v58  ;;  %3065 = vpow2.f32 %v2396_v59  ;;  %v1509_v59 = vld [vmem:[#allocation2 + $0xe8] sm:$0xff] }
 0x1db   : > { %v3048_v1 = vpop.eup %3047  ;;  %v2558_v38 = vpack.c.bf16 %v1887_v56, %v1886_v40  ;;  %v1889_v32 = vadd.f32 %v2494_v16, %v1793_v48  ;;  %v1700_v7 = vadd.f32 1.0, %v3046_v3  ;;  %v1543_v8 = vmul.f32 %v3529_v44, %v1504_v5  ;;  %v3744_v16 = vld [vmem:[%s3413_s13 + $0x48] sm:$0xff]   ;;  %v1508_v40 = vld [vmem:[#allocation2 + $0xe0] sm:$0xff] }
 0x1dc   : > { %v3050_v12 = vpop.eup %3049  ;;  %3067 = vrcp.f32 %v1699_v55  ;;  %v1701_v6 = vadd.f32 1.0, %v3048_v1  ;;  %v1544_v23 = vmul.f32 %v3529_v44, %v1505_v49  ;;  %v2506_v36 = vunpack.c.h.bf16 %v3735_v50 }
 0x1dd   : > { %v3052_v17 = vpop.eup %3051  ;;  %2633 = vst [vmem:[%s3418_s21 + $0x20] sm:$0xff] %v2558_v38   ;;  %v2563_v35 = vpack.c.bf16 %v1889_v32, %v1888_v63  ;;  %3069 = vrcp.f32 %v1700_v7  ;;  %v1702_v25 = vadd.f32 1.0, %v3050_v12  ;;  %v3748_v26 = vadd.f32 %v3536_v62, %v1543_v8  ;;  %v1510_v38 = vld [vmem:[#allocation2 + $0xf0] sm:$0xff]  ;;  %v1511_v8 = vld [vmem:[#allocation2 + $0xf8] sm:$0xff] }
 0x1de   : > { %v3054_v46 = vpop.eup %3053  ;;  %3071 = vrcp.f32 %v1701_v6  ;;  %v1703_v11 = vadd.f32 1.0, %v3052_v17  ;;  %v3755_v51 = vadd.f32 %v3536_v62, %v1544_v23  ;;  %v1545_v61 = vmul.f32 %v3529_v44, %v1506_v21 }
 0x1df   : > { %v3056_v37 = vpop.eup %3055  ;;  %2634 = vst [vmem:[%s3418_s21 + $0x28] sm:$0xff] %v2563_v35   ;;  %3073 = vrcp.f32 %v1702_v25  ;;  %v1704_v13 = vadd.f32 1.0, %v3054_v46  ;;  %v2509_v29 = vunpack.c.l.bf16 %v3744_v16  ;;  %v2397_v57 = vmul.f32 -1.442695, %v3748_v26 }
 0x1e0   : > { %v3058_v34 = vpop.eup %3057  ;;  %3075 = vrcp.f32 %v1703_v11  ;;  %v1705_v39 = vadd.f32 1.0, %v3056_v37  ;;  %v1546_v4 = vmul.f32 %v3529_v44, %v1507_v31  ;;  %v3762_v47 = vadd.f32 %v3536_v62, %v1545_v61 }
 0x1e1   : > { %v3060_v9 = vpop.eup %3059  ;;  %3077 = vrcp.f32 %v1704_v13  ;;  %v1706_v28 = vadd.f32 1.0, %v3058_v34  ;;  %v2510_v56 = vunpack.c.h.bf16 %v3744_v16  ;;  %v2513_v48 = vunpack.c.l.bf16 %v3752_v54 }
 0x1e2   : > { %v3062_v41 = vpop.eup %3061  ;;  %v1794_v42 = vmul.f32 %v3060_v9, %v3633_v24  ;;  %3079 = vrcp.f32 %v1705_v39  ;;  %v2398_v3 = vmul.f32 -1.442695, %v3755_v51  ;;  %v3769_v63 = vadd.f32 %v3536_v62, %v1546_v4 }
 0x1e3   : > { %v3064_v5 = vpop.eup %3063  ;;  %v1707_v49 = vadd.f32 1.0, %v3062_v41  ;;  %3081 = vrcp.f32 %v1706_v28  ;;  %v2514_v55 = vunpack.c.h.bf16 %v3752_v54  ;;  %v1547_v24 = vmul.f32 %v3529_v44, %v1508_v40 }
 0x1e4   : > { %v1708_v1 = vadd.f32 1.0, %v3064_v5  ;;  %3083 = vpow2.f32 %v2397_v57  ;;  %v3066_v32 = vpop.eup %3065  ;;  %v1890_v7 = vadd.f32 %v2497_v19, %v1794_v42  ;;  %v2399_v12 = vmul.f32 -1.442695, %v3762_v47 }
 0x1e5   : > { %3085 = vrcp.f32 %v1707_v49  ;;  %v1548_v6 = vmul.f32 %v3529_v44, %v1509_v59  ;;  %v1709_v21 = vadd.f32 1.0, %v3066_v32  ;;  %v2400_v17 = vmul.f32 -1.442695, %v3769_v63 }
 0x1e6   : > { %v3068_v23 = vpop.eup %3067  ;;  %3087 = vrcp.f32 %v1708_v1  ;;  %v3779_v35 = vadd.f32 %v3536_v62, %v1547_v24  ;;  %v1549_v11 = vmul.f32 %v3529_v44, %v1510_v38  ;;  %v1550_v61 = vmul.f32 %v3529_v44, %v1511_v8 }
 0x1e7   : > { %v3070_v25 = vpop.eup %3069  ;;  %v1795_v46 = vmul.f32 %v3068_v23, %v3639_v20  ;;  %3089 = vpow2.f32 %v2398_v3  ;;  %v3783_v19 = vadd.f32 %v3536_v62, %v1548_v6 }
 0x1e8   : > { %v3072_v31 = vpop.eup %3071  ;;  %v1796_v37 = vmul.f32 %v3070_v25, %v3643_v52  ;;  %3091 = vrcp.f32 %v1709_v21  ;;  %v2401_v13 = vmul.f32 -1.442695, %v3779_v35  ;;  %v3797_v4 = vadd.f32 %v3536_v62, %v1549_v11 }
 0x1e9   : > { %v3074_v34 = vpop.eup %3073  ;;  %v1891_v39 = vadd.f32 %v2498_v33, %v1795_v46  ;;  %v1797_v20 = vmul.f32 %v3072_v31, %v3648_v2  ;;  %3093 = vpow2.f32 %v2399_v12  ;;  %v2402_v57 = vmul.f32 -1.442695, %v3783_v19  ;;  %v2625_v2 = vld [vmem:[%s3413_s13 + $0x58] sm:$0xff]  }
 0x1ea   : > { %v3076_v9 = vpop.eup %3075  ;;  %v1892_v28 = vadd.f32 %v2501_v53, %v1796_v37  ;;  %v1798_v52 = vmul.f32 %v3074_v34, %v3651_v0  ;;  %3095 = vpow2.f32 %v2400_v17  ;;  %v3807_v42 = vadd.f32 %v3536_v62, %v1550_v61  ;;  %v2626_v37 = vld [vmem:[%s3413_s13 + $0x60] sm:$0xff]  }
 0x1eb   : > { %v3078_v44 = vpop.eup %3077  ;;  %v2568_v40 = vpack.c.bf16 %v1891_v39, %v1890_v7  ;;  %v1893_v10 = vadd.f32 %v2502_v60, %v1797_v20  ;;  %v1799_v33 = vmul.f32 %v3076_v9, %v3656_v15  ;;  %3097 = vpow2.f32 %v2401_v13  ;;  %v2627_v9 = vld [vmem:[%s3413_s13 + $0x68] sm:$0xff]  }
 0x1ec   : > { %v3080_v41 = vpop.eup %3079  ;;  %v1894_v53 = vadd.f32 %v2505_v43, %v1798_v52  ;;  %v1800_v0 = vmul.f32 %v3078_v44, %v3661_v27  ;;  %3099 = vpow2.f32 %v2402_v57  ;;  %v2403_v60 = vmul.f32 -1.442695, %v3797_v4  ;;  %v2628_v44 = vld [vmem:[%s3413_s13 + $0x70] sm:$0xff]  }
 0x1ed   : > { %v3082_v59 = vpop.eup %3081  ;;  %2635 = vst [vmem:[%s3418_s21 + $0x30] sm:$0xff] %v2568_v40   ;;  %v2573_v5 = vpack.c.bf16 %v1893_v10, %v1892_v28  ;;  %v1895_v58 = vadd.f32 %v2506_v36, %v1799_v33  ;;  %v1801_v15 = vmul.f32 %v3080_v41, %v3665_v45  ;;  %v2517_v3 = vunpack.c.l.bf16 %v2625_v2 }
 0x1ee   : > { %v3084_v49 = vpop.eup %3083  ;;  %v1896_v43 = vadd.f32 %v2509_v29, %v1800_v0  ;;  %v1802_v27 = vmul.f32 %v3082_v59, %v3674_v18  ;;  %v2404_v62 = vmul.f32 -1.442695, %v3807_v42  ;;  %3101 = vpow2.f32 %v2403_v60  ;;  %v2629_v60 = vld [vmem:[%s3413_s13 + $0x78] sm:$0xff]  }
 0x1ef   : > { %v3086_v1 = vpop.eup %3085  ;;  %2636 = vst [vmem:[%s3418_s21 + $0x38] sm:$0xff] %v2573_v5   ;;  %v2578_v24 = vpack.c.bf16 %v1895_v58, %v1894_v53  ;;  %v1897_v50 = vadd.f32 %v2510_v56, %v1801_v15  ;;  %v1710_v36 = vadd.f32 1.0, %v3084_v49  ;;  %v2518_v12 = vunpack.c.h.bf16 %v2625_v2 }
 0x1f0   : > { %v3088_v45 = vpop.eup %3087  ;;  %v1803_v38 = vmul.f32 %v3086_v1, %v3679_v30  ;;  %v1898_v29 = vadd.f32 %v2513_v48, %v1802_v27  ;;  %3103 = vpow2.f32 %v2404_v62  ;;  %v2521_v39 = vunpack.c.l.bf16 %v2626_v37 }
 0x1f1   : > { %v3090_v18 = vpop.eup %3089  ;;  %2637 = vst [vmem:[%s3418_s21 + $0x40] sm:$0xff] %v2578_v24   ;;  %v2583_v32 = vpack.c.bf16 %v1897_v50, %v1896_v43  ;;  %v1804_v7 = vmul.f32 %v3088_v45, %v3707_v14  ;;  %3105 = vrcp.f32 %v1710_v36  ;;  %v2522_v28 = vunpack.c.h.bf16 %v2626_v37 }
 0x1f2   : > { %v3092_v16 = vpop.eup %3091  ;;  %v1899_v56 = vadd.f32 %v2514_v55, %v1803_v38  ;;  %v1711_v6 = vadd.f32 1.0, %v3090_v18  ;;  %v2525_v33 = vunpack.c.l.bf16 %v2627_v9  ;;  %v2526_v41 = vunpack.c.h.bf16 %v2627_v9 }
 0x1f3   : > { %v3094_v8 = vpop.eup %3093  ;;  %2638 = vst [vmem:[%s3418_s21 + $0x48] sm:$0xff] %v2583_v32   ;;  %v1805_v30 = vmul.f32 %v3092_v16, %v3718_v22  ;;  %v1900_v48 = vadd.f32 %v2517_v3, %v1804_v7  ;;  %v2529_v5 = vunpack.c.l.bf16 %v2628_v44  ;;  %v2530_v15 = vunpack.c.h.bf16 %v2628_v44 }
 0x1f4   : > { %v3096_v23 = vpop.eup %3095  ;;  %v2588_v21 = vpack.c.bf16 %v1899_v56, %v1898_v29  ;;  %3107 = vrcp.f32 %v1711_v6  ;;  %v1712_v17 = vadd.f32 1.0, %v3094_v8 }
 0x1f5   : > { %v3098_v14 = vpop.eup %3097  ;;  %v1901_v25 = vadd.f32 %v2518_v12, %v1805_v30  ;;  %v1713_v46 = vadd.f32 1.0, %v3096_v23 }
 0x1f6   : > { %v3100_v11 = vpop.eup %3099  ;;  %2639 = vst [vmem:[%s3418_s21 + $0x50] sm:$0xff] %v2588_v21   ;;  %3109 = vrcp.f32 %v1712_v17  ;;  %v1714_v54 = vadd.f32 1.0, %v3098_v14 }
 0x1f7   : > { %v2593_v55 = vpack.c.bf16 %v1901_v25, %v1900_v48  ;;  %3111 = vrcp.f32 %v1713_v46  ;;  %v1715_v31 = vadd.f32 1.0, %v3100_v11 }
 0x1f8   : > { %3113 = vrcp.f32 %v1714_v54  ;;  %v3102_v22 = vpop.eup %3101 }
 0x1f9   : > { %2640 = vst [vmem:[%s3418_s21 + $0x58] sm:$0xff] %v2593_v55   ;;  %3115 = vrcp.f32 %v1715_v31  ;;  %v1716_v61 = vadd.f32 1.0, %v3102_v22 }
 0x1fa   : > { %v3104_v13 = vpop.eup %3103 }
 0x1fb   : > { %v3106_v34 = vpop.eup %3105  ;;  %v1717_v20 = vadd.f32 1.0, %v3104_v13  ;;  %3117 = vrcp.f32 %v1716_v61 }
 0x1fc   : > { %v1806_v57 = vmul.f32 %v3106_v34, %v3748_v26 }
 0x1fd   : > { %3119 = vrcp.f32 %v1717_v20 }
 0x1fe   : > { %v3108_v52 = vpop.eup %3107  ;;  %v1902_v10 = vadd.f32 %v2521_v39, %v1806_v57 }
 0x1ff   : > { %v1807_v40 = vmul.f32 %v3108_v52, %v3755_v51 }
 0x200   : > { %v3110_v2 = vpop.eup %3109 }
 0x201   : > { %v3112_v53 = vpop.eup %3111  ;;  %v1903_v0 = vadd.f32 %v2522_v28, %v1807_v40  ;;  %v1808_v59 = vmul.f32 %v3110_v2, %v3762_v47  ;;  %v2533_v47 = vunpack.c.l.bf16 %v2629_v60 }
 0x202   : > { %v3114_v26 = vpop.eup %3113  ;;  %v1809_v58 = vmul.f32 %v3112_v53, %v3769_v63  ;;  %v2534_v63 = vunpack.c.h.bf16 %v2629_v60 }
 0x203   : > { %v3116_v49 = vpop.eup %3115  ;;  %v2598_v43 = vpack.c.bf16 %v1903_v0, %v1902_v10  ;;  %v1904_v27 = vadd.f32 %v2525_v33, %v1808_v59  ;;  %v1810_v51 = vmul.f32 %v3114_v26, %v3779_v35 }
 0x204   : > { %v1905_v3 = vadd.f32 %v2526_v41, %v1809_v58  ;;  %v1811_v62 = vmul.f32 %v3116_v49, %v3783_v19 }
 0x205   : > { %2641 = vst [vmem:[%s3418_s21 + $0x60] sm:$0xff] %v2598_v43   ;;  %v1906_v1 = vadd.f32 %v2529_v5, %v1810_v51  ;;  %v3118_v24 = vpop.eup %3117 }
 0x206   : > { %v2603_v50 = vpack.c.bf16 %v1905_v3, %v1904_v27  ;;  %v1907_v36 = vadd.f32 %v2530_v15, %v1811_v62  ;;  %v1812_v38 = vmul.f32 %v3118_v24, %v3797_v4 }
 0x207   : > { %v3120_v45 = vpop.eup %3119 }
 0x208   : > { %2642 = vst [vmem:[%s3418_s21 + $0x68] sm:$0xff] %v2603_v50   ;;  %v2608_v29 = vpack.c.bf16 %v1907_v36, %v1906_v1  ;;  %v1813_v18 = vmul.f32 %v3120_v45, %v3807_v42  ;;  %v1908_v35 = vadd.f32 %v2533_v47, %v1812_v38 }
 0x20a   : > { %2643 = vst [vmem:[%s3418_s21 + $0x70] sm:$0xff] %v2608_v29   ;;  %v1909_v32 = vadd.f32 %v2534_v63, %v1813_v18 }
 0x20c   : > { %v2613_v7 = vpack.c.bf16 %v1909_v32, %v1908_v35 }
 0x20e   : > { %2644 = vst [vmem:[%s3418_s21 + $0x78] sm:$0xff] %v2613_v7  }
 0x20f PF: > { %s15_s24 = sadd.s32 1, %s3175_s24   ;;  %s3875_s18 = smov %s3155_s19 }
 0x210   : > { %p12_p0 = scmp.ge.s32.totalorder %s15_s24, 8   ;;  %s3876_s19 = smov %s3259_s6 }
 0x211   : > { %s3877_s20 = smov %s3167_s22  ;;  %s3878_s21 = smov %s3171_s23 }
 0x212   : > { %s3879_s22 = smov %s3882_s25  ;;  %s3880_s23 = smov %s3886_s26 }
 0x213   :  { %14 = sbr.rel (!%p12_p0) target bundleno = 4 (0x4), region = 127 }

// kernel: efficientnet_encoder_forward.17
= control target key start
LH: loop header
LB: loop body
LE: loop exit
PB: predicated region body
PF: predicated region fallthrough
CT: control target
= control target key end

     0   :  { %s1099_s18 = smov 0   ;;  %s1101_s19 = smov 0   ;;  %s1229_s0 = inlined_call_operand.vmem [shape: bf16[128,192], index: 0, kind: input, shape index: {}]   ;;  %s1230_s1 = inlined_call_operand.vmem [shape: bf16[192,128], index: 1, kind: input, shape index: {}]   ;;  %s1231_s2 = inlined_call_operand.vmem [shape: f32[1,128], index: 2, kind: input, shape index: {}]   ;;  %s1232_s3 = inlined_call_operand.vmem [shape: f32[1,128], index: 3, kind: input, shape index: {}]   ;;  %s1233_s4 = inlined_call_operand.vmem [shape: bf16[128,128], index: 4, kind: input, shape index: {}]   ;;  %s1234_s5 = inlined_call_operand.vmem [shape: bf16[128,128], index: 5, kind: output, shape index: {}]  }
   0x1   :  { %s1103_s20 = smov 0  }
   0x2 LB: > { %s34_s21 = sadd.s32 1, %s1062_s19  ;;  %p876_p0 = scmp.ge.s32.totalorder %s1066_s20, 1  ;;  %s1066_s20 = sphi %s1103_s20, %s15_s20   ;;  %s1062_s19 = sphi %s1101_s19, %s1236_s19   ;;  %s1058_s18 = sphi %s1099_s18, %s1235_s18  }
   0x3   : > { %p36_p1 = scmp.ge.s32.totalorder %s34_s21, 2  ;;  %p265_p2 = scmp.lt.s32.totalorder %s1066_s20, 3 }
   0x5   : > { %s1238_s21 = smov (%p36_p1, %s34_s21), 0  ;;  %p266_p3 = pnand %p876_p0, %p265_p2 }
   0x6   : > { %v1020_v0 = vld [vmem:[%s1230_s1] sm:$0xff] (!%p266_p3)   ;;  %v1068_v1 = vmov (!%p266_p3), 0   ;;  %s877_s24 = sshll.u32 (!%p266_p3), %s1058_s18, 3  ;;  %v1021_v2 = vld [vmem:[%s1230_s1 + $0x8] sm:$0xff] (!%p266_p3)   ;;  %v1022_v3 = vld [vmem:[%s1230_s1 + $0x10] sm:$0xff] (!%p266_p3)   ;;  %vm529_vm0 = vcmask (!%p266_p3), 523264  }
   0x7   : > { %269 = sbr.rel (%p266_p3) target bundleno = 287 (0x11f), region = 40  ;;  %542 = vmatprep.subr.bf16.mxu0 (!%p266_p3), %v1068_v1  ;;  %971 = vmatprep.subr.bf16.mxu1 (!%p266_p3), %v1068_v1  ;;  %p325_p4 = scmp.lt.s32.totalorder (!%p266_p3), %s877_s24, 15  ;;  %v1023_v4 = vld [vmem:[%s1230_s1 + $0x18] sm:$0xff] (!%p266_p3)   ;;  %v1024_v6 = vld [vmem:[%s1230_s1 + $0x20] sm:$0xff] (!%p266_p3)   ;;  %v1025_v8 = vld [vmem:[%s1230_s1 + $0x28] sm:$0xff] (!%p266_p3)  }
   0x8   : > { %543 = vmatpush1.bf16.msra.mxu0 (!%p266_p3), %v1020_v0  ;;  %983 = vmatpush1.bf16.msra.mxu1 (!%p266_p3), %v1020_v0  ;;  %v1026_v9 = vld [vmem:[%s1230_s1 + $0x30] sm:$0xff] (!%p266_p3)   ;;  %v1027_v10 = vld [vmem:[%s1230_s1 + $0x38] sm:$0xff] (!%p266_p3)   ;;  %v1028_v11 = vld [vmem:[%s1230_s1 + $0x40] sm:$0xff] (!%p266_p3)  }
   0x9   : > { %544 = vmatprep.subr.bf16.mxu0 (!%p266_p3), %v1068_v1  ;;  %972 = vmatprep.subr.bf16.mxu1 (!%p266_p3), %v1068_v1  ;;  %v1029_v12 = vld [vmem:[%s1230_s1 + $0x48] sm:$0xff] (!%p266_p3)   ;;  %v1030_v13 = vld [vmem:[%s1230_s1 + $0x50] sm:$0xff] (!%p266_p3)   ;;  %v1031_v14 = vld [vmem:[%s1230_s1 + $0x58] sm:$0xff] (!%p266_p3)  }
   0xa   : > { %v908_v21 = vld [vmem:[%s1231_s2] ss:$0 sm:$0xff] (!%p266_p3) }
   0xb   : > { %v909_v25 = vld [vmem:[%s1232_s3] ss:$0 sm:$0xff] (!%p266_p3) }
   0xc   : > { %545 = vmatpush1.bf16.msra.mxu0 (!%p266_p3), %v1021_v2  ;;  %984 = vmatpush1.bf16.msra.mxu1 (!%p266_p3), %v1021_v2 }
   0xd   : > { %546 = vmatprep.subr.bf16.mxu0 (!%p266_p3), %v1068_v1  ;;  %973 = vmatprep.subr.bf16.mxu1 (!%p266_p3), %v1068_v1 }
   0xe   : > { %s1240_s24 = smov (!%p325_p4, %s877_s24), 15 }
   0xf   : > { %s920_s29 = sshll.u32 %s1240_s24, 3  ;;  %s881_s30 = sshll.u32 %s1240_s24, 2 }
  0x10   : > { %547 = vmatpush1.bf16.msra.mxu0 %v1022_v3  ;;  %985 = vmatpush1.bf16.msra.mxu1 %v1022_v3  ;;  %s1141_s9 = scalar_lea.vmem %s1229_s0, %s920_s29  ;;  %s357_s8 = scalar_lea.vmem %s1233_s4, %s881_s30 }
  0x11   : > { %548 = vmatprep.subr.bf16.mxu0 %v1068_v1  ;;  %974 = vmatprep.subr.bf16.mxu1 %v1068_v1  ;;  %v1034_v5 = vld [vmem:[%s1141_s9 + $0x4] ss:$8 sps:$4 sm:$0xff]   ;;  %v1032_v15 = vld [vmem:[%s1141_s9] ss:$8 sps:$4 sm:$0xff]   ;;  %v1038_v17 = vld [vmem:[%s1141_s9 + $0x14] ss:$8 sps:$4 sm:$0xff]   ;;  %s1214_s15 = scalar_lea.vmem %s1234_s5, %s881_s30 }
  0x12   : > { %v1037_v7 = vld [vmem:[%s1141_s9 + $0x24] ss:$8 sps:$4 sm:$0xff]   ;;  %904 = vmatprep.mubr.msk.bf16.mxu0 %vm529_vm0, %v1034_v5  ;;  %v1035_v16 = vld [vmem:[%s1141_s9 + $0x20] ss:$8 sps:$4 sm:$0xff]   ;;  %v1040_v18 = vld [vmem:[%s1141_s9 + $0x34] ss:$8 sps:$4 sm:$0xff]  }
  0x13   : > { %906 = vmatprep.mubr.msk.bf16.mxu1 %vm529_vm0, %v1037_v7  ;;  %v1042_v19 = vld [vmem:[%s1141_s9 + $0x10] ss:$8 sps:$4 sm:$0xff]   ;;  %v930_v22 = vld [vmem:[%s357_s8] sm:$0xff]   ;;  %v965_v47 = vld [vmem:[%s357_s8 + $0x8] sm:$0xff]  }
  0x14   : > { %549 = vmatpush1.bf16.msra.mxu0 %v1023_v4  ;;  %986 = vmatpush1.bf16.msra.mxu1 %v1023_v4  ;;  %v1043_v20 = vld [vmem:[%s1141_s9 + $0x30] ss:$8 sps:$4 sm:$0xff]   ;;  %v931_v28 = vunpack.c.l.bf16 %v930_v22  ;;  %v932_v34 = vunpack.c.h.bf16 %v930_v22  ;;  %v935_v52 = vunpack.c.l.bf16 %v965_v47  ;;  %v936_v62 = vunpack.c.h.bf16 %v965_v47 }
  0x15   : > { %550 = vmatprep.subr.bf16.mxu0 %v1068_v1  ;;  %975 = vmatprep.subr.bf16.mxu1 %v1068_v1  ;;  %v966_v23 = vld [vmem:[%s357_s8 + $0x10] sm:$0xff]   ;;  %v967_v48 = vld [vmem:[%s357_s8 + $0x18] sm:$0xff]  }
  0x16   : > { %v939_v30 = vunpack.c.l.bf16 %v966_v23  ;;  %v940_v36 = vunpack.c.h.bf16 %v966_v23  ;;  %v943_v54 = vunpack.c.l.bf16 %v967_v48  ;;  %v944_v0 = vunpack.c.h.bf16 %v967_v48 }
  0x18   : > { %551 = vmatpush1.bf16.msra.mxu0 %v1024_v6  ;;  %987 = vmatpush1.bf16.msra.mxu1 %v1024_v6 }
  0x19   : > { %552 = vmatprep.subr.bf16.mxu0 %v1068_v1  ;;  %976 = vmatprep.subr.bf16.mxu1 %v1068_v1 }
  0x1c   : > { %553 = vmatpush1.bf16.msra.mxu0 %v1025_v8  ;;  %988 = vmatpush1.bf16.msra.mxu1 %v1025_v8 }
  0x1d   : > { %554 = vmatprep.subr.bf16.mxu0 %v1068_v1  ;;  %977 = vmatprep.subr.bf16.mxu1 %v1068_v1 }
  0x20   : > { %555 = vmatpush1.bf16.msra.mxu0 %v1026_v9  ;;  %989 = vmatpush1.bf16.msra.mxu1 %v1026_v9 }
  0x21   : > { %556 = vmatprep.subr.bf16.mxu0 %v1068_v1  ;;  %978 = vmatprep.subr.bf16.mxu1 %v1068_v1 }
  0x24   : > { %557 = vmatpush1.bf16.msra.mxu0 %v1027_v10  ;;  %990 = vmatpush1.bf16.msra.mxu1 %v1027_v10 }
  0x25   : > { %558 = vmatprep.subr.bf16.mxu0 %v1068_v1  ;;  %979 = vmatprep.subr.bf16.mxu1 %v1068_v1 }
  0x28   : > { %559 = vmatpush1.bf16.msra.mxu0 %v1028_v11  ;;  %991 = vmatpush1.bf16.msra.mxu1 %v1028_v11 }
  0x29   : > { %560 = vmatprep.subr.bf16.mxu0 %v1068_v1  ;;  %980 = vmatprep.subr.bf16.mxu1 %v1068_v1 }
  0x2c   : > { %561 = vmatpush1.bf16.msra.mxu0 %v1029_v12  ;;  %992 = vmatpush1.bf16.msra.mxu1 %v1029_v12 }
  0x2d   : > { %562 = vmatprep.subr.bf16.mxu0 %v1068_v1  ;;  %981 = vmatprep.subr.bf16.mxu1 %v1068_v1 }
  0x30   : > { %563 = vmatpush1.bf16.msra.mxu0 %v1030_v13  ;;  %993 = vmatpush1.bf16.msra.mxu1 %v1030_v13 }
  0x31   : > { %564 = vmatprep.subr.bf16.mxu0 %v1068_v1  ;;  %982 = vmatprep.subr.bf16.mxu1 %v1068_v1 }
  0x34   : > { %565 = vmatpush1.bf16.msra.mxu0 %v1031_v14  ;;  %994 = vmatpush1.bf16.msra.mxu1 %v1031_v14 }
  0x37   : > { %575 = vmatmul.mubr.bf16.vlgmr.msra.gmra.mrb[0].mxu0 %v1032_v15  ;;  %591 = vmatmul.mubr.bf16.vlgmr.msra.gmra.mrb[0].mxu1 %v1035_v16 }
  0x38   : > { %905 = vmatprep.mubr.msk.bf16.mxu0 %vm529_vm0, %v1038_v17  ;;  %907 = vmatprep.mubr.msk.bf16.mxu1 %vm529_vm0, %v1040_v18 }
  0x3f   : > { %583 = vmatmul.mubr.bf16.gmra.mrb[4].mxu0 %v1042_v19  ;;  %599 = vmatmul.mubr.bf16.gmra.mrb[4].mxu1 %v1043_v20 }
 0x10a   : > { %v576_v24 = vpop.f32.mrb[0].mxu0  ;;  %v592_v26 = vpop.f32.mrb[0].mxu1 }
 0x10b   : > { %v641_v27 = vmul.f32 %v908_v21, %v576_v24  ;;  %v645_v29 = vmul.f32 %v908_v21, %v592_v26  ;;  %v578_v31 = vpop.f32.mrb[1].mxu0  ;;  %v594_v32 = vpop.f32.mrb[1].mxu1 }
 0x10c   : > { %v579_v33 = vpop.f32.mrb[2].mxu0  ;;  %v595_v35 = vpop.f32.mrb[2].mxu1 }
 0x10d   : > { %v656_v37 = vadd.f32 %v909_v25, %v641_v27  ;;  %v660_v38 = vadd.f32 %v909_v25, %v645_v29  ;;  %v642_v39 = vmul.f32 %v908_v21, %v579_v33  ;;  %v646_v40 = vmul.f32 %v908_v21, %v595_v35  ;;  %v581_v41 = vpop.f32.mrb[3].mxu0  ;;  %v597_v42 = vpop.f32.mrb[3].mxu1 }
 0x10f   : > { %v680_v43 = vadd.f32 %v931_v28, %v656_v37  ;;  %v684_v44 = vadd.f32 %v939_v30, %v660_v38  ;;  %v657_v45 = vadd.f32 %v909_v25, %v642_v39  ;;  %v661_v46 = vadd.f32 %v909_v25, %v646_v40 }
 0x111   : > { %v681_v49 = vadd.f32 %v932_v34, %v657_v45  ;;  %v685_v50 = vadd.f32 %v940_v36, %v661_v46 }
 0x112   : > { %v584_v51 = vpop.f32.mrb[4].mxu0  ;;  %v600_v53 = vpop.f32.mrb[4].mxu1 }
 0x113   : > { %v948_v55 = vpack.c.bf16 %v681_v49, %v680_v43  ;;  %v958_v56 = vpack.c.bf16 %v685_v50, %v684_v44  ;;  %v643_v57 = vmul.f32 %v908_v21, %v584_v51  ;;  %v647_v58 = vmul.f32 %v908_v21, %v600_v53  ;;  %v586_v59 = vpop.f32.mrb[5].mxu0  ;;  %v602_v60 = vpop.f32.mrb[5].mxu1 }
 0x114   : > { %v587_v61 = vpop.f32.mrb[6].mxu0  ;;  %v603_v63 = vpop.f32.mrb[6].mxu1 }
 0x115   : > { %949 = vst [vmem:[%s1214_s15] sm:$0xff] %v948_v55   ;;  %969 = vst [vmem:[%s1214_s15 + $0x10] sm:$0xff] %v958_v56   ;;  %v658_v1 = vadd.f32 %v909_v25, %v643_v57  ;;  %v662_v2 = vadd.f32 %v909_v25, %v647_v58  ;;  %v644_v3 = vmul.f32 %v908_v21, %v587_v61  ;;  %v589_v5 = vpop.f32.mrb[7].mxu0  ;;  %v605_v6 = vpop.f32.mrb[7].mxu1 }
 0x116   : > { %v648_v4 = vmul.f32 %v908_v21, %v603_v63 }
 0x117   : > { %v682_v7 = vadd.f32 %v935_v52, %v658_v1  ;;  %v686_v8 = vadd.f32 %v943_v54, %v662_v2  ;;  %v659_v9 = vadd.f32 %v909_v25, %v644_v3 }
 0x118   : > { %v663_v10 = vadd.f32 %v909_v25, %v648_v4 }
 0x119   : > { %v683_v11 = vadd.f32 %v936_v62, %v659_v9 }
 0x11a   : > { %v687_v12 = vadd.f32 %v944_v0, %v663_v10 }
 0x11b   : > { %v953_v13 = vpack.c.bf16 %v683_v11, %v682_v7 }
 0x11c   : > { %v963_v14 = vpack.c.bf16 %v687_v12, %v686_v8 }
 0x11d   : > { %968 = vst [vmem:[%s1214_s15 + $0x8] sm:$0xff] %v953_v13  }
 0x11e   : > { %970 = vst [vmem:[%s1214_s15 + $0x18] sm:$0xff] %v963_v14  }
 0x11f PF: > { %s15_s20 = sadd.s32 1, %s1066_s20   ;;  %s1235_s18 = smov %s1062_s19 }
 0x120   : > { %p12_p5 = scmp.ge.s32.totalorder %s15_s20, 4   ;;  %s1236_s19 = smov %s1238_s21 }
 0x122   :  { %14 = sbr.rel (!%p12_p5) target bundleno = 2 (0x2), region = 90 }

// kernel: efficientnet_encoder_forward.16
= control target key start
LH: loop header
LB: loop body
LE: loop exit
PB: predicated region body
PF: predicated region fallthrough
CT: control target
= control target key end

     0   :  { %s1794_s15 = smov 0   ;;  %s1796_s16 = smov 0   ;;  %s2130_s0 = inlined_call_operand.vmem [shape: bf16[128,1152], index: 0, kind: input, shape index: {}]   ;;  %s2131_s1 = inlined_call_operand.vmem [shape: bf16[1152,192], index: 1, kind: input, shape index: {}]   ;;  %s2132_s2 = inlined_call_operand.vmem [shape: f32[1,192], index: 2, kind: input, shape index: {}]   ;;  %s2133_s3 = inlined_call_operand.vmem [shape: f32[1,192], index: 3, kind: input, shape index: {}]   ;;  %s2134_s4 = inlined_call_operand.vmem [shape: bf16[128,192], index: 4, kind: output, shape index: {}]  }
   0x1   :  { %s1798_s17 = smov 0   ;;  %s1800_s18 = smov 0  }
   0x2   :  { %s1802_s19 = smov 0   ;;  %s1804_s20 = smov 0  }
   0x3   :  { %s1806_s21 = smov 0  }
   0x4 LB: > { %s26_s22 = sadd.s32 1, %s1757_s19  ;;  %s33_s23 = sadd.s32 1, %s1761_s20  ;;  %s1765_s21 = sphi %s1806_s21, %s14_s21   ;;  %s1761_s20 = sphi %s1804_s20, %s2142_s20   ;;  %s1757_s19 = sphi %s1802_s19, %s2141_s19   ;;  %s1753_s18 = sphi %s1800_s18, %s2140_s18   ;;  %s1749_s17 = sphi %s1798_s17, %s2139_s17   ;;  %s1745_s16 = sphi %s1796_s16, %s2138_s16   ;;  %s1741_s15 = sphi %s1794_s15, %s2137_s15  }
   0x5   : > { %p27_p0 = scmp.ge.s32.totalorder %s26_s22, 3  ;;  %p49_p1 = scmp.ne.s32.totalorder %s1745_s16, %s1741_s15 }
   0x6   : > { %p50_p2 = scmp.eq.s32.totalorder %s1765_s21, 0  ;;  %s42_s27 = sadd.s32 1, %s1745_s16 }
   0x7   : > { %s2144_s22 = smov (%p27_p0, %s26_s22), 0  ;;  %s2146_s23 = smov (!%p27_p0, %s33_s23), %s1761_s20 }
   0x8   : > { %p51_p3 = por %p50_p2, %p49_p1  ;;  %p35_p4 = scmp.ge.s32.totalorder %s2146_s23, 2 }
   0x9   : > { %s38_s24 = ssub.s32 %s1757_s19, %s2144_s22  ;;  %p1358_p6 = scmp.ge.s32.totalorder %s1765_s21, 6 }
   0xa   : > { %s2148_s23 = smov (%p35_p4, %s2146_s23), 0 }
   0xb   : > { %s37_s25 = ssub.s32 %s1761_s20, %s2148_s23  ;;  %199 = sbr.rel (%p1358_p6) target bundleno = 36 (0x24), region = 24 }
   0xc   : > { %s39_s26 = sor.u32 %s38_s24, %s37_s25 }
   0xd   : > { %p40_p5 = scmp.eq.s32.totalorder %s39_s26, 0 }
   0xf   : > { %s1845_s28 = scalar_select %p40_p5, %s1745_s16, %s42_s27  }
  0x12   : > { %202 = sbr.rel (!%p51_p3) target bundleno = 36 (0x24), region = 28  ;;  %s204_s29 = sand.u32 (%p51_p3), 1, %s1745_s16  }
  0x13   : > { %s208_s30 = smul.u32 (%p51_p3), 3, %s1757_s19 }
  0x14   : > { %s1498_s5 = smul.u32 (%p51_p3), 96, %s204_s29 }
  0x15   : > { %s1499_s6 = smul.u32 (%p51_p3), 72, %s1761_s20 }
  0x16   : > { %s206_s12 = scalar_lea.vmem (%p51_p3), [#allocation3], %s1498_s5 }
  0x17   : > { %s210_s7 = sadd.s32 (%p51_p3), %s1499_s6, %s208_s30 }
  0x18   : > { %s1361_s8 = sshll.u32 (%p51_p3), %s210_s7, 2 }
  0x19   : > { %s1854_s11 = scalar_lea.vmem %s2130_s0, %s1361_s8 }
  0x1a   : > { %v227_v0 = vld [vmem:[%s1854_s11] sm:$0xff]  ;;  %v231_v2 = vld [vmem:[%s1854_s11 + $0x48] sm:$0xff]  ;;  %v235_v4 = vld [vmem:[%s1854_s11 + $0x90] sm:$0xff] }
  0x1b   : > { %v229_v1 = vld [vmem:[%s1854_s11 + $0x24] sm:$0xff]  ;;  %228 = vst [vmem:[%s206_s12] sm:$0xff] %v227_v0  ;;  %232 = vst [vmem:[%s206_s12 + $0x18] sm:$0xff] %v231_v2  ;;  %v233_v3 = vld [vmem:[%s1854_s11 + $0x6c] sm:$0xff] }
  0x1c   : > { %230 = vst [vmem:[%s206_s12 + $0xc] sm:$0xff] %v229_v1  ;;  %v237_v5 = vld [vmem:[%s1854_s11 + $0xb4] sm:$0xff]  ;;  %234 = vst [vmem:[%s206_s12 + $0x24] sm:$0xff] %v233_v3  ;;  %v241_v7 = vld [vmem:[%s1854_s11 + $0xfc] sm:$0xff] }
  0x1d   : > { %236 = vst [vmem:[%s206_s12 + $0x30] sm:$0xff] %v235_v4  ;;  %238 = vst [vmem:[%s206_s12 + $0x3c] sm:$0xff] %v237_v5  ;;  %v239_v6 = vld [vmem:[%s1854_s11 + $0xd8] sm:$0xff]  ;;  %v1362_v8 = vld [vmem:[%s1854_s11 + $0x8] sm:$0xf] }
  0x1e   : > { %240 = vst [vmem:[%s206_s12 + $0x48] sm:$0xff] %v239_v6  ;;  %242 = vst [vmem:[%s206_s12 + $0x54] sm:$0xff] %v241_v7  ;;  %v1364_v9 = vld [vmem:[%s1854_s11 + $0x2c] sm:$0xf]  ;;  %v1366_v10 = vld [vmem:[%s1854_s11 + $0x50] sm:$0xf] }
  0x1f   : > { %1363 = vst [vmem:[%s206_s12 + $0x8] sm:$0xf] %v1362_v8  ;;  %v1368_v11 = vld [vmem:[%s1854_s11 + $0x74] sm:$0xf]  ;;  %1365 = vst [vmem:[%s206_s12 + $0x14] sm:$0xf] %v1364_v9 }
  0x20   : > { %1367 = vst [vmem:[%s206_s12 + $0x20] sm:$0xf] %v1366_v10  ;;  %1369 = vst [vmem:[%s206_s12 + $0x2c] sm:$0xf] %v1368_v11  ;;  %v1370_v12 = vld [vmem:[%s1854_s11 + $0x98] sm:$0xf] }
  0x21   : > { %v1372_v13 = vld [vmem:[%s1854_s11 + $0xbc] sm:$0xf]  ;;  %v1374_v14 = vld [vmem:[%s1854_s11 + $0xe0] sm:$0xf]  ;;  %1371 = vst [vmem:[%s206_s12 + $0x38] sm:$0xf] %v1370_v12 }
  0x22   : > { %1373 = vst [vmem:[%s206_s12 + $0x44] sm:$0xf] %v1372_v13  ;;  %1375 = vst [vmem:[%s206_s12 + $0x50] sm:$0xf] %v1374_v14  ;;  %v1376_v15 = vld [vmem:[%s1854_s11 + $0x104] sm:$0xf] }
  0x23   : > { %1377 = vst [vmem:[%s206_s12 + $0x5c] sm:$0xf] %v1376_v15 }
  0x24 PF: > { %p1378_p7 = scmp.ge.s32.totalorder %s1765_s21, 1  ;;  %p285_p8 = scmp.lt.s32.totalorder %s1765_s21, 7 }
  0x26   : > { %p286_p9 = pnand %p1378_p7, %p285_p8 }
  0x27   : > { %s292_s13 = sand.u32 (!%p286_p9), 1, %s1741_s15   ;;  %s342_s14 = smul.u32 (!%p286_p9), 48, %s1749_s17 }
  0x28   : > { %289 = sbr.rel (%p286_p9) target bundleno = 423 (0x1a7), region = 58  ;;  %s1381_s25 = sshll.u32 (!%p286_p9), %s1753_s18, 3 }
  0x29   : > { %s1500_s24 = smul.u32 (!%p286_p9), 96, %s292_s13  ;;  %p344_p10 = scmp.lt.s32.totalorder (!%p286_p9), %s342_s14, 143 }
  0x2a   : > { %p366_p11 = scmp.lt.s32.totalorder (!%p286_p9), %s1381_s25, 15  ;;  %p1384_p12 = scmp.ne.s32.totalorder (!%p286_p9), %s1749_s17, 0 }
  0x2b   : > { %s1887_s15 = scalar_lea.vmem (!%p286_p9), [#allocation3], %s1500_s24 }
  0x2f   : > { %s2150_s14 = smov (!%p344_p10, %s342_s14), 143  ;;  %s2152_s25 = smov (!%p366_p11, %s1381_s25), 15 }
  0x30   : > { %s1472_s26 = sshll.u32 %s2150_s14, 3  ;;  %s1473_s5 = sshll.u32 %s2152_s25, 3  ;;  %vm382_vm0 = vcmask (!%p1384_p12), 523264   ;;  %v1767_v16 = vmov (!%p1384_p12), 0.0  }
  0x31   : > { %s1880_s30 = scalar_lea.vmem %s2131_s1, %s1472_s26  ;;  %s1885_s8 = scalar_lea.vmem %s2134_s4, %s1473_s5  ;;  %381 = vst [vmem:[#allocation2] sm:$0xff] (!%p1384_p12), %v1767_v16  ;;  %384 = vst [vmem:[#allocation2 + $0x10] sm:$0xff] (!%p1384_p12), %v1767_v16 }
  0x32   : > { %380 = sbr.rel (%p1384_p12) target bundleno = 57 (0x39), region = 66  ;;  %386 = vst [vmem:[#allocation2 + $0x20] sm:$0xff] (!%p1384_p12), %v1767_v16  ;;  %388 = vst [vmem:[#allocation2 + $0x30] sm:$0xff] (!%p1384_p12), %v1767_v16 }
  0x33   : > { %390 = vst [vmem:[#allocation2 + $0x40] sm:$0xff] (!%p1384_p12), %v1767_v16  ;;  %392 = vst [vmem:[#allocation2 + $0x50] sm:$0xff] (!%p1384_p12), %v1767_v16 }
  0x34   : > { %394 = vst [vmem:[#allocation2 + $0x60] sm:$0xff] (!%p1384_p12), %v1767_v16  ;;  %396 = vst [vmem:[#allocation2 + $0x70] sm:$0xff] (!%p1384_p12), %v1767_v16 }
  0x35   : > { %383 = vst.msk [vmem:[#allocation2 + $0x8] sm:$0xff] (!%p1384_p12), %vm382_vm0, %v1767_v16  ;;  %385 = vst.msk [vmem:[#allocation2 + $0x18] sm:$0xff] (!%p1384_p12), %vm382_vm0, %v1767_v16 }
  0x36   : > { %387 = vst.msk [vmem:[#allocation2 + $0x28] sm:$0xff] (!%p1384_p12), %vm382_vm0, %v1767_v16  ;;  %389 = vst.msk [vmem:[#allocation2 + $0x38] sm:$0xff] (!%p1384_p12), %vm382_vm0, %v1767_v16 }
  0x37   : > { %391 = vst.msk [vmem:[#allocation2 + $0x48] sm:$0xff] (!%p1384_p12), %vm382_vm0, %v1767_v16  ;;  %393 = vst.msk [vmem:[#allocation2 + $0x58] sm:$0xff] (!%p1384_p12), %vm382_vm0, %v1767_v16 }
  0x38   : > { %395 = vst.msk [vmem:[#allocation2 + $0x68] sm:$0xff] (!%p1384_p12), %vm382_vm0, %v1767_v16  ;;  %397 = vst.msk [vmem:[#allocation2 + $0x78] sm:$0xff] (!%p1384_p12), %vm382_vm0, %v1767_v16 }
  0x39 PF: > { %v1559_v17 = vld [vmem:[%s1880_s30 + $0x4] ss:$8 sps:$4 sm:$0xff]   ;;  %v1561_v18 = vld [vmem:[%s1880_s30] ss:$8 sps:$4 sm:$0xff]   ;;  %v1768_v19 = vmov 0   ;;  %vm945_vm1 = vcmask 523264  }
  0x3a   : > { %887 = vmatprep.mubr.bf16.mxu0 %v1768_v19  ;;  %782 = vmatprep.subr.bf16.mxu1 %v1559_v17  ;;  %v1562_v20 = vld [vmem:[%s1880_s30 + $0x14] ss:$8 sps:$4 sm:$0xff]   ;;  %v1564_v21 = vld [vmem:[%s1880_s30 + $0x10] ss:$8 sps:$4 sm:$0xff]   ;;  %v1565_v22 = vld [vmem:[%s1880_s30 + $0x24] ss:$8 sps:$4 sm:$0xff]  }
  0x3b   : > { %783 = vmatpush1.bf16.msra.mxu1 %v1561_v18  ;;  %v1567_v23 = vld [vmem:[%s1880_s30 + $0x20] ss:$8 sps:$4 sm:$0xff]   ;;  %v1568_v24 = vld [vmem:[%s1880_s30 + $0x34] ss:$8 sps:$4 sm:$0xff]   ;;  %v1570_v25 = vld [vmem:[%s1880_s30 + $0x30] ss:$8 sps:$4 sm:$0xff]  }
  0x3c   : > { %784 = vmatprep.subr.bf16.mxu1 %v1562_v20  ;;  %v1583_v26 = vld [vmem:[%s1880_s30 + $0x104] ss:$8 sps:$4 sm:$0xff]   ;;  %v1585_v27 = vld [vmem:[%s1880_s30 + $0x100] ss:$8 sps:$4 sm:$0xff]   ;;  %v1589_v29 = vld [vmem:[%s1880_s30 + $0x114] ss:$8 sps:$4 sm:$0xff]  }
  0x3d   : > { %v1571_v28 = vld [vmem:[%s1880_s30 + $0x44] ss:$8 sps:$4 sm:$0xff]   ;;  %855 = vmatprep.subr.bf16.mxu0 %v1583_v26  ;;  %v1591_v30 = vld [vmem:[%s1880_s30 + $0x110] ss:$8 sps:$4 sm:$0xff]   ;;  %v1573_v31 = vld [vmem:[%s1880_s30 + $0x40] ss:$8 sps:$4 sm:$0xff]  }
  0x3e   : > { %856 = vmatpush1.bf16.msra.mxu0 %v1585_v27  ;;  %v1574_v32 = vld [vmem:[%s1880_s30 + $0x54] ss:$8 sps:$4 sm:$0xff]   ;;  %v1595_v33 = vld [vmem:[%s1880_s30 + $0x124] ss:$8 sps:$4 sm:$0xff]   ;;  %v1597_v34 = vld [vmem:[%s1880_s30 + $0x120] ss:$8 sps:$4 sm:$0xff]  }
  0x3f   : > { %785 = vmatpush1.bf16.msra.mxu1 %v1564_v21  ;;  %857 = vmatprep.subr.bf16.mxu0 %v1589_v29  ;;  %v1576_v35 = vld [vmem:[%s1880_s30 + $0x50] ss:$8 sps:$4 sm:$0xff]   ;;  %v1601_v36 = vld [vmem:[%s1880_s30 + $0x134] ss:$8 sps:$4 sm:$0xff]   ;;  %v1577_v37 = vld [vmem:[%s1880_s30 + $0x64] ss:$8 sps:$4 sm:$0xff]  }
  0x40   : > { %786 = vmatprep.subr.bf16.mxu1 %v1565_v22  ;;  %v1603_v38 = vld [vmem:[%s1880_s30 + $0x130] ss:$8 sps:$4 sm:$0xff]   ;;  %v1579_v39 = vld [vmem:[%s1880_s30 + $0x60] ss:$8 sps:$4 sm:$0xff]   ;;  %v1607_v40 = vld [vmem:[%s1880_s30 + $0x144] ss:$8 sps:$4 sm:$0xff]  }
  0x41   : > { %v1580_v41 = vld [vmem:[%s1880_s30 + $0x74] ss:$8 sps:$4 sm:$0xff]   ;;  %v1609_v42 = vld [vmem:[%s1880_s30 + $0x140] ss:$8 sps:$4 sm:$0xff]   ;;  %v1582_v43 = vld [vmem:[%s1880_s30 + $0x70] ss:$8 sps:$4 sm:$0xff]  }
  0x42   : > { %858 = vmatpush1.bf16.msra.mxu0 %v1591_v30  ;;  %v1613_v44 = vld [vmem:[%s1880_s30 + $0x154] ss:$8 sps:$4 sm:$0xff]   ;;  %v1586_v45 = vld [vmem:[%s1880_s30 + $0x84] ss:$8 sps:$4 sm:$0xff]   ;;  %v1615_v46 = vld [vmem:[%s1880_s30 + $0x150] ss:$8 sps:$4 sm:$0xff]  }
  0x43   : > { %787 = vmatpush1.bf16.msra.mxu1 %v1567_v23  ;;  %859 = vmatprep.subr.bf16.mxu0 %v1595_v33  ;;  %v1588_v47 = vld [vmem:[%s1880_s30 + $0x80] ss:$8 sps:$4 sm:$0xff]   ;;  %v1619_v48 = vld [vmem:[%s1880_s30 + $0x164] ss:$8 sps:$4 sm:$0xff]   ;;  %v1592_v49 = vld [vmem:[%s1880_s30 + $0x94] ss:$8 sps:$4 sm:$0xff]  }
  0x44   : > { %788 = vmatprep.subr.bf16.mxu1 %v1568_v24  ;;  %v1594_v50 = vld [vmem:[%s1880_s30 + $0x90] ss:$8 sps:$4 sm:$0xff]   ;;  %v1621_v51 = vld [vmem:[%s1880_s30 + $0x160] ss:$8 sps:$4 sm:$0xff]   ;;  %v1625_v53 = vld [vmem:[%s1880_s30 + $0x174] ss:$8 sps:$4 sm:$0xff]  }
  0x45   : > { %v1634_v52 = vld [vmem:[%s1887_s15 + $0x4] ss:$12 sps:$4 sm:$0xff]   ;;  %v1600_v56 = vld [vmem:[%s1880_s30 + $0xa0] ss:$8 sps:$4 sm:$0xff]   ;;  %v1604_v57 = vld [vmem:[%s1880_s30 + $0xb4] ss:$8 sps:$4 sm:$0xff]  }
  0x46   : > { %860 = vmatpush1.bf16.msra.mxu0 %v1597_v34  ;;  %v1598_v54 = vld [vmem:[%s1880_s30 + $0xa4] ss:$8 sps:$4 sm:$0xff]   ;;  %814 = vmatprep.mubr.bf16.mxu1 %v1634_v52  ;;  %v1627_v55 = vld [vmem:[%s1880_s30 + $0x170] ss:$8 sps:$4 sm:$0xff]   ;;  %v1631_v58 = vld [vmem:[%s1887_s15 + $0x8] ss:$12 sps:$4 sm:$0xff]  }
  0x47   : > { %789 = vmatpush1.bf16.msra.mxu1 %v1570_v25  ;;  %861 = vmatprep.subr.bf16.mxu0 %v1601_v36  ;;  %v1606_v59 = vld [vmem:[%s1880_s30 + $0xb0] ss:$8 sps:$4 sm:$0xff]   ;;  %v1610_v60 = vld [vmem:[%s1880_s30 + $0xc4] ss:$8 sps:$4 sm:$0xff]   ;;  %v1612_v61 = vld [vmem:[%s1880_s30 + $0xc0] ss:$8 sps:$4 sm:$0xff]  }
  0x48   : > { %790 = vmatprep.subr.bf16.mxu1 %v1571_v28  ;;  %v1616_v62 = vld [vmem:[%s1880_s30 + $0xd4] ss:$8 sps:$4 sm:$0xff]   ;;  %v1635_v63 = vld [vmem:[%s1887_s15 + $0x20] ss:$12 sps:$4 sm:$0xff]   ;;  %v1618_v0 = vld [vmem:[%s1880_s30 + $0xd0] ss:$8 sps:$4 sm:$0xff]  }
  0x49   : > { %v1622_v1 = vld [vmem:[%s1880_s30 + $0xe4] ss:$8 sps:$4 sm:$0xff]   ;;  %v1624_v2 = vld [vmem:[%s1880_s30 + $0xe0] ss:$8 sps:$4 sm:$0xff]   ;;  %v1628_v3 = vld [vmem:[%s1880_s30 + $0xf4] ss:$8 sps:$4 sm:$0xff]  }
  0x4a   : > { %862 = vmatpush1.bf16.msra.mxu0 %v1603_v38  ;;  %v1639_v4 = vld [vmem:[%s1887_s15 + $0x38] ss:$12 sps:$4 sm:$0xff]   ;;  %v1632_v6 = vld [vmem:[%s1887_s15] ss:$12 sps:$4 sm:$0xff]   ;;  %v1636_v7 = vld [vmem:[%s1887_s15 + $0x1c] ss:$12 sps:$4 sm:$0xff]  }
  0x4b   : > { %791 = vmatpush1.bf16.msra.mxu1 %v1573_v31  ;;  %863 = vmatprep.subr.bf16.mxu0 %v1607_v40  ;;  %v1630_v5 = vld [vmem:[%s1880_s30 + $0xf0] ss:$8 sps:$4 sm:$0xff]   ;;  %v1640_v10 = vld [vmem:[%s1887_s15 + $0x34] ss:$12 sps:$4 sm:$0xff]   ;;  %v415_v29 = vld [vmem:[#allocation2 + $0x8] sm:$0xff]  ;;  %p1445_p13 = scmp.ne.s32.totalorder %s1749_s17, 2 }
  0x4c   : > { %792 = vmatprep.subr.bf16.mxu1 %v1574_v32  ;;  %v1643_v8 = vld [vmem:[%s1887_s15 + $0x50] ss:$12 sps:$4 sm:$0xff]   ;;  %v1638_v9 = vld [vmem:[%s1887_s15 + $0x18] ss:$12 sps:$4 sm:$0xff]   ;;  %v1646_v13 = vld [vmem:[%s1887_s15 + $0x48] ss:$12 sps:$4 sm:$0xff]  }
  0x4d   : > { %v1642_v11 = vld [vmem:[%s1887_s15 + $0x30] ss:$12 sps:$4 sm:$0xff]   ;;  %v1644_v12 = vld [vmem:[%s1887_s15 + $0x4c] ss:$12 sps:$4 sm:$0xff]   ;;  %v414_v26 = vld [vmem:[#allocation2] sm:$0xff]  ;;  %vm1197_vm2 = vcmask (!%p1445_p13), 1043456  }
  0x4e   : > { %864 = vmatpush1.bf16.msra.mxu0 %v1609_v42  ;;  %v416_v32 = vld [vmem:[#allocation2 + $0x10] sm:$0xff]  ;;  %v417_v36 = vld [vmem:[#allocation2 + $0x18] sm:$0xff]  ;;  %vm1198_vm3 = vcmask (!%p1445_p13), 523268  }
  0x4f   : > { %793 = vmatpush1.bf16.msra.mxu1 %v1576_v35  ;;  %865 = vmatprep.subr.bf16.mxu0 %v1613_v44  ;;  %v420_v52 = vld [vmem:[#allocation2 + $0x30] sm:$0xff]  ;;  %vm2067_vm4 = vmor (!%p1445_p13), %vm1198_vm3, %vm1197_vm2 }
  0x50   : > { %794 = vmatprep.subr.bf16.mxu1 %v1577_v37 }
  0x52   : > { %866 = vmatpush1.bf16.msra.mxu0 %v1615_v46  ;;  %v418_v46 = vld [vmem:[#allocation2 + $0x20] sm:$0xff] }
  0x53   : > { %795 = vmatpush1.bf16.msra.mxu1 %v1579_v39  ;;  %867 = vmatprep.subr.bf16.mxu0 %v1619_v48 }
  0x54   : > { %796 = vmatprep.subr.bf16.mxu1 %v1580_v41 }
  0x56   : > { %868 = vmatpush1.bf16.msra.mxu0 %v1621_v51 }
  0x57   : > { %797 = vmatpush1.bf16.msra.mxu1 %v1582_v43  ;;  %869 = vmatprep.subr.bf16.mxu0 %v1625_v53 }
  0x58   : > { %798 = vmatprep.subr.bf16.mxu1 %v1586_v45 }
  0x5a   : > { %870 = vmatpush1.bf16.msra.mxu0 %v1627_v55 }
  0x5b   : > { %799 = vmatpush1.bf16.msra.mxu1 %v1588_v47 }
  0x5c   : > { %800 = vmatprep.subr.bf16.mxu1 %v1592_v49  ;;  %v419_v49 = vld [vmem:[#allocation2 + $0x28] sm:$0xff] }
  0x5d   : > { %888 = vmatmul.mubr.bf16.vlgmr.msra.gmra.mrb[0].mxu0 %v1631_v58 }
  0x5e   : > { %897 = vmatprep.mubr.bf16.mxu0 %v1768_v19 }
  0x5f   : > { %801 = vmatpush1.bf16.msra.mxu1 %v1594_v50 }
  0x60   : > { %802 = vmatprep.subr.bf16.mxu1 %v1598_v54 }
  0x63   : > { %803 = vmatpush1.bf16.msra.mxu1 %v1600_v56  ;;  %v421_v56 = vld [vmem:[#allocation2 + $0x38] sm:$0xff] }
  0x64   : > { %804 = vmatprep.subr.bf16.mxu1 %v1604_v57 }
  0x65   : > { %898 = vmatmul.mubr.bf16.gmra.mrb[4].mxu0 %v1635_v63 }
  0x66   : > { %907 = vmatprep.mubr.bf16.mxu0 %v1768_v19 }
  0x67   : > { %805 = vmatpush1.bf16.msra.mxu1 %v1606_v59 }
  0x68   : > { %806 = vmatprep.subr.bf16.mxu1 %v1610_v60 }
  0x6b   : > { %807 = vmatpush1.bf16.msra.mxu1 %v1612_v61 }
  0x6c   : > { %808 = vmatprep.subr.bf16.mxu1 %v1616_v62  ;;  %v422_v62 = vld [vmem:[#allocation2 + $0x40] sm:$0xff] }
  0x6d   : > { %908 = vmatmul.mubr.bf16.gmra.mrb[8].mxu0 %v1639_v4  ;;  %v424_v4 = vld [vmem:[#allocation2 + $0x50] sm:$0xff] }
  0x6e   : > { %917 = vmatprep.mubr.bf16.mxu0 %v1768_v19 }
  0x6f   : > { %809 = vmatpush1.bf16.msra.mxu1 %v1618_v0 }
  0x70   : > { %810 = vmatprep.subr.bf16.mxu1 %v1622_v1  ;;  %v423_v1 = vld [vmem:[#allocation2 + $0x48] sm:$0xff] }
  0x73   : > { %811 = vmatpush1.bf16.msra.mxu1 %v1624_v2 }
  0x74   : > { %812 = vmatprep.subr.bf16.mxu1 %v1628_v3 }
  0x75   : > { %918 = vmatmul.mubr.bf16.gmra.mrb[12].mxu0 %v1643_v8  ;;  %v425_v8 = vld [vmem:[#allocation2 + $0x58] sm:$0xff] }
  0x77   : > { %813 = vmatpush1.bf16.msra.mxu1 %v1630_v5 }
  0x7a   : > { %815 = vmatmul.mubr.bf16.vlgmr.msra.gmra.mrb[0].mxu1 %v1632_v6 }
  0x7b   : > { %824 = vmatprep.mubr.bf16.mxu1 %v1636_v7 }
  0x82   : > { %825 = vmatmul.mubr.bf16.gmra.mrb[4].mxu1 %v1638_v9 }
  0x83   : > { %834 = vmatprep.mubr.bf16.mxu1 %v1640_v10 }
  0x8a   : > { %835 = vmatmul.mubr.bf16.gmra.mrb[8].mxu1 %v1642_v11 }
  0x8b   : > { %844 = vmatprep.mubr.bf16.mxu1 %v1644_v12 }
  0x92   : > { %845 = vmatmul.mubr.bf16.gmra.mrb[12].mxu1 %v1646_v13 }
 0x130   : > { %v889_v14 = vpop.f32.mrb[0].mxu0 }
 0x131   : > { %v891_v15 = vpop.f32.mrb[1].mxu0 }
 0x132   : > { %v893_v16 = vpop.f32.mrb[2].mxu0 }
 0x133   : > { %v895_v17 = vpop.f32.mrb[3].mxu0 }
 0x138   : > { %v899_v18 = vpop.f32.mrb[4].mxu0 }
 0x139   : > { %v901_v19 = vpop.f32.mrb[5].mxu0 }
 0x13a   : > { %v903_v20 = vpop.f32.mrb[6].mxu0 }
 0x13b   : > { %v905_v21 = vpop.f32.mrb[7].mxu0 }
 0x140   : > { %v909_v22 = vpop.f32.mrb[8].mxu0 }
 0x141   : > { %v911_v23 = vpop.f32.mrb[9].mxu0 }
 0x142   : > { %v913_v24 = vpop.f32.mrb[10].mxu0 }
 0x143   : > { %v915_v25 = vpop.f32.mrb[11].mxu0 }
 0x148   : > { %v919_v38 = vpop.f32.mrb[12].mxu0 }
 0x149   : > { %v921_v41 = vpop.f32.mrb[13].mxu0 }
 0x14a   : > { %v923_v43 = vpop.f32.mrb[14].mxu0 }
 0x14b   : > { %v925_v45 = vpop.f32.mrb[15].mxu0 }
 0x14d   : > { %v816_v27 = vpop.f32.mrb[0].mxu1 }
 0x14e   : > { %v890_v28 = vadd.f32 %v889_v14, %v816_v27  ;;  %v818_v30 = vpop.f32.mrb[1].mxu1  ;;  %v426_v14 = vld [vmem:[#allocation2 + $0x60] sm:$0xff] }
 0x14f   : > { %v892_v31 = vadd.f32 %v891_v15, %v818_v30  ;;  %v820_v33 = vpop.f32.mrb[2].mxu1  ;;  %v983_v30 = vlaneseq (!%p1445_p13) }
 0x150   : > { %v928_v34 = vadd.f32 %v890_v28, %v414_v26  ;;  %v894_v35 = vadd.f32 %v893_v16, %v820_v33  ;;  %v822_v37 = vpop.f32.mrb[3].mxu1  ;;  %v1009_v33 = vld [vmem:[%s2133_s3] sm:$0x3] (!%p1445_p13) }
 0x151   : > { %v929_v39 = vadd.f32 %v892_v31, %v415_v29  ;;  %v896_v40 = vadd.f32 %v895_v17, %v822_v37  ;;  %v427_v17 = vld [vmem:[#allocation2 + $0x68] sm:$0xff]  ;;  %v984_v31 = vshrl.u32 (!%p1445_p13), %v983_v30, 7 }
 0x152   : > { %944 = vst [vmem:[#allocation2] sm:$0xff] %v928_v34  ;;  %v930_v42 = vadd.f32 %v894_v35, %v416_v32  ;;  %v981_v32 = vld [vmem:[%s2132_s2] sm:$0x3] (!%p1445_p13) }
 0x153   : > { %946 = vst.msk [vmem:[#allocation2 + $0x8] sm:$0xff] %vm945_vm1, %v929_v39  ;;  %v931_v44 = vadd.f32 %v896_v40, %v417_v36  ;;  %v985_v36 = vsub.s32 (!%p1445_p13), 0, %v984_v31  ;;  %v989_v37 = vsub.s32 (!%p1445_p13), 1, %v984_v31 }
 0x154   : > { %947 = vst [vmem:[#allocation2 + $0x10] sm:$0xff] %v930_v42 }
 0x155   : > { %948 = vst.msk [vmem:[#allocation2 + $0x18] sm:$0xff] %vm945_vm1, %v931_v44  ;;  %v826_v47 = vpop.f32.mrb[4].mxu1  ;;  %v1979_v42 = vrot.slane (!%p1445_p13), %v981_v32, %v989_v37  ;;  %v1983_v44 = vrot.slane (!%p1445_p13), %v1009_v33, %v989_v37 }
 0x156   : > { %v900_v48 = vadd.f32 %v899_v18, %v826_v47  ;;  %v828_v50 = vpop.f32.mrb[5].mxu1 }
 0x157   : > { %v902_v51 = vadd.f32 %v901_v19, %v828_v50  ;;  %v830_v53 = vpop.f32.mrb[6].mxu1 }
 0x158   : > { %v932_v54 = vadd.f32 %v900_v48, %v418_v46  ;;  %v904_v55 = vadd.f32 %v903_v20, %v830_v53  ;;  %v832_v57 = vpop.f32.mrb[7].mxu1  ;;  %v428_v20 = vld [vmem:[#allocation2 + $0x70] sm:$0xff] }
 0x159   : > { %v933_v58 = vadd.f32 %v902_v51, %v419_v49  ;;  %v906_v59 = vadd.f32 %v905_v21, %v832_v57  ;;  %v965_v34 = vld [vmem:[#allocation2] sm:$0xff] (!%p1445_p13) }
 0x15a   : > { %949 = vst [vmem:[#allocation2 + $0x20] sm:$0xff] %v932_v54  ;;  %v934_v60 = vadd.f32 %v904_v55, %v420_v52  ;;  %v966_v35 = vld [vmem:[#allocation2 + $0x8] sm:$0xff] (!%p1445_p13) }
 0x15b   : > { %950 = vst.msk [vmem:[#allocation2 + $0x28] sm:$0xff] %vm945_vm1, %v933_v58  ;;  %v935_v61 = vadd.f32 %v906_v59, %v421_v56  ;;  %v994_v49 = vmul.f32 (!%p1445_p13), %v1979_v42, %v966_v35 }
 0x15c   : > { %951 = vst [vmem:[#allocation2 + $0x30] sm:$0xff] %v934_v60  ;;  %v968_v39 = vld [vmem:[#allocation2 + $0x18] sm:$0xff] (!%p1445_p13) }
 0x15d   : > { %952 = vst.msk [vmem:[#allocation2 + $0x38] sm:$0xff] %vm945_vm1, %v935_v61  ;;  %v836_v63 = vpop.f32.mrb[8].mxu1  ;;  %v996_v51 = vmul.f32 (!%p1445_p13), %v1979_v42, %v968_v39  ;;  %v1997_v58 = vadd.f32 (!%p1445_p13), %v1983_v44, %v994_v49 }
 0x15e   : > { %v910_v0 = vadd.f32 %v909_v22, %v836_v63  ;;  %v838_v2 = vpop.f32.mrb[9].mxu1 }
 0x15f   : > { %v912_v3 = vadd.f32 %v911_v23, %v838_v2  ;;  %v840_v5 = vpop.f32.mrb[10].mxu1  ;;  %v2003_v60 = vadd.f32 (!%p1445_p13), %v1983_v44, %v996_v51 }
 0x160   : > { %v936_v6 = vadd.f32 %v910_v0, %v422_v62  ;;  %v914_v7 = vadd.f32 %v913_v24, %v840_v5  ;;  %v842_v9 = vpop.f32.mrb[11].mxu1  ;;  %v429_v24 = vld [vmem:[#allocation2 + $0x78] sm:$0xff] }
 0x161   : > { %v937_v10 = vadd.f32 %v912_v3, %v423_v1  ;;  %v916_v11 = vadd.f32 %v915_v25, %v842_v9  ;;  %v969_v40 = vld [vmem:[#allocation2 + $0x20] sm:$0xff] (!%p1445_p13) }
 0x162   : > { %953 = vst [vmem:[#allocation2 + $0x40] sm:$0xff] %v936_v6  ;;  %v938_v12 = vadd.f32 %v914_v7, %v424_v4  ;;  %v1447_v4 = vmul.f32 (!%p1445_p13), -1.442695, %v1997_v58  ;;  %v1449_v7 = vmul.f32 (!%p1445_p13), -1.442695, %v2003_v60 }
 0x163   : > { %954 = vst.msk [vmem:[#allocation2 + $0x48] sm:$0xff] %vm945_vm1, %v937_v10  ;;  %v939_v13 = vadd.f32 %v916_v11, %v425_v8  ;;  %v971_v46 = vld [vmem:[#allocation2 + $0x30] sm:$0xff] (!%p1445_p13) }
 0x164   : > { %955 = vst [vmem:[#allocation2 + $0x50] sm:$0xff] %v938_v12  ;;  %v972_v47 = vld [vmem:[#allocation2 + $0x38] sm:$0xff] (!%p1445_p13) }
 0x165   : > { %956 = vst.msk [vmem:[#allocation2 + $0x58] sm:$0xff] %vm945_vm1, %v939_v13  ;;  %v846_v15 = vpop.f32.mrb[12].mxu1  ;;  %v1000_v55 = vmul.f32 (!%p1445_p13), %v1979_v42, %v972_v47 }
 0x166   : > { %v920_v16 = vadd.f32 %v919_v38, %v846_v15  ;;  %v848_v18 = vpop.f32.mrb[13].mxu1  ;;  %v967_v38 = vld [vmem:[#allocation2 + $0x10] sm:$0xff] (!%p1445_p13) }
 0x167   : > { %v922_v19 = vadd.f32 %v921_v41, %v848_v18  ;;  %v850_v21 = vpop.f32.mrb[14].mxu1  ;;  %964 = sbr.rel (%p1445_p13) target bundleno = 423 (0x1a7), region = 70  ;;  %v1977_v41 = vrot.slane (!%p1445_p13), %v981_v32, %v985_v36  ;;  %v2020_v8 = vadd.f32 (!%p1445_p13), %v1983_v44, %v1000_v55 }
 0x168   : > { %v940_v22 = vadd.f32 %v920_v16, %v426_v14  ;;  %v924_v23 = vadd.f32 %v923_v43, %v850_v21  ;;  %v852_v25 = vpop.f32.mrb[15].mxu1  ;;  %v1981_v43 = vrot.slane (!%p1445_p13), %v1009_v33, %v985_v36 }
 0x169   : > { %v941_v26 = vadd.f32 %v922_v19, %v427_v17  ;;  %v926_v27 = vadd.f32 %v925_v45, %v852_v25  ;;  %v970_v45 = vld [vmem:[#allocation2 + $0x28] sm:$0xff] (!%p1445_p13)  ;;  %v993_v48 = vmul.f32 (!%p1445_p13), %v1977_v41, %v965_v34  ;;  %v995_v50 = vmul.f32 (!%p1445_p13), %v1977_v41, %v967_v38  ;;  %v973_v56 = vld [vmem:[#allocation2 + $0x40] sm:$0xff] (!%p1445_p13) }
 0x16a   : > { %957 = vst [vmem:[#allocation2 + $0x60] sm:$0xff] %v940_v22  ;;  %v942_v28 = vadd.f32 %v924_v23, %v428_v20  ;;  %v997_v52 = vmul.f32 (!%p1445_p13), %v1977_v41, %v969_v40  ;;  %v998_v53 = vmul.f32 (!%p1445_p13), %v1979_v42, %v970_v45  ;;  %v999_v54 = vmul.f32 (!%p1445_p13), %v1977_v41, %v971_v46  ;;  %v974_v61 = vld [vmem:[#allocation2 + $0x48] sm:$0xff] (!%p1445_p13) }
 0x16b   : > { %958 = vst.msk [vmem:[#allocation2 + $0x68] sm:$0xff] %vm945_vm1, %v941_v26  ;;  %v943_v29 = vadd.f32 %v926_v27, %v429_v24  ;;  %v1994_v57 = vadd.f32 (!%p1445_p13), %v1981_v43, %v993_v48  ;;  %v2000_v59 = vadd.f32 (!%p1445_p13), %v1981_v43, %v995_v50  ;;  %v975_v1 = vld [vmem:[#allocation2 + $0x50] sm:$0xff] (!%p1445_p13)  ;;  %v1001_v6 = vmul.f32 (!%p1445_p13), %v1977_v41, %v973_v56 }
 0x16c   : > { %959 = vst [vmem:[#allocation2 + $0x70] sm:$0xff] %v942_v28  ;;  %v2006_v62 = vadd.f32 (!%p1445_p13), %v1981_v43, %v997_v52  ;;  %v2009_v63 = vadd.f32 (!%p1445_p13), %v1983_v44, %v998_v53  ;;  %v2012_v0 = vadd.f32 (!%p1445_p13), %v1981_v43, %v999_v54  ;;  %v976_v2 = vld [vmem:[#allocation2 + $0x58] sm:$0xff] (!%p1445_p13)  ;;  %v1002_v9 = vmul.f32 (!%p1445_p13), %v1979_v42, %v974_v61 }
 0x16d   : > { %960 = vst.msk [vmem:[#allocation2 + $0x78] sm:$0xff] %vm945_vm1, %v943_v29  ;;  %v1446_v3 = vmul.f32 (!%p1445_p13), -1.442695, %v1994_v57  ;;  %v1448_v5 = vmul.f32 (!%p1445_p13), -1.442695, %v2000_v59  ;;  %v2026_v13 = vadd.f32 (!%p1445_p13), %v1981_v43, %v1001_v6  ;;  %v1003_v15 = vmul.f32 (!%p1445_p13), %v1977_v41, %v975_v1 }
 0x16e   : > { %v1450_v11 = vmul.f32 -1.442695, %v2006_v62  ;;  %v1451_v12 = vmul.f32 -1.442695, %v2009_v63  ;;  %v2029_v14 = vadd.f32 %v1983_v44, %v1002_v9  ;;  %v1004_v16 = vmul.f32 %v1979_v42, %v976_v2 }
 0x16f   : > { %1647 = vpow2.f32 %v1446_v3  ;;  %v1452_v17 = vmul.f32 -1.442695, %v2012_v0  ;;  %v1453_v19 = vmul.f32 -1.442695, %v2020_v8  ;;  %v2037_v20 = vadd.f32 %v1981_v43, %v1003_v15 }
 0x170   : > { %1649 = vpow2.f32 %v1447_v4  ;;  %v2040_v21 = vadd.f32 %v1983_v44, %v1004_v16  ;;  %v1454_v22 = vmul.f32 -1.442695, %v2026_v13  ;;  %v1455_v24 = vmul.f32 -1.442695, %v2029_v14 }
 0x171   : > { %v977_v10 = vld [vmem:[#allocation2 + $0x60] sm:$0xff]  ;;  %1651 = vpow2.f32 %v1448_v5  ;;  %v1456_v25 = vmul.f32 -1.442695, %v2037_v20 }
 0x172   : > { %v1005_v18 = vmul.f32 %v1977_v41, %v977_v10  ;;  %1653 = vpow2.f32 %v1449_v7  ;;  %v1457_v26 = vmul.f32 -1.442695, %v2040_v21  ;;  %v978_v29 = vld [vmem:[#allocation2 + $0x68] sm:$0xff] }
 0x173   : > { %1655 = vpow2.f32 %v1450_v11  ;;  %v979_v34 = vld [vmem:[#allocation2 + $0x70] sm:$0xff]  ;;  %v1006_v37 = vmul.f32 %v1979_v42, %v978_v29 }
 0x174   : > { %v2044_v23 = vadd.f32 %v1981_v43, %v1005_v18  ;;  %1657 = vpow2.f32 %v1451_v12  ;;  %v980_v38 = vld [vmem:[#allocation2 + $0x78] sm:$0xff]  ;;  %v1007_v47 = vmul.f32 %v1977_v41, %v979_v34 }
 0x175   : > { %1659 = vpow2.f32 %v1452_v17  ;;  %v1008_v50 = vmul.f32 %v1979_v42, %v980_v38  ;;  %v2054_v53 = vadd.f32 %v1983_v44, %v1006_v37 }
 0x176   : > { %1661 = vpow2.f32 %v1453_v19  ;;  %v1458_v27 = vmul.f32 -1.442695, %v2044_v23  ;;  %v2057_v1 = vadd.f32 %v1981_v43, %v1007_v47 }
 0x177   : > { %1663 = vpow2.f32 %v1454_v22  ;;  %v2060_v42 = vadd.f32 %v1983_v44, %v1008_v50  ;;  %v1459_v5 = vmul.f32 -1.442695, %v2054_v53 }
 0x178   : > { %1665 = vpow2.f32 %v1455_v24  ;;  %v1460_v43 = vmul.f32 -1.442695, %v2057_v1 }
 0x179   : > { %v1648_v28 = vpop.eup %1647  ;;  %1667 = vpow2.f32 %v1456_v25  ;;  %v1461_v44 = vmul.f32 -1.442695, %v2060_v42 }
 0x17a   : > { %v1650_v30 = vpop.eup %1649  ;;  %v1085_v31 = vadd.f32 1.0, %v1648_v28  ;;  %1669 = vpow2.f32 %v1457_v26 }
 0x17b   : > { %v1652_v32 = vpop.eup %1651  ;;  %v1086_v33 = vadd.f32 1.0, %v1650_v30  ;;  %1671 = vpow2.f32 %v1458_v27 }
 0x17c   : > { %v1654_v35 = vpop.eup %1653  ;;  %1673 = vrcp.f32 %v1085_v31  ;;  %v1087_v36 = vadd.f32 1.0, %v1652_v32 }
 0x17d   : > { %v1656_v39 = vpop.eup %1655  ;;  %1675 = vrcp.f32 %v1086_v33  ;;  %v1088_v40 = vadd.f32 1.0, %v1654_v35 }
 0x17e   : > { %v1658_v45 = vpop.eup %1657  ;;  %1677 = vrcp.f32 %v1087_v36  ;;  %v1089_v46 = vadd.f32 1.0, %v1656_v39 }
 0x17f   : > { %v1660_v48 = vpop.eup %1659  ;;  %1679 = vrcp.f32 %v1088_v40  ;;  %v1090_v49 = vadd.f32 1.0, %v1658_v45 }
 0x180   : > { %v1662_v51 = vpop.eup %1661  ;;  %1681 = vrcp.f32 %v1089_v46  ;;  %v1091_v52 = vadd.f32 1.0, %v1660_v48 }
 0x181   : > { %v1664_v54 = vpop.eup %1663  ;;  %1683 = vrcp.f32 %v1090_v49  ;;  %v1092_v55 = vadd.f32 1.0, %v1662_v51 }
 0x182   : > { %v1666_v56 = vpop.eup %1665  ;;  %1685 = vrcp.f32 %v1091_v52  ;;  %v1093_v61 = vadd.f32 1.0, %v1664_v54 }
 0x183   : > { %v1668_v41 = vpop.eup %1667  ;;  %1687 = vrcp.f32 %v1092_v55  ;;  %v1094_v2 = vadd.f32 1.0, %v1666_v56 }
 0x184   : > { %v1670_v3 = vpop.eup %1669  ;;  %1689 = vrcp.f32 %v1093_v61  ;;  %v1095_v4 = vadd.f32 1.0, %v1668_v41 }
 0x185   : > { %v1672_v6 = vpop.eup %1671  ;;  %1691 = vrcp.f32 %v1094_v2  ;;  %v1096_v7 = vadd.f32 1.0, %v1670_v3 }
 0x186   : > { %v1674_v9 = vpop.eup %1673  ;;  %1693 = vrcp.f32 %v1095_v4  ;;  %v1097_v29 = vadd.f32 1.0, %v1672_v6 }
 0x187   : > { %v1676_v10 = vpop.eup %1675  ;;  %v1133_v11 = vmul.f32 %v1674_v9, %v1994_v57  ;;  %1695 = vrcp.f32 %v1096_v7 }
 0x188   : > { %v1678_v12 = vpop.eup %1677  ;;  %v1134_v15 = vmul.f32 %v1676_v10, %v1997_v58  ;;  %1697 = vpow2.f32 %v1459_v5 }
 0x189   : > { %v1680_v16 = vpop.eup %1679  ;;  %v1135_v18 = vmul.f32 %v1678_v12, %v2000_v59  ;;  %1699 = vpow2.f32 %v1460_v43 }
 0x18a   : > { %v1682_v19 = vpop.eup %1681  ;;  %v1474_v22 = vpack.c.bf16 %v1134_v15, %v1133_v11  ;;  %v1136_v57 = vmul.f32 %v1680_v16, %v2003_v60  ;;  %1701 = vpow2.f32 %v1461_v44 }
 0x18b   : > { %v1684_v24 = vpop.eup %1683  ;;  %v1137_v25 = vmul.f32 %v1682_v19, %v2006_v62  ;;  %1703 = vrcp.f32 %v1097_v29 }
 0x18c   : > { %v1686_v58 = vpop.eup %1685  ;;  %1200 = vst.msk [vmem:[%s1885_s8] sm:$0xff] %vm2067_vm4, %v1474_v22  ;;  %v1475_v26 = vpack.c.bf16 %v1136_v57, %v1135_v18  ;;  %v1138_v27 = vmul.f32 %v1684_v24, %v2009_v63 }
 0x18d   : > { %v1688_v28 = vpop.eup %1687  ;;  %v1139_v59 = vmul.f32 %v1686_v58, %v2012_v0 }
 0x18e   : > { %v1690_v30 = vpop.eup %1689  ;;  %1201 = vst.msk [vmem:[%s1885_s8 + $0x8] sm:$0xff] %vm2067_vm4, %v1475_v26  ;;  %v1476_v60 = vpack.c.bf16 %v1138_v27, %v1137_v25  ;;  %v1140_v62 = vmul.f32 %v1688_v28, %v2020_v8 }
 0x18f   : > { %v1692_v31 = vpop.eup %1691  ;;  %v1141_v32 = vmul.f32 %v1690_v30, %v2026_v13 }
 0x190   : > { %v1694_v33 = vpop.eup %1693  ;;  %1202 = vst.msk [vmem:[%s1885_s8 + $0x10] sm:$0xff] %vm2067_vm4, %v1476_v60  ;;  %v1477_v63 = vpack.c.bf16 %v1140_v62, %v1139_v59  ;;  %v1142_v0 = vmul.f32 %v1692_v31, %v2029_v14 }
 0x191   : > { %v1696_v34 = vpop.eup %1695  ;;  %v1143_v35 = vmul.f32 %v1694_v33, %v2037_v20 }
 0x192   : > { %v1698_v36 = vpop.eup %1697  ;;  %1203 = vst.msk [vmem:[%s1885_s8 + $0x18] sm:$0xff] %vm2067_vm4, %v1477_v63  ;;  %v1478_v8 = vpack.c.bf16 %v1142_v0, %v1141_v32  ;;  %v1144_v37 = vmul.f32 %v1696_v34, %v2040_v21 }
 0x193   : > { %v1098_v13 = vadd.f32 1.0, %v1698_v36  ;;  %v1700_v38 = vpop.eup %1699 }
 0x194   : > { %1204 = vst.msk [vmem:[%s1885_s8 + $0x20] sm:$0xff] %vm2067_vm4, %v1478_v8  ;;  %v1479_v39 = vpack.c.bf16 %v1144_v37, %v1143_v35  ;;  %v1702_v40 = vpop.eup %1701  ;;  %v1099_v14 = vadd.f32 1.0, %v1700_v38 }
 0x195   : > { %1705 = vrcp.f32 %v1098_v13  ;;  %v1100_v20 = vadd.f32 1.0, %v1702_v40  ;;  %v1704_v45 = vpop.eup %1703 }
 0x196   : > { %1205 = vst.msk [vmem:[%s1885_s8 + $0x28] sm:$0xff] %vm2067_vm4, %v1479_v39  ;;  %1707 = vrcp.f32 %v1099_v14  ;;  %v1145_v21 = vmul.f32 %v1704_v45, %v2044_v23 }
 0x197   : > { %1709 = vrcp.f32 %v1100_v20 }
 0x19f   : > { %v1706_v46 = vpop.eup %1705 }
 0x1a0   : > { %v1146_v47 = vmul.f32 %v1706_v46, %v2054_v53  ;;  %v1708_v48 = vpop.eup %1707 }
 0x1a1   : > { %v1710_v49 = vpop.eup %1709  ;;  %v1147_v51 = vmul.f32 %v1708_v48, %v2057_v1 }
 0x1a2   : > { %v1480_v50 = vpack.c.bf16 %v1146_v47, %v1145_v21  ;;  %v1148_v52 = vmul.f32 %v1710_v49, %v2060_v42 }
 0x1a4   : > { %1206 = vst.msk [vmem:[%s1885_s8 + $0x30] sm:$0xff] %vm2067_vm4, %v1480_v50  ;;  %v1481_v54 = vpack.c.bf16 %v1148_v52, %v1147_v51 }
 0x1a6   : > { %1207 = vst.msk [vmem:[%s1885_s8 + $0x38] sm:$0xff] %vm2067_vm4, %v1481_v54 }
 0x1a7 PF: > { %s14_s21 = sadd.s32 1, %s1765_s21   ;;  %s2137_s15 = smov %s1745_s16 }
 0x1a8   : > { %p11_p0 = scmp.ge.s32.totalorder %s14_s21, 8   ;;  %s2138_s16 = smov %s1845_s28 }
 0x1a9   : > { %s2139_s17 = smov %s1757_s19  ;;  %s2140_s18 = smov %s1761_s20 }
 0x1aa   : > { %s2141_s19 = smov %s2144_s22  ;;  %s2142_s20 = smov %s2148_s23 }
 0x1ab   :  { %13 = sbr.rel (!%p11_p0) target bundleno = 4 (0x4), region = 120 }

</bundles_post_ra>
